<compile_context>
chip_gen: v6e
topology: v6e:2x2x1
jax: 0.10.0
libtpu: 0.0.40
codegen_flags: <defaults>
</compile_context>

<pallas_src>
import jax
import jax.numpy as jnp
from jax import lax
from jax.experimental import pallas as pl
from jax.experimental.pallas import tpu as pltpu


# Per-image padded grid widths on the lane axis.
_BLK1 = 512     # stage-1: 22*22 = 484 grid cells, padded to a multiple of 128
_BLK2 = 128     # stage-2: 11*11 = 121 grid cells, padded to a multiple of 128

# Row layout of the packed bf16 parameter/selection slab.
_R_W2 = 0       # (16, 128)  conv2 weights, column 8*(3*ky+kx) + cin
_R_S1 = 16      # (384, 128) pool1 per-image 0/1 selection
_R_S2 = 400     # (80, 128)  pool2 per-image 0/1 selection
_R_FW1 = 480    # (256, 128) fc1 weight (rows = NCHW-flatten index 16*c + s)
_R_FW2 = 736    # (128, 128) fc2 weight (output cols 84.. zero padded)
_R_FW3 = 864    # (2, 128)   fc3 weight, transposed, cols 84.. zero padded
_R_END = 872


# ----------------------------------------------------------------------------
# The fused whole-network kernel.
# ----------------------------------------------------------------------------
def _net_kernel(xfp_ref, m12_ref, pf32_ref, pbf_ref, out_ref,
                y1_sc, cm1_sc, p1_sc, k2_sc, y2_sc, cm2_sc, flat_sc):
    f32, bf16 = jnp.float32, jnp.bfloat16
    n_img = out_ref.shape[0]
    nw1 = y1_sc.shape[1]            # n_img * 512
    nw2 = y2_sc.shape[1]            # n_img * 128

    # --- conv1 (1->6, 5x5, pad 3) + bias + ReLU: 25 shifted rank-1 VPU updates.
    w1 = pf32_ref[0:6, 0:25]                              # (6, 25)
    b1 = pf32_ref[0:6, 32:33]                             # (6, 1)
    acc1 = jnp.zeros((6, nw1), f32)
    for ky in range(5):
        for kx in range(5):
            off = 18 + 22 * ky + kx                       # 64 (guard) - 46 + shift
            xs = xfp_ref[0:1, off:off + nw1]              # (1, nw1)
            acc1 = acc1 + w1[:, 5 * ky + kx:5 * ky + kx + 1] * xs
    m1 = m12_ref[0:1, 0:nw1]
    # mask zeroes grid-padding / invalid columns (valid because ReLU >= 0).
    y1_sc[...] = jnp.maximum(acc1 + b1, 0.0) * m1

    # --- pool1 (5x5, stride 2, pad 2): SEPARABLE stride-1 window max
    #     (4 column-shift maxima, then 4 row-shift maxima).
    wc = nw1 - 4
    cm = y1_sc[:, 0:wc]
    for dx in range(1, 5):
        cm = jnp.maximum(cm, y1_sc[:, dx:dx + wc])
    cm1_sc[:, 0:wc] = cm
    wd = nw1 - 92
    dm1 = cm1_sc[:, 0:wd]
    for dy in range(1, 5):
        dm1 = jnp.maximum(dm1, cm1_sc[:, 22 * dy:22 * dy + wd])

    # stride-2 downsample + re-embed on the 11x11 grid: per-image bf16
    # selection matmul with a batch-independent (384, 128) 0/1 matrix.
    s1p = pbf_ref[_R_S1:_R_S2, :]                         # (384, 128) bf16
    p1_sc[...] = jnp.zeros_like(p1_sc)                    # also zero guard block
    for n in range(n_img):
        dm1n = dm1[:, n * _BLK1:n * _BLK1 + 384].astype(bf16)
        p1_sc[:, n * _BLK2:(n + 1) * _BLK2] = jnp.dot(
            dm1n, s1p, preferred_element_type=f32).astype(bf16)

    # --- conv2 (6->16, 3x3, valid) as ONE stacked bf16 MXU matmul:
    #     stage the 9 shifted (6, nw2) slabs into rows 8*t .. 8*t+5 of k2_sc.
    k2_sc[...] = jnp.zeros_like(k2_sc)
    for t in range(9):                                    # t = 3*ky + kx
        ky, kx = t // 3, t % 3
        shift = 11 * ky + kx
        k2_sc[8 * t:8 * t + 6, :] = p1_sc[:, shift:shift + nw2]
    w2 = pbf_ref[_R_W2:_R_W2 + 16, :]                     # (16, 128) bf16
    acc2 = jnp.dot(w2, k2_sc[...], preferred_element_type=f32)   # (16, nw2) f32
    b2 = pf32_ref[0:16, 33:34]                            # (16, 1)
    m2 = m12_ref[0:1, nw1:nw1 + nw2]
    y2_sc[...] = jnp.maximum(acc2 + b2, 0.0) * m2

    # --- pool2 (separable) + selection + NCHW flatten, per image.
    s2p = pbf_ref[_R_S2:_R_FW1, :]                        # (80, 128) bf16
    for n in range(n_img):
        base = n * _BLK2
        c2 = y2_sc[:, base:base + 124]
        for dx in range(1, 5):
            c2 = jnp.maximum(c2, y2_sc[:, base + dx:base + dx + 124])
        cm2_sc[:, 0:124] = c2
        dm2 = cm2_sc[:, 0:80]
        for dy in range(1, 5):
            dm2 = jnp.maximum(dm2, cm2_sc[:, 11 * dy:11 * dy + 80])
        p2n = jnp.dot(dm2.astype(bf16), s2p, preferred_element_type=f32)  # (16,128)
        for c in range(16):                               # NCHW flatten (see TODO)
            flat_sc[n:n + 1, 16 * c:16 * c + 16] = p2n[c:c + 1, 0:16]

    # --- fc1/fc2/fc3 + EXACT softmax (bf16 MXU operands, f32 epilogue).
    fw1 = pbf_ref[_R_FW1:_R_FW2, :]                       # (256, 128)
    fw2 = pbf_ref[_R_FW2:_R_FW3, :]                       # (128, 128), cols 84.. = 0
    fw3t = pbf_ref[_R_FW3:_R_FW3 + 2, :]                  # (2, 128) transposed fc3
    fb1 = pf32_ref[16:17, :]
    fb2 = pf32_ref[17:18, :]                              # cols 84.. are zero
    fb3 = pf32_ref[18:19, 0:2]
    flat = flat_sc[...].astype(bf16)
    h1 = jnp.maximum(jnp.dot(flat, fw1, preferred_element_type=f32) + fb1, 0.0)
    h2 = jnp.maximum(jnp.dot(h1.astype(bf16), fw2, preferred_element_type=f32) + fb2, 0.0)
    logits = lax.dot_general(h2.astype(bf16), fw3t,
                             dimension_numbers=(((1,), (1,)), ((), ())),
                             preferred_element_type=f32) + fb3
    z = logits - jnp.max(logits, axis=-1, keepdims=True)
    e = jnp.exp(z)
    out_ref[...] = (e / jnp.sum(e, axis=-1, keepdims=True)).astype(out_ref.dtype)


# ----------------------------------------------------------------------------
# Wrapper: packs parameters/masks into 4 DMAs and calls the kernel.
# ----------------------------------------------------------------------------
def _pack_inputs(params, x_nchw):
    f32 = jnp.float32
    n_img = x_nchw.shape[0]

    # Conv-padded input embedded in per-image 512-lane blocks + 64-lane guards.
    xpad = jnp.pad(x_nchw.astype(f32)[:, 0], ((0, 0), (3, 3), (3, 3)))   # (N,22,22)
    xemb = jnp.zeros((n_img, _BLK1), f32).at[:, 0:484].set(xpad.reshape(n_img, 484))
    xfp = jnp.pad(xemb.reshape(1, n_img * _BLK1), ((0, 0), (64, 64)))

    # Validity masks for the two padded grids, concatenated on the lane axis.
    a, b = jnp.meshgrid(jnp.arange(2, 20), jnp.arange(2, 20), indexing="ij")
    m1 = jnp.zeros((n_img, _BLK1), f32).at[:, (22 * a + b).ravel()].set(1.0)
    a, b = jnp.meshgrid(jnp.arange(2, 9), jnp.arange(2, 9), indexing="ij")
    m2 = jnp.zeros((n_img, _BLK2), f32).at[:, (11 * a + b).ravel()].set(1.0)
    m12 = jnp.concatenate([m1.reshape(1, -1), m2.reshape(1, -1)], axis=1)

    # Small f32 parameters packed into one (24, 128) slab.
    pf32 = jnp.zeros((24, 128), f32)
    pf32 = pf32.at[0:6, 0:25].set(params["conv1_w"].reshape(6, 25))
    pf32 = pf32.at[0:6, 32].set(params["conv1_b"])
    pf32 = pf32.at[0:16, 33].set(params["conv2_b"])
    pf32 = pf32.at[16, :].set(params["fc1_b"])
    pf32 = pf32.at[17, 0:84].set(params["fc2_b"])
    pf32 = pf32.at[18, 0:2].set(params["fc3_b"])

    # bf16 weights + constant 0/1 selection tables packed into one (872, 128) slab.
    w2p = jnp.zeros((16, 9, 8), f32).at[:, :, 0:6].set(
        jnp.transpose(params["conv2_w"], (0, 2, 3, 1)).reshape(16, 9, 6)
    ).reshape(16, 72)
    w2p = jnp.pad(w2p, ((0, 0), (0, 56)))                                 # (16, 128)

    i, j = jnp.meshgrid(jnp.arange(9), jnp.arange(9), indexing="ij")
    s1p = jnp.zeros((384, 128), f32).at[
        (44 * i + 2 * j).ravel(), (11 * (i + 2) + (j + 2)).ravel()].set(1.0)
    i, j = jnp.meshgrid(jnp.arange(4), jnp.arange(4), indexing="ij")
    s2p = jnp.zeros((80, 128), f32).at[
        (22 * i + 2 * j).ravel(), (4 * i + j).ravel()].set(1.0)

    pbf = jnp.concatenate([
        w2p,                                              # rows   0:16
        s1p,                                              # rows  16:400
        s2p,                                              # rows 400:480
        params["fc1_w"],                                  # rows 480:736
        jnp.pad(params["fc2_w"], ((0, 0), (0, 44))),      # rows 736:864
        jnp.pad(params["fc3_w"].T, ((0, 6), (0, 44))),    # rows 864:872
    ], axis=0).astype(jnp.bfloat16)

    return xfp, m12, pf32, pbf


@jax.jit
def net_forward(params, x_nchw):
    n_img, c_in, h, w = x_nchw.shape
    assert c_in == 1 and h == 16 and w == 16
    assert params["fc1_w"].shape == (256, 128)
    f32, bf16 = jnp.float32, jnp.bfloat16

    xfp, m12, pf32, pbf = _pack_inputs(params, x_nchw)
    vmem = pl.BlockSpec(memory_space=pltpu.MemorySpace.VMEM)
    return pl.pallas_call(
        _net_kernel,
        out_shape=jax.ShapeDtypeStruct((n_img, 2), f32),
        in_specs=[vmem] * 4,
        out_specs=vmem,
        scratch_shapes=[
            pltpu.VMEM((6, n_img * _BLK1), f32),           # conv1+relu output
            pltpu.VMEM((6, n_img * _BLK1), f32),           # pool1 column-max stage
            pltpu.VMEM((6, (n_img + 1) * _BLK2), bf16),    # pool1 output (+ zero guard)
            pltpu.VMEM((128, n_img * _BLK2), bf16),        # conv2 stacked-tap operand
            pltpu.VMEM((16, n_img * _BLK2), f32),          # conv2+relu output
            pltpu.VMEM((16, _BLK2), f32),                  # pool2 column-max (per image)
            pltpu.VMEM((n_img, 256), f32),                 # NCHW-flattened fc1 input
        ],
    )(xfp, m12, pf32, pbf)


# ----------------------------------------------------------------------------
# Pure-XLA reference (only for the in-script numerical self-check).
# ----------------------------------------------------------------------------
def _maxpool_ref(x):
    return lax.reduce_window(x, -jnp.inf, lax.max, (1, 1, 5, 5), (1, 1, 2, 2),
                             ((0, 0), (0, 0), (2, 2), (2, 2)))


def net_reference(params, x_nchw):
    dn = ("NCHW", "OIHW", "NCHW")
    x = x_nchw.astype(jnp.float32)
    y = lax.conv_general_dilated(x, params["conv1_w"], (1, 1), ((3, 3), (3, 3)),
                                 dimension_numbers=dn)
    y = _maxpool_ref(jax.nn.relu(y + params["conv1_b"].reshape(1, -1, 1, 1)))
    y = lax.conv_general_dilated(y, params["conv2_w"], (1, 1), "VALID",
                                 dimension_numbers=dn)
    y = _maxpool_ref(jax.nn.relu(y + params["conv2_b"].reshape(1, -1, 1, 1)))
    f = y.reshape(y.shape[0], -1)
    f = jax.nn.relu(f @ params["fc1_w"] + params["fc1_b"])
    f = jax.nn.relu(f @ params["fc2_w"] + params["fc2_b"])
    return jax.nn.softmax(f @ params["fc3_w"] + params["fc3_b"], axis=-1)


# ----------------------------------------------------------------------------
# Parameters (deterministic, PyTorch-style uniform fan-in init)
# ----------------------------------------------------------------------------
def init_params(key, flat_features):
    keys = jax.random.split(key, 10)

    def u(k, shape, fan_in):
        bound = 1.0 / jnp.sqrt(jnp.float32(fan_in))
        return jax.random.uniform(k, shape, jnp.float32, -bound, bound)

    return {
        "conv1_w": u(keys[0], (6, 1, 5, 5), 1 * 5 * 5),
        "conv1_b": u(keys[1], (6,), 1 * 5 * 5),
        "conv2_w": u(keys[2], (16, 6, 3, 3), 6 * 3 * 3),
        "conv2_b": u(keys[3], (16,), 6 * 3 * 3),
        "fc1_w": u(keys[4], (flat_features, 128), flat_features),
        "fc1_b": u(keys[5], (128,), flat_features),
        "fc2_w": u(keys[6], (128, 84), 128),
        "fc2_b": u(keys[7], (84,), 128),
        "fc3_w": u(keys[8], (84, 2), 84),
        "fc3_b": u(keys[9], (2,), 84),
    }


if __name__ == "__main__":
    key = jax.random.PRNGKey(0)
    kx_, kp_ = jax.random.split(key)

    # NCHW input, in_channels=1 (as required by conv1), small spatial size.
    # Shape trace: conv1(p=3,k=5): 16->18 ; pool(k5,s2,p2): 18->9 ;
    #              conv2(k=3): 9->7 ; pool: 7->4  => flat = 16*4*4 = 256
    x = jax.random.normal(kx_, (2, 1, 16, 16), jnp.float32)
    params = init_params(kp_, 16 * 4 * 4)

    out = jax.block_until_ready(net_forward(params, x))
    ref = jax.block_until_ready(net_reference(params, x))

    assert out.shape == (2, 2)
    assert bool(jnp.all(jnp.isfinite(out)))
    # exact softmax divide -> rows sum to 1 up to f32 rounding.
    assert bool(jnp.allclose(jnp.sum(out, axis=-1), 1.0, atol=1e-3))
    # bf16 MXU operands -> loose but bug-catching tolerance vs f32 reference.
    assert bool(jnp.allclose(out, ref, atol=5e-2))
    print("KERNEL_OK")
</pallas_src>

<mosaic_0001>
module attributes {stable_mosaic.version = 11 : i64} {
  func.func @_net_kernel(%arg0: memref<1x1152xf32, #tpu.memory_space<vmem>>, %arg1: memref<1x1280xf32, #tpu.memory_space<vmem>>, %arg2: memref<24x128xf32, #tpu.memory_space<vmem>>, %arg3: memref<872x128xbf16, #tpu.memory_space<vmem>>, %arg4: memref<2x2xf32, #tpu.memory_space<vmem>>, %arg5: memref<6x1024xf32, #tpu.memory_space<vmem>>, %arg6: memref<6x1024xf32, #tpu.memory_space<vmem>>, %arg7: memref<6x384xbf16, #tpu.memory_space<vmem>>, %arg8: memref<128x256xbf16, #tpu.memory_space<vmem>>, %arg9: memref<16x256xf32, #tpu.memory_space<vmem>>, %arg10: memref<16x128xf32, #tpu.memory_space<vmem>>, %arg11: memref<2x256xf32, #tpu.memory_space<vmem>>) attributes {dimension_semantics = [], scalar_prefetch = 0 : i64, scratch_operands = 7 : i64, tpu.core_type = #tpu.core_type<tc>} {
    %c0 = arith.constant 0 : index
    %c0_0 = arith.constant 0 : index
    %0 = vector.load %arg2[%c0, %c0_0] : memref<24x128xf32, #tpu.memory_space<vmem>>, vector<6x25xf32>
    %c0_1 = arith.constant 0 : index
    %c32 = arith.constant 32 : index
    %1 = vector.load %arg2[%c0_1, %c32] : memref<24x128xf32, #tpu.memory_space<vmem>>, vector<6x1xf32>
    %cst = arith.constant 0.000000e+00 : f32
    %2 = vector.broadcast %cst : f32 to vector<6x1024xf32>
    %c0_2 = arith.constant 0 : index
    %c18 = arith.constant 18 : index
    %3 = vector.load %arg0[%c0_2, %c18] : memref<1x1152xf32, #tpu.memory_space<vmem>>, vector<1x1024xf32>
    %4 = vector.extract_strided_slice %0 {offsets = [0, 0], sizes = [6, 1], strides = [1, 1]} : vector<6x25xf32> to vector<6x1xf32>
    %5 = vector.broadcast %4 : vector<6x1xf32> to vector<6x1024xf32>
    %6 = vector.broadcast %3 : vector<1x1024xf32> to vector<6x1024xf32>
    %7 = arith.mulf %5, %6 : vector<6x1024xf32>
    %8 = arith.addf %2, %7 : vector<6x1024xf32>
    %c0_3 = arith.constant 0 : index
    %c19 = arith.constant 19 : index
    %9 = vector.load %arg0[%c0_3, %c19] : memref<1x1152xf32, #tpu.memory_space<vmem>>, vector<1x1024xf32>
    %10 = vector.extract_strided_slice %0 {offsets = [0, 1], sizes = [6, 1], strides = [1, 1]} : vector<6x25xf32> to vector<6x1xf32>
    %11 = vector.broadcast %10 : vector<6x1xf32> to vector<6x1024xf32>
    %12 = vector.broadcast %9 : vector<1x1024xf32> to vector<6x1024xf32>
    %13 = arith.mulf %11, %12 : vector<6x1024xf32>
    %14 = arith.addf %8, %13 : vector<6x1024xf32>
    %c0_4 = arith.constant 0 : index
    %c20 = arith.constant 20 : index
    %15 = vector.load %arg0[%c0_4, %c20] : memref<1x1152xf32, #tpu.memory_space<vmem>>, vector<1x1024xf32>
    %16 = vector.extract_strided_slice %0 {offsets = [0, 2], sizes = [6, 1], strides = [1, 1]} : vector<6x25xf32> to vector<6x1xf32>
    %17 = vector.broadcast %16 : vector<6x1xf32> to vector<6x1024xf32>
    %18 = vector.broadcast %15 : vector<1x1024xf32> to vector<6x1024xf32>
    %19 = arith.mulf %17, %18 : vector<6x1024xf32>
    %20 = arith.addf %14, %19 : vector<6x1024xf32>
    %c0_5 = arith.constant 0 : index
    %c21 = arith.constant 21 : index
    %21 = vector.load %arg0[%c0_5, %c21] : memref<1x1152xf32, #tpu.memory_space<vmem>>, vector<1x1024xf32>
    %22 = vector.extract_strided_slice %0 {offsets = [0, 3], sizes = [6, 1], strides = [1, 1]} : vector<6x25xf32> to vector<6x1xf32>
    %23 = vector.broadcast %22 : vector<6x1xf32> to vector<6x1024xf32>
    %24 = vector.broadcast %21 : vector<1x1024xf32> to vector<6x1024xf32>
    %25 = arith.mulf %23, %24 : vector<6x1024xf32>
    %26 = arith.addf %20, %25 : vector<6x1024xf32>
    %c0_6 = arith.constant 0 : index
    %c22 = arith.constant 22 : index
    %27 = vector.load %arg0[%c0_6, %c22] : memref<1x1152xf32, #tpu.memory_space<vmem>>, vector<1x1024xf32>
    %28 = vector.extract_strided_slice %0 {offsets = [0, 4], sizes = [6, 1], strides = [1, 1]} : vector<6x25xf32> to vector<6x1xf32>
    %29 = vector.broadcast %28 : vector<6x1xf32> to vector<6x1024xf32>
    %30 = vector.broadcast %27 : vector<1x1024xf32> to vector<6x1024xf32>
    %31 = arith.mulf %29, %30 : vector<6x1024xf32>
    %32 = arith.addf %26, %31 : vector<6x1024xf32>
    %c0_7 = arith.constant 0 : index
    %c40 = arith.constant 40 : index
    %33 = vector.load %arg0[%c0_7, %c40] : memref<1x1152xf32, #tpu.memory_space<vmem>>, vector<1x1024xf32>
    %34 = vector.extract_strided_slice %0 {offsets = [0, 5], sizes = [6, 1], strides = [1, 1]} : vector<6x25xf32> to vector<6x1xf32>
    %35 = vector.broadcast %34 : vector<6x1xf32> to vector<6x1024xf32>
    %36 = vector.broadcast %33 : vector<1x1024xf32> to vector<6x1024xf32>
    %37 = arith.mulf %35, %36 : vector<6x1024xf32>
    %38 = arith.addf %32, %37 : vector<6x1024xf32>
    %c0_8 = arith.constant 0 : index
    %c41 = arith.constant 41 : index
    %39 = vector.load %arg0[%c0_8, %c41] : memref<1x1152xf32, #tpu.memory_space<vmem>>, vector<1x1024xf32>
    %40 = vector.extract_strided_slice %0 {offsets = [0, 6], sizes = [6, 1], strides = [1, 1]} : vector<6x25xf32> to vector<6x1xf32>
    %41 = vector.broadcast %40 : vector<6x1xf32> to vector<6x1024xf32>
    %42 = vector.broadcast %39 : vector<1x1024xf32> to vector<6x1024xf32>
    %43 = arith.mulf %41, %42 : vector<6x1024xf32>
    %44 = arith.addf %38, %43 : vector<6x1024xf32>
    %c0_9 = arith.constant 0 : index
    %c42 = arith.constant 42 : index
    %45 = vector.load %arg0[%c0_9, %c42] : memref<1x1152xf32, #tpu.memory_space<vmem>>, vector<1x1024xf32>
    %46 = vector.extract_strided_slice %0 {offsets = [0, 7], sizes = [6, 1], strides = [1, 1]} : vector<6x25xf32> to vector<6x1xf32>
    %47 = vector.broadcast %46 : vector<6x1xf32> to vector<6x1024xf32>
    %48 = vector.broadcast %45 : vector<1x1024xf32> to vector<6x1024xf32>
    %49 = arith.mulf %47, %48 : vector<6x1024xf32>
    %50 = arith.addf %44, %49 : vector<6x1024xf32>
    %c0_10 = arith.constant 0 : index
    %c43 = arith.constant 43 : index
    %51 = vector.load %arg0[%c0_10, %c43] : memref<1x1152xf32, #tpu.memory_space<vmem>>, vector<1x1024xf32>
    %52 = vector.extract_strided_slice %0 {offsets = [0, 8], sizes = [6, 1], strides = [1, 1]} : vector<6x25xf32> to vector<6x1xf32>
    %53 = vector.broadcast %52 : vector<6x1xf32> to vector<6x1024xf32>
    %54 = vector.broadcast %51 : vector<1x1024xf32> to vector<6x1024xf32>
    %55 = arith.mulf %53, %54 : vector<6x1024xf32>
    %56 = arith.addf %50, %55 : vector<6x1024xf32>
    %c0_11 = arith.constant 0 : index
    %c44 = arith.constant 44 : index
    %57 = vector.load %arg0[%c0_11, %c44] : memref<1x1152xf32, #tpu.memory_space<vmem>>, vector<1x1024xf32>
    %58 = vector.extract_strided_slice %0 {offsets = [0, 9], sizes = [6, 1], strides = [1, 1]} : vector<6x25xf32> to vector<6x1xf32>
    %59 = vector.broadcast %58 : vector<6x1xf32> to vector<6x1024xf32>
    %60 = vector.broadcast %57 : vector<1x1024xf32> to vector<6x1024xf32>
    %61 = arith.mulf %59, %60 : vector<6x1024xf32>
    %62 = arith.addf %56, %61 : vector<6x1024xf32>
    %c0_12 = arith.constant 0 : index
    %c62 = arith.constant 62 : index
    %63 = vector.load %arg0[%c0_12, %c62] : memref<1x1152xf32, #tpu.memory_space<vmem>>, vector<1x1024xf32>
    %64 = vector.extract_strided_slice %0 {offsets = [0, 10], sizes = [6, 1], strides = [1, 1]} : vector<6x25xf32> to vector<6x1xf32>
    %65 = vector.broadcast %64 : vector<6x1xf32> to vector<6x1024xf32>
    %66 = vector.broadcast %63 : vector<1x1024xf32> to vector<6x1024xf32>
    %67 = arith.mulf %65, %66 : vector<6x1024xf32>
    %68 = arith.addf %62, %67 : vector<6x1024xf32>
    %c0_13 = arith.constant 0 : index
    %c63 = arith.constant 63 : index
    %69 = vector.load %arg0[%c0_13, %c63] : memref<1x1152xf32, #tpu.memory_space<vmem>>, vector<1x1024xf32>
    %70 = vector.extract_strided_slice %0 {offsets = [0, 11], sizes = [6, 1], strides = [1, 1]} : vector<6x25xf32> to vector<6x1xf32>
    %71 = vector.broadcast %70 : vector<6x1xf32> to vector<6x1024xf32>
    %72 = vector.broadcast %69 : vector<1x1024xf32> to vector<6x1024xf32>
    %73 = arith.mulf %71, %72 : vector<6x1024xf32>
    %74 = arith.addf %68, %73 : vector<6x1024xf32>
    %c0_14 = arith.constant 0 : index
    %c64 = arith.constant 64 : index
    %75 = vector.load %arg0[%c0_14, %c64] : memref<1x1152xf32, #tpu.memory_space<vmem>>, vector<1x1024xf32>
    %76 = vector.extract_strided_slice %0 {offsets = [0, 12], sizes = [6, 1], strides = [1, 1]} : vector<6x25xf32> to vector<6x1xf32>
    %77 = vector.broadcast %76 : vector<6x1xf32> to vector<6x1024xf32>
    %78 = vector.broadcast %75 : vector<1x1024xf32> to vector<6x1024xf32>
    %79 = arith.mulf %77, %78 : vector<6x1024xf32>
    %80 = arith.addf %74, %79 : vector<6x1024xf32>
    %c0_15 = arith.constant 0 : index
    %c65 = arith.constant 65 : index
    %81 = vector.load %arg0[%c0_15, %c65] : memref<1x1152xf32, #tpu.memory_space<vmem>>, vector<1x1024xf32>
    %82 = vector.extract_strided_slice %0 {offsets = [0, 13], sizes = [6, 1], strides = [1, 1]} : vector<6x25xf32> to vector<6x1xf32>
    %83 = vector.broadcast %82 : vector<6x1xf32> to vector<6x1024xf32>
    %84 = vector.broadcast %81 : vector<1x1024xf32> to vector<6x1024xf32>
    %85 = arith.mulf %83, %84 : vector<6x1024xf32>
    %86 = arith.addf %80, %85 : vector<6x1024xf32>
    %c0_16 = arith.constant 0 : index
    %c66 = arith.constant 66 : index
    %87 = vector.load %arg0[%c0_16, %c66] : memref<1x1152xf32, #tpu.memory_space<vmem>>, vector<1x1024xf32>
    %88 = vector.extract_strided_slice %0 {offsets = [0, 14], sizes = [6, 1], strides = [1, 1]} : vector<6x25xf32> to vector<6x1xf32>
    %89 = vector.broadcast %88 : vector<6x1xf32> to vector<6x1024xf32>
    %90 = vector.broadcast %87 : vector<1x1024xf32> to vector<6x1024xf32>
    %91 = arith.mulf %89, %90 : vector<6x1024xf32>
    %92 = arith.addf %86, %91 : vector<6x1024xf32>
    %c0_17 = arith.constant 0 : index
    %c84 = arith.constant 84 : index
    %93 = vector.load %arg0[%c0_17, %c84] : memref<1x1152xf32, #tpu.memory_space<vmem>>, vector<1x1024xf32>
    %94 = vector.extract_strided_slice %0 {offsets = [0, 15], sizes = [6, 1], strides = [1, 1]} : vector<6x25xf32> to vector<6x1xf32>
    %95 = vector.broadcast %94 : vector<6x1xf32> to vector<6x1024xf32>
    %96 = vector.broadcast %93 : vector<1x1024xf32> to vector<6x1024xf32>
    %97 = arith.mulf %95, %96 : vector<6x1024xf32>
    %98 = arith.addf %92, %97 : vector<6x1024xf32>
    %c0_18 = arith.constant 0 : index
    %c85 = arith.constant 85 : index
    %99 = vector.load %arg0[%c0_18, %c85] : memref<1x1152xf32, #tpu.memory_space<vmem>>, vector<1x1024xf32>
    %100 = vector.extract_strided_slice %0 {offsets = [0, 16], sizes = [6, 1], strides = [1, 1]} : vector<6x25xf32> to vector<6x1xf32>
    %101 = vector.broadcast %100 : vector<6x1xf32> to vector<6x1024xf32>
    %102 = vector.broadcast %99 : vector<1x1024xf32> to vector<6x1024xf32>
    %103 = arith.mulf %101, %102 : vector<6x1024xf32>
    %104 = arith.addf %98, %103 : vector<6x1024xf32>
    %c0_19 = arith.constant 0 : index
    %c86 = arith.constant 86 : index
    %105 = vector.load %arg0[%c0_19, %c86] : memref<1x1152xf32, #tpu.memory_space<vmem>>, vector<1x1024xf32>
    %106 = vector.extract_strided_slice %0 {offsets = [0, 17], sizes = [6, 1], strides = [1, 1]} : vector<6x25xf32> to vector<6x1xf32>
    %107 = vector.broadcast %106 : vector<6x1xf32> to vector<6x1024xf32>
    %108 = vector.broadcast %105 : vector<1x1024xf32> to vector<6x1024xf32>
    %109 = arith.mulf %107, %108 : vector<6x1024xf32>
    %110 = arith.addf %104, %109 : vector<6x1024xf32>
    %c0_20 = arith.constant 0 : index
    %c87 = arith.constant 87 : index
    %111 = vector.load %arg0[%c0_20, %c87] : memref<1x1152xf32, #tpu.memory_space<vmem>>, vector<1x1024xf32>
    %112 = vector.extract_strided_slice %0 {offsets = [0, 18], sizes = [6, 1], strides = [1, 1]} : vector<6x25xf32> to vector<6x1xf32>
    %113 = vector.broadcast %112 : vector<6x1xf32> to vector<6x1024xf32>
    %114 = vector.broadcast %111 : vector<1x1024xf32> to vector<6x1024xf32>
    %115 = arith.mulf %113, %114 : vector<6x1024xf32>
    %116 = arith.addf %110, %115 : vector<6x1024xf32>
    %c0_21 = arith.constant 0 : index
    %c88 = arith.constant 88 : index
    %117 = vector.load %arg0[%c0_21, %c88] : memref<1x1152xf32, #tpu.memory_space<vmem>>, vector<1x1024xf32>
    %118 = vector.extract_strided_slice %0 {offsets = [0, 19], sizes = [6, 1], strides = [1, 1]} : vector<6x25xf32> to vector<6x1xf32>
    %119 = vector.broadcast %118 : vector<6x1xf32> to vector<6x1024xf32>
    %120 = vector.broadcast %117 : vector<1x1024xf32> to vector<6x1024xf32>
    %121 = arith.mulf %119, %120 : vector<6x1024xf32>
    %122 = arith.addf %116, %121 : vector<6x1024xf32>
    %c0_22 = arith.constant 0 : index
    %c106 = arith.constant 106 : index
    %123 = vector.load %arg0[%c0_22, %c106] : memref<1x1152xf32, #tpu.memory_space<vmem>>, vector<1x1024xf32>
    %124 = vector.extract_strided_slice %0 {offsets = [0, 20], sizes = [6, 1], strides = [1, 1]} : vector<6x25xf32> to vector<6x1xf32>
    %125 = vector.broadcast %124 : vector<6x1xf32> to vector<6x1024xf32>
    %126 = vector.broadcast %123 : vector<1x1024xf32> to vector<6x1024xf32>
    %127 = arith.mulf %125, %126 : vector<6x1024xf32>
    %128 = arith.addf %122, %127 : vector<6x1024xf32>
    %c0_23 = arith.constant 0 : index
    %c107 = arith.constant 107 : index
    %129 = vector.load %arg0[%c0_23, %c107] : memref<1x1152xf32, #tpu.memory_space<vmem>>, vector<1x1024xf32>
    %130 = vector.extract_strided_slice %0 {offsets = [0, 21], sizes = [6, 1], strides = [1, 1]} : vector<6x25xf32> to vector<6x1xf32>
    %131 = vector.broadcast %130 : vector<6x1xf32> to vector<6x1024xf32>
    %132 = vector.broadcast %129 : vector<1x1024xf32> to vector<6x1024xf32>
    %133 = arith.mulf %131, %132 : vector<6x1024xf32>
    %134 = arith.addf %128, %133 : vector<6x1024xf32>
    %c0_24 = arith.constant 0 : index
    %c108 = arith.constant 108 : index
    %135 = vector.load %arg0[%c0_24, %c108] : memref<1x1152xf32, #tpu.memory_space<vmem>>, vector<1x1024xf32>
    %136 = vector.extract_strided_slice %0 {offsets = [0, 22], sizes = [6, 1], strides = [1, 1]} : vector<6x25xf32> to vector<6x1xf32>
    %137 = vector.broadcast %136 : vector<6x1xf32> to vector<6x1024xf32>
    %138 = vector.broadcast %135 : vector<1x1024xf32> to vector<6x1024xf32>
    %139 = arith.mulf %137, %138 : vector<6x1024xf32>
    %140 = arith.addf %134, %139 : vector<6x1024xf32>
    %c0_25 = arith.constant 0 : index
    %c109 = arith.constant 109 : index
    %141 = vector.load %arg0[%c0_25, %c109] : memref<1x1152xf32, #tpu.memory_space<vmem>>, vector<1x1024xf32>
    %142 = vector.extract_strided_slice %0 {offsets = [0, 23], sizes = [6, 1], strides = [1, 1]} : vector<6x25xf32> to vector<6x1xf32>
    %143 = vector.broadcast %142 : vector<6x1xf32> to vector<6x1024xf32>
    %144 = vector.broadcast %141 : vector<1x1024xf32> to vector<6x1024xf32>
    %145 = arith.mulf %143, %144 : vector<6x1024xf32>
    %146 = arith.addf %140, %145 : vector<6x1024xf32>
    %c0_26 = arith.constant 0 : index
    %c110 = arith.constant 110 : index
    %147 = vector.load %arg0[%c0_26, %c110] : memref<1x1152xf32, #tpu.memory_space<vmem>>, vector<1x1024xf32>
    %148 = vector.extract_strided_slice %0 {offsets = [0, 24], sizes = [6, 1], strides = [1, 1]} : vector<6x25xf32> to vector<6x1xf32>
    %149 = vector.broadcast %148 : vector<6x1xf32> to vector<6x1024xf32>
    %150 = vector.broadcast %147 : vector<1x1024xf32> to vector<6x1024xf32>
    %151 = arith.mulf %149, %150 : vector<6x1024xf32>
    %152 = arith.addf %146, %151 : vector<6x1024xf32>
    %c0_27 = arith.constant 0 : index
    %c0_28 = arith.constant 0 : index
    %153 = vector.load %arg1[%c0_27, %c0_28] : memref<1x1280xf32, #tpu.memory_space<vmem>>, vector<1x1024xf32>
    %154 = vector.broadcast %1 : vector<6x1xf32> to vector<6x1024xf32>
    %155 = arith.addf %152, %154 : vector<6x1024xf32>
    %cst_29 = arith.constant 0.000000e+00 : f32
    %156 = vector.broadcast %cst_29 : f32 to vector<6x1024xf32>
    %157 = arith.maximumf %155, %156 : vector<6x1024xf32>
    %158 = vector.broadcast %153 : vector<1x1024xf32> to vector<6x1024xf32>
    %159 = arith.mulf %157, %158 : vector<6x1024xf32>
    %c0_30 = arith.constant 0 : index
    %c0_31 = arith.constant 0 : index
    %160 = vector.load %arg5[%c0_30, %c0_31] : memref<6x1024xf32, #tpu.memory_space<vmem>>, vector<6x1024xf32>
    tpu.vector_store %arg5[%c0_30, %c0_31], %159 {strides = array<i32>} : memref<6x1024xf32, #tpu.memory_space<vmem>>, vector<6x1024xf32>,
    %c0_32 = arith.constant 0 : index
    %c0_33 = arith.constant 0 : index
    %161 = vector.load %arg5[%c0_32, %c0_33] : memref<6x1024xf32, #tpu.memory_space<vmem>>, vector<6x1020xf32>
    %c0_34 = arith.constant 0 : index
    %c1 = arith.constant 1 : index
    %162 = vector.load %arg5[%c0_34, %c1] : memref<6x1024xf32, #tpu.memory_space<vmem>>, vector<6x1020xf32>
    %163 = arith.maximumf %161, %162 : vector<6x1020xf32>
    %c0_35 = arith.constant 0 : index
    %c2 = arith.constant 2 : index
    %164 = vector.load %arg5[%c0_35, %c2] : memref<6x1024xf32, #tpu.memory_space<vmem>>, vector<6x1020xf32>
    %165 = arith.maximumf %163, %164 : vector<6x1020xf32>
    %c0_36 = arith.constant 0 : index
    %c3 = arith.constant 3 : index
    %166 = vector.load %arg5[%c0_36, %c3] : memref<6x1024xf32, #tpu.memory_space<vmem>>, vector<6x1020xf32>
    %167 = arith.maximumf %165, %166 : vector<6x1020xf32>
    %c0_37 = arith.constant 0 : index
    %c4 = arith.constant 4 : index
    %168 = vector.load %arg5[%c0_37, %c4] : memref<6x1024xf32, #tpu.memory_space<vmem>>, vector<6x1020xf32>
    %169 = arith.maximumf %167, %168 : vector<6x1020xf32>
    %c0_38 = arith.constant 0 : index
    %c0_39 = arith.constant 0 : index
    %170 = vector.load %arg6[%c0_38, %c0_39] : memref<6x1024xf32, #tpu.memory_space<vmem>>, vector<6x1020xf32>
    tpu.vector_store %arg6[%c0_38, %c0_39], %169 {strides = array<i32>} : memref<6x1024xf32, #tpu.memory_space<vmem>>, vector<6x1020xf32>,
    %c0_40 = arith.constant 0 : index
    %c0_41 = arith.constant 0 : index
    %171 = vector.load %arg6[%c0_40, %c0_41] : memref<6x1024xf32, #tpu.memory_space<vmem>>, vector<6x932xf32>
    %c0_42 = arith.constant 0 : index
    %c22_43 = arith.constant 22 : index
    %172 = vector.load %arg6[%c0_42, %c22_43] : memref<6x1024xf32, #tpu.memory_space<vmem>>, vector<6x932xf32>
    %173 = arith.maximumf %171, %172 : vector<6x932xf32>
    %c0_44 = arith.constant 0 : index
    %c44_45 = arith.constant 44 : index
    %174 = vector.load %arg6[%c0_44, %c44_45] : memref<6x1024xf32, #tpu.memory_space<vmem>>, vector<6x932xf32>
    %175 = arith.maximumf %173, %174 : vector<6x932xf32>
    %c0_46 = arith.constant 0 : index
    %c66_47 = arith.constant 66 : index
    %176 = vector.load %arg6[%c0_46, %c66_47] : memref<6x1024xf32, #tpu.memory_space<vmem>>, vector<6x932xf32>
    %177 = arith.maximumf %175, %176 : vector<6x932xf32>
    %c0_48 = arith.constant 0 : index
    %c88_49 = arith.constant 88 : index
    %178 = vector.load %arg6[%c0_48, %c88_49] : memref<6x1024xf32, #tpu.memory_space<vmem>>, vector<6x932xf32>
    %179 = arith.maximumf %177, %178 : vector<6x932xf32>
    %c16 = arith.constant 16 : index
    %c0_50 = arith.constant 0 : index
    %180 = vector.load %arg3[%c16, %c0_50] : memref<872x128xbf16, #tpu.memory_space<vmem>>, vector<384x128xbf16>
    %cst_51 = arith.constant 0.000000e+00 : bf16
    %181 = vector.broadcast %cst_51 : bf16 to vector<6x384xbf16>
    %c0_52 = arith.constant 0 : index
    %c0_53 = arith.constant 0 : index
    %182 = vector.load %arg7[%c0_52, %c0_53] : memref<6x384xbf16, #tpu.memory_space<vmem>>, vector<6x384xbf16>
    tpu.vector_store %arg7[%c0_52, %c0_53], %181 {strides = array<i32>} : memref<6x384xbf16, #tpu.memory_space<vmem>>, vector<6x384xbf16>,
    %183 = vector.extract_strided_slice %179 {offsets = [0, 0], sizes = [6, 384], strides = [1, 1]} : vector<6x932xf32> to vector<6x384xf32>
    %184 = arith.truncf %183 : vector<6x384xf32> to vector<6x384xbf16>
    %cst_54 = arith.constant dense<0.000000e+00> : vector<6x128xf32>
    %185 = tpu.matmul %184, %180, %cst_54 {dimension_numbers = #tpu.dot_dimension_numbers<[1], [0], [0], [1], [0, 0, 1, 1], [], []>} : vector<6x384xbf16>, vector<384x128xbf16>, vector<6x128xf32> -> vector<6x128xf32>
    %186 = arith.truncf %185 : vector<6x128xf32> to vector<6x128xbf16>
    %c0_55 = arith.constant 0 : index
    %c0_56 = arith.constant 0 : index
    %187 = vector.load %arg7[%c0_55, %c0_56] : memref<6x384xbf16, #tpu.memory_space<vmem>>, vector<6x128xbf16>
    tpu.vector_store %arg7[%c0_55, %c0_56], %186 {strides = array<i32>} : memref<6x384xbf16, #tpu.memory_space<vmem>>, vector<6x128xbf16>,
    %188 = vector.extract_strided_slice %179 {offsets = [0, 512], sizes = [6, 384], strides = [1, 1]} : vector<6x932xf32> to vector<6x384xf32>
    %189 = arith.truncf %188 : vector<6x384xf32> to vector<6x384xbf16>
    %cst_57 = arith.constant dense<0.000000e+00> : vector<6x128xf32>
    %190 = tpu.matmul %189, %180, %cst_57 {dimension_numbers = #tpu.dot_dimension_numbers<[1], [0], [0], [1], [0, 0, 1, 1], [], []>} : vector<6x384xbf16>, vector<384x128xbf16>, vector<6x128xf32> -> vector<6x128xf32>
    %191 = arith.truncf %190 : vector<6x128xf32> to vector<6x128xbf16>
    %c0_58 = arith.constant 0 : index
    %c128 = arith.constant 128 : index
    %192 = vector.load %arg7[%c0_58, %c128] : memref<6x384xbf16, #tpu.memory_space<vmem>>, vector<6x128xbf16>
    tpu.vector_store %arg7[%c0_58, %c128], %191 {strides = array<i32>} : memref<6x384xbf16, #tpu.memory_space<vmem>>, vector<6x128xbf16>,
    %cst_59 = arith.constant 0.000000e+00 : bf16
    %193 = vector.broadcast %cst_59 : bf16 to vector<128x256xbf16>
    %c0_60 = arith.constant 0 : index
    %c0_61 = arith.constant 0 : index
    %194 = vector.load %arg8[%c0_60, %c0_61] : memref<128x256xbf16, #tpu.memory_space<vmem>>, vector<128x256xbf16>
    tpu.vector_store %arg8[%c0_60, %c0_61], %193 {strides = array<i32>} : memref<128x256xbf16, #tpu.memory_space<vmem>>, vector<128x256xbf16>,
    %c0_62 = arith.constant 0 : index
    %c0_63 = arith.constant 0 : index
    %195 = vector.load %arg7[%c0_62, %c0_63] : memref<6x384xbf16, #tpu.memory_space<vmem>>, vector<6x256xbf16>
    %c0_64 = arith.constant 0 : index
    %c0_65 = arith.constant 0 : index
    %196 = vector.load %arg8[%c0_64, %c0_65] : memref<128x256xbf16, #tpu.memory_space<vmem>>, vector<6x256xbf16>
    tpu.vector_store %arg8[%c0_64, %c0_65], %195 {strides = array<i32>} : memref<128x256xbf16, #tpu.memory_space<vmem>>, vector<6x256xbf16>,
    %c0_66 = arith.constant 0 : index
    %c1_67 = arith.constant 1 : index
    %197 = vector.load %arg7[%c0_66, %c1_67] : memref<6x384xbf16, #tpu.memory_space<vmem>>, vector<6x256xbf16>
    %c8 = arith.constant 8 : index
    %c0_68 = arith.constant 0 : index
    %198 = vector.load %arg8[%c8, %c0_68] : memref<128x256xbf16, #tpu.memory_space<vmem>>, vector<6x256xbf16>
    tpu.vector_store %arg8[%c8, %c0_68], %197 {strides = array<i32>} : memref<128x256xbf16, #tpu.memory_space<vmem>>, vector<6x256xbf16>,
    %c0_69 = arith.constant 0 : index
    %c2_70 = arith.constant 2 : index
    %199 = vector.load %arg7[%c0_69, %c2_70] : memref<6x384xbf16, #tpu.memory_space<vmem>>, vector<6x256xbf16>
    %c16_71 = arith.constant 16 : index
    %c0_72 = arith.constant 0 : index
    %200 = vector.load %arg8[%c16_71, %c0_72] : memref<128x256xbf16, #tpu.memory_space<vmem>>, vector<6x256xbf16>
    tpu.vector_store %arg8[%c16_71, %c0_72], %199 {strides = array<i32>} : memref<128x256xbf16, #tpu.memory_space<vmem>>, vector<6x256xbf16>,
    %c0_73 = arith.constant 0 : index
    %c11 = arith.constant 11 : index
    %201 = vector.load %arg7[%c0_73, %c11] : memref<6x384xbf16, #tpu.memory_space<vmem>>, vector<6x256xbf16>
    %c24 = arith.constant 24 : index
    %c0_74 = arith.constant 0 : index
    %202 = vector.load %arg8[%c24, %c0_74] : memref<128x256xbf16, #tpu.memory_space<vmem>>, vector<6x256xbf16>
    tpu.vector_store %arg8[%c24, %c0_74], %201 {strides = array<i32>} : memref<128x256xbf16, #tpu.memory_space<vmem>>, vector<6x256xbf16>,
    %c0_75 = arith.constant 0 : index
    %c12 = arith.constant 12 : index
    %203 = vector.load %arg7[%c0_75, %c12] : memref<6x384xbf16, #tpu.memory_space<vmem>>, vector<6x256xbf16>
    %c32_76 = arith.constant 32 : index
    %c0_77 = arith.constant 0 : index
    %204 = vector.load %arg8[%c32_76, %c0_77] : memref<128x256xbf16, #tpu.memory_space<vmem>>, vector<6x256xbf16>
    tpu.vector_store %arg8[%c32_76, %c0_77], %203 {strides = array<i32>} : memref<128x256xbf16, #tpu.memory_space<vmem>>, vector<6x256xbf16>,
    %c0_78 = arith.constant 0 : index
    %c13 = arith.constant 13 : index
    %205 = vector.load %arg7[%c0_78, %c13] : memref<6x384xbf16, #tpu.memory_space<vmem>>, vector<6x256xbf16>
    %c40_79 = arith.constant 40 : index
    %c0_80 = arith.constant 0 : index
    %206 = vector.load %arg8[%c40_79, %c0_80] : memref<128x256xbf16, #tpu.memory_space<vmem>>, vector<6x256xbf16>
    tpu.vector_store %arg8[%c40_79, %c0_80], %205 {strides = array<i32>} : memref<128x256xbf16, #tpu.memory_space<vmem>>, vector<6x256xbf16>,
    %c0_81 = arith.constant 0 : index
    %c22_82 = arith.constant 22 : index
    %207 = vector.load %arg7[%c0_81, %c22_82] : memref<6x384xbf16, #tpu.memory_space<vmem>>, vector<6x256xbf16>
    %c48 = arith.constant 48 : index
    %c0_83 = arith.constant 0 : index
    %208 = vector.load %arg8[%c48, %c0_83] : memref<128x256xbf16, #tpu.memory_space<vmem>>, vector<6x256xbf16>
    tpu.vector_store %arg8[%c48, %c0_83], %207 {strides = array<i32>} : memref<128x256xbf16, #tpu.memory_space<vmem>>, vector<6x256xbf16>,
    %c0_84 = arith.constant 0 : index
    %c23 = arith.constant 23 : index
    %209 = vector.load %arg7[%c0_84, %c23] : memref<6x384xbf16, #tpu.memory_space<vmem>>, vector<6x256xbf16>
    %c56 = arith.constant 56 : index
    %c0_85 = arith.constant 0 : index
    %210 = vector.load %arg8[%c56, %c0_85] : memref<128x256xbf16, #tpu.memory_space<vmem>>, vector<6x256xbf16>
    tpu.vector_store %arg8[%c56, %c0_85], %209 {strides = array<i32>} : memref<128x256xbf16, #tpu.memory_space<vmem>>, vector<6x256xbf16>,
    %c0_86 = arith.constant 0 : index
    %c24_87 = arith.constant 24 : index
    %211 = vector.load %arg7[%c0_86, %c24_87] : memref<6x384xbf16, #tpu.memory_space<vmem>>, vector<6x256xbf16>
    %c64_88 = arith.constant 64 : index
    %c0_89 = arith.constant 0 : index
    %212 = vector.load %arg8[%c64_88, %c0_89] : memref<128x256xbf16, #tpu.memory_space<vmem>>, vector<6x256xbf16>
    tpu.vector_store %arg8[%c64_88, %c0_89], %211 {strides = array<i32>} : memref<128x256xbf16, #tpu.memory_space<vmem>>, vector<6x256xbf16>,
    %c0_90 = arith.constant 0 : index
    %c0_91 = arith.constant 0 : index
    %213 = vector.load %arg3[%c0_90, %c0_91] : memref<872x128xbf16, #tpu.memory_space<vmem>>, vector<16x128xbf16>
    %c0_92 = arith.constant 0 : index
    %c0_93 = arith.constant 0 : index
    %214 = vector.load %arg8[%c0_92, %c0_93] : memref<128x256xbf16, #tpu.memory_space<vmem>>, vector<128x256xbf16>
    %cst_94 = arith.constant dense<0.000000e+00> : vector<16x256xf32>
    %215 = tpu.matmul %213, %214, %cst_94 {dimension_numbers = #tpu.dot_dimension_numbers<[1], [0], [0], [1], [0, 0, 1, 1], [], []>} : vector<16x128xbf16>, vector<128x256xbf16>, vector<16x256xf32> -> vector<16x256xf32>
    %c0_95 = arith.constant 0 : index
    %c33 = arith.constant 33 : index
    %216 = vector.load %arg2[%c0_95, %c33] : memref<24x128xf32, #tpu.memory_space<vmem>>, vector<16x1xf32>
    %c0_96 = arith.constant 0 : index
    %c1024 = arith.constant 1024 : index
    %217 = vector.load %arg1[%c0_96, %c1024] : memref<1x1280xf32, #tpu.memory_space<vmem>>, vector<1x256xf32>
    %218 = vector.broadcast %216 : vector<16x1xf32> to vector<16x256xf32>
    %219 = arith.addf %215, %218 : vector<16x256xf32>
    %cst_97 = arith.constant 0.000000e+00 : f32
    %220 = vector.broadcast %cst_97 : f32 to vector<16x256xf32>
    %221 = arith.maximumf %219, %220 : vector<16x256xf32>
    %222 = vector.broadcast %217 : vector<1x256xf32> to vector<16x256xf32>
    %223 = arith.mulf %221, %222 : vector<16x256xf32>
    %c0_98 = arith.constant 0 : index
    %c0_99 = arith.constant 0 : index
    %224 = vector.load %arg9[%c0_98, %c0_99] : memref<16x256xf32, #tpu.memory_space<vmem>>, vector<16x256xf32>
    tpu.vector_store %arg9[%c0_98, %c0_99], %223 {strides = array<i32>} : memref<16x256xf32, #tpu.memory_space<vmem>>, vector<16x256xf32>,
    %c400 = arith.constant 400 : index
    %c0_100 = arith.constant 0 : index
    %225 = vector.load %arg3[%c400, %c0_100] : memref<872x128xbf16, #tpu.memory_space<vmem>>, vector<80x128xbf16>
    %c0_101 = arith.constant 0 : index
    %c0_102 = arith.constant 0 : index
    %226 = vector.load %arg9[%c0_101, %c0_102] : memref<16x256xf32, #tpu.memory_space<vmem>>, vector<16x124xf32>
    %c0_103 = arith.constant 0 : index
    %c1_104 = arith.constant 1 : index
    %227 = vector.load %arg9[%c0_103, %c1_104] : memref<16x256xf32, #tpu.memory_space<vmem>>, vector<16x124xf32>
    %228 = arith.maximumf %226, %227 : vector<16x124xf32>
    %c0_105 = arith.constant 0 : index
    %c2_106 = arith.constant 2 : index
    %229 = vector.load %arg9[%c0_105, %c2_106] : memref<16x256xf32, #tpu.memory_space<vmem>>, vector<16x124xf32>
    %230 = arith.maximumf %228, %229 : vector<16x124xf32>
    %c0_107 = arith.constant 0 : index
    %c3_108 = arith.constant 3 : index
    %231 = vector.load %arg9[%c0_107, %c3_108] : memref<16x256xf32, #tpu.memory_space<vmem>>, vector<16x124xf32>
    %232 = arith.maximumf %230, %231 : vector<16x124xf32>
    %c0_109 = arith.constant 0 : index
    %c4_110 = arith.constant 4 : index
    %233 = vector.load %arg9[%c0_109, %c4_110] : memref<16x256xf32, #tpu.memory_space<vmem>>, vector<16x124xf32>
    %234 = arith.maximumf %232, %233 : vector<16x124xf32>
    %c0_111 = arith.constant 0 : index
    %c0_112 = arith.constant 0 : index
    %235 = vector.load %arg10[%c0_111, %c0_112] : memref<16x128xf32, #tpu.memory_space<vmem>>, vector<16x124xf32>
    tpu.vector_store %arg10[%c0_111, %c0_112], %234 {strides = array<i32>} : memref<16x128xf32, #tpu.memory_space<vmem>>, vector<16x124xf32>,
    %c0_113 = arith.constant 0 : index
    %c0_114 = arith.constant 0 : index
    %236 = vector.load %arg10[%c0_113, %c0_114] : memref<16x128xf32, #tpu.memory_space<vmem>>, vector<16x80xf32>
    %c0_115 = arith.constant 0 : index
    %c11_116 = arith.constant 11 : index
    %237 = vector.load %arg10[%c0_115, %c11_116] : memref<16x128xf32, #tpu.memory_space<vmem>>, vector<16x80xf32>
    %238 = arith.maximumf %236, %237 : vector<16x80xf32>
    %c0_117 = arith.constant 0 : index
    %c22_118 = arith.constant 22 : index
    %239 = vector.load %arg10[%c0_117, %c22_118] : memref<16x128xf32, #tpu.memory_space<vmem>>, vector<16x80xf32>
    %240 = arith.maximumf %238, %239 : vector<16x80xf32>
    %c0_119 = arith.constant 0 : index
    %c33_120 = arith.constant 33 : index
    %241 = vector.load %arg10[%c0_119, %c33_120] : memref<16x128xf32, #tpu.memory_space<vmem>>, vector<16x80xf32>
    %242 = arith.maximumf %240, %241 : vector<16x80xf32>
    %c0_121 = arith.constant 0 : index
    %c44_122 = arith.constant 44 : index
    %243 = vector.load %arg10[%c0_121, %c44_122] : memref<16x128xf32, #tpu.memory_space<vmem>>, vector<16x80xf32>
    %244 = arith.maximumf %242, %243 : vector<16x80xf32>
    %245 = arith.truncf %244 : vector<16x80xf32> to vector<16x80xbf16>
    %cst_123 = arith.constant dense<0.000000e+00> : vector<16x128xf32>
    %246 = tpu.matmul %245, %225, %cst_123 {dimension_numbers = #tpu.dot_dimension_numbers<[1], [0], [0], [1], [0, 0, 1, 1], [], []>} : vector<16x80xbf16>, vector<80x128xbf16>, vector<16x128xf32> -> vector<16x128xf32>
    %247 = vector.extract_strided_slice %246 {offsets = [0, 0], sizes = [1, 16], strides = [1, 1]} : vector<16x128xf32> to vector<1x16xf32>
    %c0_124 = arith.constant 0 : index
    %c0_125 = arith.constant 0 : index
    %248 = vector.load %arg11[%c0_124, %c0_125] : memref<2x256xf32, #tpu.memory_space<vmem>>, vector<1x16xf32>
    tpu.vector_store %arg11[%c0_124, %c0_125], %247 {strides = array<i32>} : memref<2x256xf32, #tpu.memory_space<vmem>>, vector<1x16xf32>,
    %249 = vector.extract_strided_slice %246 {offsets = [1, 0], sizes = [1, 16], strides = [1, 1]} : vector<16x128xf32> to vector<1x16xf32>
    %c0_126 = arith.constant 0 : index
    %c16_127 = arith.constant 16 : index
    %250 = vector.load %arg11[%c0_126, %c16_127] : memref<2x256xf32, #tpu.memory_space<vmem>>, vector<1x16xf32>
    tpu.vector_store %arg11[%c0_126, %c16_127], %249 {strides = array<i32>} : memref<2x256xf32, #tpu.memory_space<vmem>>, vector<1x16xf32>,
    %251 = vector.extract_strided_slice %246 {offsets = [2, 0], sizes = [1, 16], strides = [1, 1]} : vector<16x128xf32> to vector<1x16xf32>
    %c0_128 = arith.constant 0 : index
    %c32_129 = arith.constant 32 : index
    %252 = vector.load %arg11[%c0_128, %c32_129] : memref<2x256xf32, #tpu.memory_space<vmem>>, vector<1x16xf32>
    tpu.vector_store %arg11[%c0_128, %c32_129], %251 {strides = array<i32>} : memref<2x256xf32, #tpu.memory_space<vmem>>, vector<1x16xf32>,
    %253 = vector.extract_strided_slice %246 {offsets = [3, 0], sizes = [1, 16], strides = [1, 1]} : vector<16x128xf32> to vector<1x16xf32>
    %c0_130 = arith.constant 0 : index
    %c48_131 = arith.constant 48 : index
    %254 = vector.load %arg11[%c0_130, %c48_131] : memref<2x256xf32, #tpu.memory_space<vmem>>, vector<1x16xf32>
    tpu.vector_store %arg11[%c0_130, %c48_131], %253 {strides = array<i32>} : memref<2x256xf32, #tpu.memory_space<vmem>>, vector<1x16xf32>,
    %255 = vector.extract_strided_slice %246 {offsets = [4, 0], sizes = [1, 16], strides = [1, 1]} : vector<16x128xf32> to vector<1x16xf32>
    %c0_132 = arith.constant 0 : index
    %c64_133 = arith.constant 64 : index
    %256 = vector.load %arg11[%c0_132, %c64_133] : memref<2x256xf32, #tpu.memory_space<vmem>>, vector<1x16xf32>
    tpu.vector_store %arg11[%c0_132, %c64_133], %255 {strides = array<i32>} : memref<2x256xf32, #tpu.memory_space<vmem>>, vector<1x16xf32>,
    %257 = vector.extract_strided_slice %246 {offsets = [5, 0], sizes = [1, 16], strides = [1, 1]} : vector<16x128xf32> to vector<1x16xf32>
    %c0_134 = arith.constant 0 : index
    %c80 = arith.constant 80 : index
    %258 = vector.load %arg11[%c0_134, %c80] : memref<2x256xf32, #tpu.memory_space<vmem>>, vector<1x16xf32>
    tpu.vector_store %arg11[%c0_134, %c80], %257 {strides = array<i32>} : memref<2x256xf32, #tpu.memory_space<vmem>>, vector<1x16xf32>,
    %259 = vector.extract_strided_slice %246 {offsets = [6, 0], sizes = [1, 16], strides = [1, 1]} : vector<16x128xf32> to vector<1x16xf32>
    %c0_135 = arith.constant 0 : index
    %c96 = arith.constant 96 : index
    %260 = vector.load %arg11[%c0_135, %c96] : memref<2x256xf32, #tpu.memory_space<vmem>>, vector<1x16xf32>
    tpu.vector_store %arg11[%c0_135, %c96], %259 {strides = array<i32>} : memref<2x256xf32, #tpu.memory_space<vmem>>, vector<1x16xf32>,
    %261 = vector.extract_strided_slice %246 {offsets = [7, 0], sizes = [1, 16], strides = [1, 1]} : vector<16x128xf32> to vector<1x16xf32>
    %c0_136 = arith.constant 0 : index
    %c112 = arith.constant 112 : index
    %262 = vector.load %arg11[%c0_136, %c112] : memref<2x256xf32, #tpu.memory_space<vmem>>, vector<1x16xf32>
    tpu.vector_store %arg11[%c0_136, %c112], %261 {strides = array<i32>} : memref<2x256xf32, #tpu.memory_space<vmem>>, vector<1x16xf32>,
    %263 = vector.extract_strided_slice %246 {offsets = [8, 0], sizes = [1, 16], strides = [1, 1]} : vector<16x128xf32> to vector<1x16xf32>
    %c0_137 = arith.constant 0 : index
    %c128_138 = arith.constant 128 : index
    %264 = vector.load %arg11[%c0_137, %c128_138] : memref<2x256xf32, #tpu.memory_space<vmem>>, vector<1x16xf32>
    tpu.vector_store %arg11[%c0_137, %c128_138], %263 {strides = array<i32>} : memref<2x256xf32, #tpu.memory_space<vmem>>, vector<1x16xf32>,
    %265 = vector.extract_strided_slice %246 {offsets = [9, 0], sizes = [1, 16], strides = [1, 1]} : vector<16x128xf32> to vector<1x16xf32>
    %c0_139 = arith.constant 0 : index
    %c144 = arith.constant 144 : index
    %266 = vector.load %arg11[%c0_139, %c144] : memref<2x256xf32, #tpu.memory_space<vmem>>, vector<1x16xf32>
    tpu.vector_store %arg11[%c0_139, %c144], %265 {strides = array<i32>} : memref<2x256xf32, #tpu.memory_space<vmem>>, vector<1x16xf32>,
    %267 = vector.extract_strided_slice %246 {offsets = [10, 0], sizes = [1, 16], strides = [1, 1]} : vector<16x128xf32> to vector<1x16xf32>
    %c0_140 = arith.constant 0 : index
    %c160 = arith.constant 160 : index
    %268 = vector.load %arg11[%c0_140, %c160] : memref<2x256xf32, #tpu.memory_space<vmem>>, vector<1x16xf32>
    tpu.vector_store %arg11[%c0_140, %c160], %267 {strides = array<i32>} : memref<2x256xf32, #tpu.memory_space<vmem>>, vector<1x16xf32>,
    %269 = vector.extract_strided_slice %246 {offsets = [11, 0], sizes = [1, 16], strides = [1, 1]} : vector<16x128xf32> to vector<1x16xf32>
    %c0_141 = arith.constant 0 : index
    %c176 = arith.constant 176 : index
    %270 = vector.load %arg11[%c0_141, %c176] : memref<2x256xf32, #tpu.memory_space<vmem>>, vector<1x16xf32>
    tpu.vector_store %arg11[%c0_141, %c176], %269 {strides = array<i32>} : memref<2x256xf32, #tpu.memory_space<vmem>>, vector<1x16xf32>,
    %271 = vector.extract_strided_slice %246 {offsets = [12, 0], sizes = [1, 16], strides = [1, 1]} : vector<16x128xf32> to vector<1x16xf32>
    %c0_142 = arith.constant 0 : index
    %c192 = arith.constant 192 : index
    %272 = vector.load %arg11[%c0_142, %c192] : memref<2x256xf32, #tpu.memory_space<vmem>>, vector<1x16xf32>
    tpu.vector_store %arg11[%c0_142, %c192], %271 {strides = array<i32>} : memref<2x256xf32, #tpu.memory_space<vmem>>, vector<1x16xf32>,
    %273 = vector.extract_strided_slice %246 {offsets = [13, 0], sizes = [1, 16], strides = [1, 1]} : vector<16x128xf32> to vector<1x16xf32>
    %c0_143 = arith.constant 0 : index
    %c208 = arith.constant 208 : index
    %274 = vector.load %arg11[%c0_143, %c208] : memref<2x256xf32, #tpu.memory_space<vmem>>, vector<1x16xf32>
    tpu.vector_store %arg11[%c0_143, %c208], %273 {strides = array<i32>} : memref<2x256xf32, #tpu.memory_space<vmem>>, vector<1x16xf32>,
    %275 = vector.extract_strided_slice %246 {offsets = [14, 0], sizes = [1, 16], strides = [1, 1]} : vector<16x128xf32> to vector<1x16xf32>
    %c0_144 = arith.constant 0 : index
    %c224 = arith.constant 224 : index
    %276 = vector.load %arg11[%c0_144, %c224] : memref<2x256xf32, #tpu.memory_space<vmem>>, vector<1x16xf32>
    tpu.vector_store %arg11[%c0_144, %c224], %275 {strides = array<i32>} : memref<2x256xf32, #tpu.memory_space<vmem>>, vector<1x16xf32>,
    %277 = vector.extract_strided_slice %246 {offsets = [15, 0], sizes = [1, 16], strides = [1, 1]} : vector<16x128xf32> to vector<1x16xf32>
    %c0_145 = arith.constant 0 : index
    %c240 = arith.constant 240 : index
    %278 = vector.load %arg11[%c0_145, %c240] : memref<2x256xf32, #tpu.memory_space<vmem>>, vector<1x16xf32>
    tpu.vector_store %arg11[%c0_145, %c240], %277 {strides = array<i32>} : memref<2x256xf32, #tpu.memory_space<vmem>>, vector<1x16xf32>,
    %c0_146 = arith.constant 0 : index
    %c128_147 = arith.constant 128 : index
    %279 = vector.load %arg9[%c0_146, %c128_147] : memref<16x256xf32, #tpu.memory_space<vmem>>, vector<16x124xf32>
    %c0_148 = arith.constant 0 : index
    %c129 = arith.constant 129 : index
    %280 = vector.load %arg9[%c0_148, %c129] : memref<16x256xf32, #tpu.memory_space<vmem>>, vector<16x124xf32>
    %281 = arith.maximumf %279, %280 : vector<16x124xf32>
    %c0_149 = arith.constant 0 : index
    %c130 = arith.constant 130 : index
    %282 = vector.load %arg9[%c0_149, %c130] : memref<16x256xf32, #tpu.memory_space<vmem>>, vector<16x124xf32>
    %283 = arith.maximumf %281, %282 : vector<16x124xf32>
    %c0_150 = arith.constant 0 : index
    %c131 = arith.constant 131 : index
    %284 = vector.load %arg9[%c0_150, %c131] : memref<16x256xf32, #tpu.memory_space<vmem>>, vector<16x124xf32>
    %285 = arith.maximumf %283, %284 : vector<16x124xf32>
    %c0_151 = arith.constant 0 : index
    %c132 = arith.constant 132 : index
    %286 = vector.load %arg9[%c0_151, %c132] : memref<16x256xf32, #tpu.memory_space<vmem>>, vector<16x124xf32>
    %287 = arith.maximumf %285, %286 : vector<16x124xf32>
    %c0_152 = arith.constant 0 : index
    %c0_153 = arith.constant 0 : index
    %288 = vector.load %arg10[%c0_152, %c0_153] : memref<16x128xf32, #tpu.memory_space<vmem>>, vector<16x124xf32>
    tpu.vector_store %arg10[%c0_152, %c0_153], %287 {strides = array<i32>} : memref<16x128xf32, #tpu.memory_space<vmem>>, vector<16x124xf32>,
    %c0_154 = arith.constant 0 : index
    %c0_155 = arith.constant 0 : index
    %289 = vector.load %arg10[%c0_154, %c0_155] : memref<16x128xf32, #tpu.memory_space<vmem>>, vector<16x80xf32>
    %c0_156 = arith.constant 0 : index
    %c11_157 = arith.constant 11 : index
    %290 = vector.load %arg10[%c0_156, %c11_157] : memref<16x128xf32, #tpu.memory_space<vmem>>, vector<16x80xf32>
    %291 = arith.maximumf %289, %290 : vector<16x80xf32>
    %c0_158 = arith.constant 0 : index
    %c22_159 = arith.constant 22 : index
    %292 = vector.load %arg10[%c0_158, %c22_159] : memref<16x128xf32, #tpu.memory_space<vmem>>, vector<16x80xf32>
    %293 = arith.maximumf %291, %292 : vector<16x80xf32>
    %c0_160 = arith.constant 0 : index
    %c33_161 = arith.constant 33 : index
    %294 = vector.load %arg10[%c0_160, %c33_161] : memref<16x128xf32, #tpu.memory_space<vmem>>, vector<16x80xf32>
    %295 = arith.maximumf %293, %294 : vector<16x80xf32>
    %c0_162 = arith.constant 0 : index
    %c44_163 = arith.constant 44 : index
    %296 = vector.load %arg10[%c0_162, %c44_163] : memref<16x128xf32, #tpu.memory_space<vmem>>, vector<16x80xf32>
    %297 = arith.maximumf %295, %296 : vector<16x80xf32>
    %298 = arith.truncf %297 : vector<16x80xf32> to vector<16x80xbf16>
    %cst_164 = arith.constant dense<0.000000e+00> : vector<16x128xf32>
    %299 = tpu.matmul %298, %225, %cst_164 {dimension_numbers = #tpu.dot_dimension_numbers<[1], [0], [0], [1], [0, 0, 1, 1], [], []>} : vector<16x80xbf16>, vector<80x128xbf16>, vector<16x128xf32> -> vector<16x128xf32>
    %300 = vector.extract_strided_slice %299 {offsets = [0, 0], sizes = [1, 16], strides = [1, 1]} : vector<16x128xf32> to vector<1x16xf32>
    %c1_165 = arith.constant 1 : index
    %c0_166 = arith.constant 0 : index
    %301 = vector.load %arg11[%c1_165, %c0_166] : memref<2x256xf32, #tpu.memory_space<vmem>>, vector<1x16xf32>
    tpu.vector_store %arg11[%c1_165, %c0_166], %300 {strides = array<i32>} : memref<2x256xf32, #tpu.memory_space<vmem>>, vector<1x16xf32>,
    %302 = vector.extract_strided_slice %299 {offsets = [1, 0], sizes = [1, 16], strides = [1, 1]} : vector<16x128xf32> to vector<1x16xf32>
    %c1_167 = arith.constant 1 : index
    %c16_168 = arith.constant 16 : index
    %303 = vector.load %arg11[%c1_167, %c16_168] : memref<2x256xf32, #tpu.memory_space<vmem>>, vector<1x16xf32>
    tpu.vector_store %arg11[%c1_167, %c16_168], %302 {strides = array<i32>} : memref<2x256xf32, #tpu.memory_space<vmem>>, vector<1x16xf32>,
    %304 = vector.extract_strided_slice %299 {offsets = [2, 0], sizes = [1, 16], strides = [1, 1]} : vector<16x128xf32> to vector<1x16xf32>
    %c1_169 = arith.constant 1 : index
    %c32_170 = arith.constant 32 : index
    %305 = vector.load %arg11[%c1_169, %c32_170] : memref<2x256xf32, #tpu.memory_space<vmem>>, vector<1x16xf32>
    tpu.vector_store %arg11[%c1_169, %c32_170], %304 {strides = array<i32>} : memref<2x256xf32, #tpu.memory_space<vmem>>, vector<1x16xf32>,
    %306 = vector.extract_strided_slice %299 {offsets = [3, 0], sizes = [1, 16], strides = [1, 1]} : vector<16x128xf32> to vector<1x16xf32>
    %c1_171 = arith.constant 1 : index
    %c48_172 = arith.constant 48 : index
    %307 = vector.load %arg11[%c1_171, %c48_172] : memref<2x256xf32, #tpu.memory_space<vmem>>, vector<1x16xf32>
    tpu.vector_store %arg11[%c1_171, %c48_172], %306 {strides = array<i32>} : memref<2x256xf32, #tpu.memory_space<vmem>>, vector<1x16xf32>,
    %308 = vector.extract_strided_slice %299 {offsets = [4, 0], sizes = [1, 16], strides = [1, 1]} : vector<16x128xf32> to vector<1x16xf32>
    %c1_173 = arith.constant 1 : index
    %c64_174 = arith.constant 64 : index
    %309 = vector.load %arg11[%c1_173, %c64_174] : memref<2x256xf32, #tpu.memory_space<vmem>>, vector<1x16xf32>
    tpu.vector_store %arg11[%c1_173, %c64_174], %308 {strides = array<i32>} : memref<2x256xf32, #tpu.memory_space<vmem>>, vector<1x16xf32>,
    %310 = vector.extract_strided_slice %299 {offsets = [5, 0], sizes = [1, 16], strides = [1, 1]} : vector<16x128xf32> to vector<1x16xf32>
    %c1_175 = arith.constant 1 : index
    %c80_176 = arith.constant 80 : index
    %311 = vector.load %arg11[%c1_175, %c80_176] : memref<2x256xf32, #tpu.memory_space<vmem>>, vector<1x16xf32>
    tpu.vector_store %arg11[%c1_175, %c80_176], %310 {strides = array<i32>} : memref<2x256xf32, #tpu.memory_space<vmem>>, vector<1x16xf32>,
    %312 = vector.extract_strided_slice %299 {offsets = [6, 0], sizes = [1, 16], strides = [1, 1]} : vector<16x128xf32> to vector<1x16xf32>
    %c1_177 = arith.constant 1 : index
    %c96_178 = arith.constant 96 : index
    %313 = vector.load %arg11[%c1_177, %c96_178] : memref<2x256xf32, #tpu.memory_space<vmem>>, vector<1x16xf32>
    tpu.vector_store %arg11[%c1_177, %c96_178], %312 {strides = array<i32>} : memref<2x256xf32, #tpu.memory_space<vmem>>, vector<1x16xf32>,
    %314 = vector.extract_strided_slice %299 {offsets = [7, 0], sizes = [1, 16], strides = [1, 1]} : vector<16x128xf32> to vector<1x16xf32>
    %c1_179 = arith.constant 1 : index
    %c112_180 = arith.constant 112 : index
    %315 = vector.load %arg11[%c1_179, %c112_180] : memref<2x256xf32, #tpu.memory_space<vmem>>, vector<1x16xf32>
    tpu.vector_store %arg11[%c1_179, %c112_180], %314 {strides = array<i32>} : memref<2x256xf32, #tpu.memory_space<vmem>>, vector<1x16xf32>,
    %316 = vector.extract_strided_slice %299 {offsets = [8, 0], sizes = [1, 16], strides = [1, 1]} : vector<16x128xf32> to vector<1x16xf32>
    %c1_181 = arith.constant 1 : index
    %c128_182 = arith.constant 128 : index
    %317 = vector.load %arg11[%c1_181, %c128_182] : memref<2x256xf32, #tpu.memory_space<vmem>>, vector<1x16xf32>
    tpu.vector_store %arg11[%c1_181, %c128_182], %316 {strides = array<i32>} : memref<2x256xf32, #tpu.memory_space<vmem>>, vector<1x16xf32>,
    %318 = vector.extract_strided_slice %299 {offsets = [9, 0], sizes = [1, 16], strides = [1, 1]} : vector<16x128xf32> to vector<1x16xf32>
    %c1_183 = arith.constant 1 : index
    %c144_184 = arith.constant 144 : index
    %319 = vector.load %arg11[%c1_183, %c144_184] : memref<2x256xf32, #tpu.memory_space<vmem>>, vector<1x16xf32>
    tpu.vector_store %arg11[%c1_183, %c144_184], %318 {strides = array<i32>} : memref<2x256xf32, #tpu.memory_space<vmem>>, vector<1x16xf32>,
    %320 = vector.extract_strided_slice %299 {offsets = [10, 0], sizes = [1, 16], strides = [1, 1]} : vector<16x128xf32> to vector<1x16xf32>
    %c1_185 = arith.constant 1 : index
    %c160_186 = arith.constant 160 : index
    %321 = vector.load %arg11[%c1_185, %c160_186] : memref<2x256xf32, #tpu.memory_space<vmem>>, vector<1x16xf32>
    tpu.vector_store %arg11[%c1_185, %c160_186], %320 {strides = array<i32>} : memref<2x256xf32, #tpu.memory_space<vmem>>, vector<1x16xf32>,
    %322 = vector.extract_strided_slice %299 {offsets = [11, 0], sizes = [1, 16], strides = [1, 1]} : vector<16x128xf32> to vector<1x16xf32>
    %c1_187 = arith.constant 1 : index
    %c176_188 = arith.constant 176 : index
    %323 = vector.load %arg11[%c1_187, %c176_188] : memref<2x256xf32, #tpu.memory_space<vmem>>, vector<1x16xf32>
    tpu.vector_store %arg11[%c1_187, %c176_188], %322 {strides = array<i32>} : memref<2x256xf32, #tpu.memory_space<vmem>>, vector<1x16xf32>,
    %324 = vector.extract_strided_slice %299 {offsets = [12, 0], sizes = [1, 16], strides = [1, 1]} : vector<16x128xf32> to vector<1x16xf32>
    %c1_189 = arith.constant 1 : index
    %c192_190 = arith.constant 192 : index
    %325 = vector.load %arg11[%c1_189, %c192_190] : memref<2x256xf32, #tpu.memory_space<vmem>>, vector<1x16xf32>
    tpu.vector_store %arg11[%c1_189, %c192_190], %324 {strides = array<i32>} : memref<2x256xf32, #tpu.memory_space<vmem>>, vector<1x16xf32>,
    %326 = vector.extract_strided_slice %299 {offsets = [13, 0], sizes = [1, 16], strides = [1, 1]} : vector<16x128xf32> to vector<1x16xf32>
    %c1_191 = arith.constant 1 : index
    %c208_192 = arith.constant 208 : index
    %327 = vector.load %arg11[%c1_191, %c208_192] : memref<2x256xf32, #tpu.memory_space<vmem>>, vector<1x16xf32>
    tpu.vector_store %arg11[%c1_191, %c208_192], %326 {strides = array<i32>} : memref<2x256xf32, #tpu.memory_space<vmem>>, vector<1x16xf32>,
    %328 = vector.extract_strided_slice %299 {offsets = [14, 0], sizes = [1, 16], strides = [1, 1]} : vector<16x128xf32> to vector<1x16xf32>
    %c1_193 = arith.constant 1 : index
    %c224_194 = arith.constant 224 : index
    %329 = vector.load %arg11[%c1_193, %c224_194] : memref<2x256xf32, #tpu.memory_space<vmem>>, vector<1x16xf32>
    tpu.vector_store %arg11[%c1_193, %c224_194], %328 {strides = array<i32>} : memref<2x256xf32, #tpu.memory_space<vmem>>, vector<1x16xf32>,
    %330 = vector.extract_strided_slice %299 {offsets = [15, 0], sizes = [1, 16], strides = [1, 1]} : vector<16x128xf32> to vector<1x16xf32>
    %c1_195 = arith.constant 1 : index
    %c240_196 = arith.constant 240 : index
    %331 = vector.load %arg11[%c1_195, %c240_196] : memref<2x256xf32, #tpu.memory_space<vmem>>, vector<1x16xf32>
    tpu.vector_store %arg11[%c1_195, %c240_196], %330 {strides = array<i32>} : memref<2x256xf32, #tpu.memory_space<vmem>>, vector<1x16xf32>,
    %c480 = arith.constant 480 : index
    %c0_197 = arith.constant 0 : index
    %332 = vector.load %arg3[%c480, %c0_197] : memref<872x128xbf16, #tpu.memory_space<vmem>>, vector<256x128xbf16>
    %c736 = arith.constant 736 : index
    %c0_198 = arith.constant 0 : index
    %333 = vector.load %arg3[%c736, %c0_198] : memref<872x128xbf16, #tpu.memory_space<vmem>>, vector<128x128xbf16>
    %c864 = arith.constant 864 : index
    %c0_199 = arith.constant 0 : index
    %334 = vector.load %arg3[%c864, %c0_199] : memref<872x128xbf16, #tpu.memory_space<vmem>>, vector<2x128xbf16>
    %c16_200 = arith.constant 16 : index
    %c0_201 = arith.constant 0 : index
    %335 = vector.load %arg2[%c16_200, %c0_201] : memref<24x128xf32, #tpu.memory_space<vmem>>, vector<1x128xf32>
    %c17 = arith.constant 17 : index
    %c0_202 = arith.constant 0 : index
    %336 = vector.load %arg2[%c17, %c0_202] : memref<24x128xf32, #tpu.memory_space<vmem>>, vector<1x128xf32>
    %c18_203 = arith.constant 18 : index
    %c0_204 = arith.constant 0 : index
    %337 = vector.load %arg2[%c18_203, %c0_204] : memref<24x128xf32, #tpu.memory_space<vmem>>, vector<1x2xf32>
    %c0_205 = arith.constant 0 : index
    %c0_206 = arith.constant 0 : index
    %338 = vector.load %arg11[%c0_205, %c0_206] : memref<2x256xf32, #tpu.memory_space<vmem>>, vector<2x256xf32>
    %339 = arith.truncf %338 : vector<2x256xf32> to vector<2x256xbf16>
    %cst_207 = arith.constant dense<0.000000e+00> : vector<2x128xf32>
    %340 = tpu.matmul %339, %332, %cst_207 {dimension_numbers = #tpu.dot_dimension_numbers<[1], [0], [0], [1], [0, 0, 1, 1], [], []>} : vector<2x256xbf16>, vector<256x128xbf16>, vector<2x128xf32> -> vector<2x128xf32>
    %341 = vector.broadcast %335 : vector<1x128xf32> to vector<2x128xf32>
    %342 = arith.addf %340, %341 : vector<2x128xf32>
    %cst_208 = arith.constant 0.000000e+00 : f32
    %343 = vector.broadcast %cst_208 : f32 to vector<2x128xf32>
    %344 = arith.maximumf %342, %343 : vector<2x128xf32>
    %345 = arith.truncf %344 : vector<2x128xf32> to vector<2x128xbf16>
    %cst_209 = arith.constant dense<0.000000e+00> : vector<2x128xf32>
    %346 = tpu.matmul %345, %333, %cst_209 {dimension_numbers = #tpu.dot_dimension_numbers<[1], [0], [0], [1], [0, 0, 1, 1], [], []>} : vector<2x128xbf16>, vector<128x128xbf16>, vector<2x128xf32> -> vector<2x128xf32>
    %347 = vector.broadcast %336 : vector<1x128xf32> to vector<2x128xf32>
    %348 = arith.addf %346, %347 : vector<2x128xf32>
    %cst_210 = arith.constant 0.000000e+00 : f32
    %349 = vector.broadcast %cst_210 : f32 to vector<2x128xf32>
    %350 = arith.maximumf %348, %349 : vector<2x128xf32>
    %351 = arith.truncf %350 : vector<2x128xf32> to vector<2x128xbf16>
    %cst_211 = arith.constant dense<0.000000e+00> : vector<2x2xf32>
    %352 = tpu.matmul %351, %334, %cst_211 {dimension_numbers = #tpu.dot_dimension_numbers<[1], [1], [0], [0], [0, 0, 1, 0], [], []>} : vector<2x128xbf16>, vector<2x128xbf16>, vector<2x2xf32> -> vector<2x2xf32>
    %353 = vector.broadcast %337 : vector<1x2xf32> to vector<2x2xf32>
    %354 = arith.addf %352, %353 : vector<2x2xf32>
    %cst_212 = arith.constant dense<0xFF800000> : vector<2xf32>
    %355 = vector.multi_reduction <maximumf>, %354, %cst_212 [1] : vector<2x2xf32> to vector<2xf32>
    %356 = vector.shape_cast %355 : vector<2xf32> to vector<2x1xf32>
    %357 = vector.broadcast %356 : vector<2x1xf32> to vector<2x2xf32>
    %358 = arith.subf %354, %357 : vector<2x2xf32>
    %359 = math.exp %358 : vector<2x2xf32>
    %cst_213 = arith.constant dense<0.000000e+00> : vector<2xf32>
    %360 = vector.multi_reduction <add>, %359, %cst_213 [1] : vector<2x2xf32> to vector<2xf32>
    %361 = vector.shape_cast %360 : vector<2xf32> to vector<2x1xf32>
    %362 = vector.broadcast %361 : vector<2x1xf32> to vector<2x2xf32>
    %363 = arith.divf %359, %362 : vector<2x2xf32>
    %c0_214 = arith.constant 0 : index
    %c0_215 = arith.constant 0 : index
    %364 = vector.load %arg4[%c0_214, %c0_215] : memref<2x2xf32, #tpu.memory_space<vmem>>, vector<2x2xf32>
    tpu.vector_store %arg4[%c0_214, %c0_215], %363 {strides = array<i32>} : memref<2x2xf32, #tpu.memory_space<vmem>>, vector<2x2xf32>,
    return
  }
}

</mosaic_0001>

<bundles_post_ra>
// kernel: net_forward.1
= control target key start
LH: loop header
LB: loop body
LE: loop exit
PB: predicated region body
PF: predicated region fallthrough
CT: control target
= control target key end

     0   :  { %v4324_v1 = vmov 1   ;;  %v4325_v2 = vmov 3   ;;  %v4326_v3 = vmov 2   ;;  %v4327_v4 = vmov 4   ;;  %s6981_s0 = inlined_call_operand.vmem [shape: f32[1,1152], index: 0, kind: input, shape index: {}]   ;;  %s6982_s1 = inlined_call_operand.vmem [shape: f32[1,1280], index: 1, kind: input, shape index: {}]   ;;  %s6983_s2 = inlined_call_operand.vmem [shape: f32[24,128], index: 2, kind: input, shape index: {}]   ;;  %s6984_s3 = inlined_call_operand.vmem [shape: bf16[872,128], index: 3, kind: input, shape index: {}]   ;;  %s6985_s4 = inlined_call_operand.hbm [shape: f32[2,2], index: 4, kind: output, shape index: {}]  }
   0x1   :  { %v4419_v0 = vld [vmem:[%s6983_s2] sm:$0x3f]  ;;  %4109 = vset.pattern.permute.xlu0 %v4324_v1  ;;  %4111 = vset.pattern.permute.xlu1 %v4325_v2  ;;  %v4328_v5 = vmov 0   ;;  %v4329_v6 = vmov 5   ;;  %v4330_v7 = vmov 6   ;;  %v4331_v8 = vmov 7  }
   0x2   :  { %93 = vperm.xlu0 %4109, %v4419_v0   ;;  %227 = vperm.xlu1 %4111, %v4419_v0   ;;  %2231 = vst [vmem:[#allocation4] sm:$0x77] %v4328_v5  ;;  %2232 = vst [vmem:[#allocation4 + $0x8] sm:$0x7] %v4328_v5  ;;  %v4332_v9 = vmov 9   ;;  %v4333_v10 = vmov 8  }
   0x3   :  { %2547 = vst [vmem:[#allocation5] sm:$0xff] %v4328_v5  ;;  %2548 = vst [vmem:[#allocation5 + $0x18] sm:$0xff] %v4328_v5  ;;  %v4334_v11 = vmov 12   ;;  %v4335_v12 = vmov 10   ;;  %v4336_v13 = vmov 15   ;;  %v4337_v14 = vmov 11  }
   0x4   :  { %2549 = vst [vmem:[#allocation5 + $0x50] sm:$0xff] %v4328_v5  ;;  %2550 = vst [vmem:[#allocation5 + $0x60] sm:$0xff] %v4328_v5  ;;  %v4338_v15 = vmov 18   ;;  %v4339_v16 = vmov 13   ;;  %v4340_v17 = vmov 21   ;;  %v4341_v18 = vmov 14  }
   0x5   :  { %2551 = vst [vmem:[#allocation5 + $0x68] sm:$0xff] %v4328_v5  ;;  %2552 = vst [vmem:[#allocation5 + $0x20] sm:$0xff] %v4328_v5  ;;  %v4342_v19 = vmov 24  }
   0x6   :  { %4110 = vset.pattern.permute.xlu0 %v4326_v3  ;;  %4112 = vset.pattern.permute.xlu1 %v4327_v4  ;;  %2553 = vst [vmem:[#allocation5 + $0x70] sm:$0xff] %v4328_v5  ;;  %2554 = vst [vmem:[#allocation5 + $0x10] sm:$0xff] %v4328_v5 }
   0x7   :  { %2555 = vst [vmem:[#allocation5 + $0x28] sm:$0xff] %v4328_v5  ;;  %160 = vperm.xlu0 %4110, %v4419_v0   ;;  %294 = vperm.xlu1 %4112, %v4419_v0  }
   0xb   :  { %4113 = vset.pattern.permute.xlu1 %v4329_v6  ;;  %4114 = vset.pattern.permute.xlu0 %v4330_v7 }
   0xc   :  { %361 = vperm.xlu1 %4113, %v4419_v0   ;;  %428 = vperm.xlu0 %4114, %v4419_v0  }
  0x10   :  { %4115 = vset.pattern.permute.xlu1 %v4331_v8  ;;  %4117 = vset.pattern.permute.xlu0 %v4332_v9 }
  0x11   :  { %495 = vperm.xlu1 %4115, %v4419_v0   ;;  %629 = vperm.xlu0 %4117, %v4419_v0  }
  0x15   :  { %4116 = vset.pattern.permute.xlu1 %v4333_v10  ;;  %4120 = vset.pattern.permute.xlu0 %v4334_v11 }
  0x16   :  { %562 = vperm.xlu1 %4116, %v4419_v0   ;;  %830 = vperm.xlu0 %4120, %v4419_v0  }
  0x1a   :  { %4118 = vset.pattern.permute.xlu1 %v4335_v12  ;;  %4123 = vset.pattern.permute.xlu0 %v4336_v13 }
  0x1b   :  { %696 = vperm.xlu1 %4118, %v4419_v0   ;;  %1031 = vperm.xlu0 %4123, %v4419_v0  }
  0x1f   :  { %4119 = vset.pattern.permute.xlu1 %v4337_v14  ;;  %4126 = vset.pattern.permute.xlu0 %v4338_v15 }
  0x20   :  { %763 = vperm.xlu1 %4119, %v4419_v0   ;;  %1232 = vperm.xlu0 %4126, %v4419_v0  }
  0x24   :  { %4121 = vset.pattern.permute.xlu1 %v4339_v16  ;;  %4129 = vset.pattern.permute.xlu0 %v4340_v17 }
  0x25   :  { %897 = vperm.xlu1 %4121, %v4419_v0   ;;  %1433 = vperm.xlu0 %4129, %v4419_v0  }
  0x29   :  { %4122 = vset.pattern.permute.xlu1 %v4341_v18  ;;  %4132 = vset.pattern.permute.xlu0 %v4342_v19 }
  0x2a   :  { %964 = vperm.xlu1 %4122, %v4419_v0   ;;  %1634 = vperm.xlu0 %4132, %v4419_v0  }
  0x2b   :  { %9 = vsyncpa [#allocation10], 0  ;;  %v4343_v20 = vmov 16   ;;  %v4344_v21 = vmov 17   ;;  %v4345_v22 = vmov 19   ;;  %v4346_v23 = vmov 20  }
  0x2c   :  { %v4347_v24 = vmov 22   ;;  %v4348_v25 = vmov 23   ;;  %v29_v26 = vlaneseq  ;;  %v4467_v30 = vld [vmem:[%s6981_s0] sm:$0xff]  ;;  %s4349_s19 = smov 127   ;;  %s4350_s20 = smov 126   ;;  %vm132_vm0 = vcmask 1039360  }
  0x2d   :  { %s4351_s21 = smov 125   ;;  %s4352_s22 = smov 124   ;;  %vm7114_vm1 = vcmask 1031168   ;;  %vm7115_vm2 = vcmask 1022976   ;;  %vm333_vm3 = vcmask 1014784   ;;  %vm7117_vm4 = vcmask 867328  }
  0x2e   :  { %4124 = vset.pattern.permute.xlu1 %v4343_v20  ;;  %v4458_v27 = vshrl.u32 %v29_v26, 7  ;;  %s4353_s23 = smov 106   ;;  %s4354_s24 = smov 105   ;;  %vm7116_vm5 = vcmask 859136   ;;  %vm7112_vm6 = vcmask 850944   ;;  %vm7109_vm7 = vcmask 842752  }
  0x2f   :  { %1098 = vperm.xlu1 %4124, %v4419_v0   ;;  %s4355_s25 = smov 104   ;;  %s4356_s26 = smov 103   ;;  %vm7104_vm8 = vcmask 834560   ;;  %vm7106_vm9 = vcmask 687104   ;;  %vm7107_vm10 = vcmask 678912   ;;  %vm7108_vm11 = vcmask 670720  }
  0x30   :  { %7118 = vst [vmem:[#allocation12_spill] sm:$0xff] %v4458_v27  ;;  %v6989_v28 = vsub.s32 2, %v4458_v27  ;;  %v4462_v29 = vsub.s32 1, %v4458_v27  ;;  %v6988_v33 = vsub.s32 4, %v4458_v27  ;;  %v6990_v34 = vsub.s32 3, %v4458_v27  ;;  %s4357_s27 = smov 102  }
  0x31   :  { %v6987_v36 = vsub.s32 5, %v4458_v27  ;;  %v4484_v37 = vsub.s32 0, %v4458_v27  ;;  %v6986_v58 = vsub.s32 6, %v4458_v27  ;;  %s4358_s28 = smov 84   ;;  %s4359_s29 = smov 83   ;;  %vm7110_vm12 = vcmask 662528  }
  0x32   :  { %7119 = vst [vmem:[#allocation13_spill] sm:$0xff] %v4462_v29  ;;  %v4472_v31 = vrot.slane %v4467_v30, %v6989_v28  ;;  %v4476_v32 = vrot.slane %v4467_v30, %v4462_v29  ;;  %v4493_v40 = vrot.slane %v4467_v30, %v6988_v33  ;;  %v4498_v41 = vrot.slane %v4467_v30, %v6990_v34  ;;  %s4360_s30 = smov 82   ;;  %s4361_s5 = smov 81  }
  0x33   :  { %4125 = vset.pattern.permute.xlu1 %v4344_v21  ;;  %7120 = vst [vmem:[#allocation14_spill] sm:$0xff] %v4484_v37  ;;  %v4509_v44 = vrot.slane %v4467_v30, %v6987_v36  ;;  %v4513_v45 = vrot.slane %v4467_v30, %v4484_v37  ;;  %v4559_v61 = vrot.slane %v4467_v30, %v6986_v58  ;;  %s4362_s6 = smov 80   ;;  %s4363_s7 = smov 62   ;;  %vm7111_vm13 = vcmask 654336  }
  0x34   :  { %1165 = vperm.xlu1 %4125, %v4419_v0   ;;  %s4364_s8 = smov 61   ;;  %s4366_s11 = smov 60   ;;  %vm1070_vm14 = vcmask 506880   ;;  %vm1137_vm15 = vcmask 498688  }
  0x35   :  { %7121 = vst [vmem:[#allocation15_spill] sm:$0xff] %v4559_v61  ;;  %s4367_s12 = smov 59   ;;  %s4368_s13 = smov 58  }
  0x36   :  { %s4369_s14 = smov 40   ;;  %s4370_s15 = smov 39  }
  0x37   :  { %s4371_s16 = smov 38   ;;  %s4372_s17 = smov 37  }
  0x38   :  { %4127 = vset.pattern.permute.xlu1 %v4345_v22  ;;  %s4373_s10 = smov 36   ;;  %s4374_s18 = smov 18  }
  0x39   :  { %1299 = vperm.xlu1 %4127, %v4419_v0  }
  0x3d   :  { %4128 = vset.pattern.permute.xlu1 %v4346_v23 }
  0x3e   :  { %1366 = vperm.xlu1 %4128, %v4419_v0  }
  0x42   :  { %4130 = vset.pattern.permute.xlu1 %v4347_v24 }
  0x43   :  { %1500 = vperm.xlu1 %4130, %v4419_v0  }
  0x47   :  { %4131 = vset.pattern.permute.xlu1 %v4348_v25 }
  0x48   :  { %1567 = vperm.xlu1 %4131, %v4419_v0  }
  0x4c   :  { %4133 = vset.pattern.permute.xlu1 %v4328_v5 }
  0x4d   :  { %24 = vperm.xlu1 %4133, %v4419_v0  }
  0x7d   :  { %v4480_v35 = vpop.permute.xlu0 %93  ;;  %v4537_v53 = vpop.permute.xlu1 %227 }
  0x7e   :  { %v98_v38 = vmul.f32 %v4480_v35, %v4472_v31  ;;  %v97_v39 = vmul.f32 %v4480_v35, %v4476_v32  ;;  %v100_v42 = vmul.f32 %v4480_v35, %v4493_v40  ;;  %v99_v43 = vmul.f32 %v4480_v35, %v4498_v41 }
  0x7f   :  { %v101_v47 = vmul.f32 %v4480_v35, %v4509_v44  ;;  %v96_v48 = vmul.f32 %v4480_v35, %v4513_v45  ;;  %v231_v56 = vmul.f32 %v4537_v53, %v4476_v32  ;;  %v232_v57 = vmul.f32 %v4537_v53, %v4472_v31 }
  0x80   :  { %118 = vrot.lane.b32.xlu0 %v98_v38, %s4349_s19  ;;  %116 = vrot.lane.b32.xlu1 %v97_v39, %s4349_s19  ;;  %v233_v59 = vmul.f32 %v4537_v53, %v4498_v41  ;;  %v234_v60 = vmul.f32 %v4537_v53, %v4493_v40  ;;  %v235_v63 = vmul.f32 %v4537_v53, %v4509_v44 }
  0x81   :  { %v102_v0 = vmul.f32 %v4480_v35, %v4559_v61  ;;  %v230_v3 = vmul.f32 %v4537_v53, %v4513_v45  ;;  %v236_v20 = vmul.f32 %v4537_v53, %v4559_v61 }
  0x82   :  { %v4517_v46 = vpop.permute.xlu0 %160  ;;  %v4563_v62 = vpop.permute.xlu1 %294 }
  0x83   :  { %v165_v49 = vmul.f32 %v4517_v46, %v4472_v31  ;;  %v164_v50 = vmul.f32 %v4517_v46, %v4476_v32  ;;  %v167_v51 = vmul.f32 %v4517_v46, %v4493_v40  ;;  %v166_v52 = vmul.f32 %v4517_v46, %v4498_v41 }
  0x84   :  { %122 = vrot.lane.b32.xlu0 %v100_v42, %s4349_s19  ;;  %120 = vrot.lane.b32.xlu1 %v99_v43, %s4349_s19  ;;  %v168_v54 = vmul.f32 %v4517_v46, %v4509_v44  ;;  %v163_v55 = vmul.f32 %v4517_v46, %v4513_v45  ;;  %v298_v1 = vmul.f32 %v4563_v62, %v4476_v32 }
  0x85   :  { %v299_v5 = vmul.f32 %v4563_v62, %v4472_v31  ;;  %v300_v6 = vmul.f32 %v4563_v62, %v4498_v41  ;;  %v301_v7 = vmul.f32 %v4563_v62, %v4493_v40  ;;  %v302_v8 = vmul.f32 %v4563_v62, %v4509_v44 }
  0x86   :  { %v169_v10 = vmul.f32 %v4517_v46, %v4559_v61  ;;  %v297_v11 = vmul.f32 %v4563_v62, %v4513_v45  ;;  %v303_v43 = vmul.f32 %v4563_v62, %v4559_v61 }
  0x87   :  { %v4573_v2 = vpop.permute.xlu1 %361  ;;  %v4617_v18 = vpop.permute.xlu0 %428 }
  0x88   :  { %124 = vrot.lane.b32.xlu1 %v101_v47, %s4349_s19  ;;  %114 = vrot.lane.b32.xlu0 %v96_v48, %s4349_s19  ;;  %v365_v12 = vmul.f32 %v4573_v2, %v4476_v32  ;;  %v366_v13 = vmul.f32 %v4573_v2, %v4472_v31  ;;  %v367_v15 = vmul.f32 %v4573_v2, %v4498_v41 }
  0x89   :  { %v368_v16 = vmul.f32 %v4573_v2, %v4493_v40  ;;  %v369_v19 = vmul.f32 %v4573_v2, %v4509_v44  ;;  %v432_v21 = vmul.f32 %v4617_v18, %v4476_v32  ;;  %v364_v23 = vmul.f32 %v4573_v2, %v4513_v45 }
  0x8a   :  { %v433_v24 = vmul.f32 %v4617_v18, %v4472_v31  ;;  %v434_v25 = vmul.f32 %v4617_v18, %v4498_v41  ;;  %v435_v38 = vmul.f32 %v4617_v18, %v4493_v40  ;;  %v436_v39 = vmul.f32 %v4617_v18, %v4509_v44 }
  0x8b   :  { %v431_v47 = vmul.f32 %v4617_v18, %v4513_v45 }
  0x8c   :  { %185 = vrot.lane.b32.xlu0 %v165_v49, %s4350_s20  ;;  %183 = vrot.lane.b32.xlu1 %v164_v50, %s4350_s20  ;;  %v4579_v4 = vpop.permute.xlu1 %495 }
  0x8d   :  { %v499_v48 = vmul.f32 %v4579_v4, %v4476_v32  ;;  %v500_v49 = vmul.f32 %v4579_v4, %v4472_v31 }
  0x90   :  { %189 = vrot.lane.b32.xlu0 %v167_v51, %s4350_s20  ;;  %187 = vrot.lane.b32.xlu1 %v166_v52, %s4350_s20  ;;  %v4661_v51 = vpop.permute.xlu0 %629  ;;  %v501_v52 = vmul.f32 %v4579_v4, %v4498_v41 }
  0x91   :  { %v4591_v9 = vpop.permute.xlu1 %562 }
  0x94   :  { %191 = vrot.lane.b32.xlu1 %v168_v54, %s4350_s20  ;;  %181 = vrot.lane.b32.xlu0 %v163_v55, %s4350_s20  ;;  %v502_v54 = vmul.f32 %v4579_v4, %v4493_v40 }
  0x96   :  { %v4605_v14 = vpop.permute.xlu1 %696 }
  0x98   :  { %250 = vrot.lane.b32.xlu1 %v231_v56, %s4351_s21  ;;  %252 = vrot.lane.b32.xlu0 %v232_v57, %s4351_s21  ;;  %v4673_v56 = vpop.permute.xlu0 %830  ;;  %v503_v57 = vmul.f32 %v4579_v4, %v4509_v44 }
  0x99   :  { %v836_v58 = vmul.f32 %v4673_v56, %v4498_v41  ;;  %v838_v33 = vmul.f32 %v4673_v56, %v4509_v44 }
  0x9b   :  { %v4613_v17 = vpop.permute.xlu1 %763 }
  0x9c   :  { %254 = vrot.lane.b32.xlu1 %v233_v59, %s4351_s21  ;;  %256 = vrot.lane.b32.xlu0 %v234_v60, %s4351_s21  ;;  %v370_v59 = vmul.f32 %v4573_v2, %v4559_v61  ;;  %v498_v60 = vmul.f32 %v4579_v4, %v4513_v45 }
  0xa0   :  { %258 = vrot.lane.b32.xlu1 %v235_v63, %s4351_s21  ;;  %126 = vrot.lane.b32.xlu0 %v102_v0, %s4349_s19  ;;  %v4627_v22 = vpop.permute.xlu1 %897  ;;  %v566_v63 = vmul.f32 %v4591_v9, %v4476_v32 }
  0xa4   :  { %248 = vrot.lane.b32.xlu1 %v230_v3, %s4351_s21  ;;  %317 = vrot.lane.b32.xlu0 %v298_v1, %s4352_s22  ;;  %v4687_v1 = vpop.permute.xlu0 %1031  ;;  %v567_v3 = vmul.f32 %v4591_v9, %v4472_v31 }
  0xa5   :  { %v4637_v26 = vpop.permute.xlu1 %964 }
  0xa8   :  { %319 = vrot.lane.b32.xlu1 %v299_v5, %s4352_s22  ;;  %321 = vrot.lane.b32.xlu0 %v300_v6, %s4352_s22  ;;  %v568_v5 = vmul.f32 %v4591_v9, %v4498_v41 }
  0xaa   :  { %v4647_v42 = vpop.permute.xlu1 %1098 }
  0xac   :  { %323 = vrot.lane.b32.xlu1 %v301_v7, %s4352_s22  ;;  %325 = vrot.lane.b32.xlu0 %v302_v8, %s4352_s22  ;;  %v4699_v7 = vpop.permute.xlu0 %1232  ;;  %v569_v8 = vmul.f32 %v4591_v9, %v4493_v40 }
  0xaf   :  { %v4659_v50 = vpop.permute.xlu1 %1165 }
  0xb0   :  { %193 = vrot.lane.b32.xlu1 %v169_v10, %s4350_s20  ;;  %315 = vrot.lane.b32.xlu0 %v297_v11, %s4352_s22  ;;  %v570_v10 = vmul.f32 %v4591_v9, %v4509_v44  ;;  %v437_v11 = vmul.f32 %v4617_v18, %v4559_v61 }
  0xb4   :  { %384 = vrot.lane.b32.xlu1 %v365_v12, %s4353_s23  ;;  %386 = vrot.lane.b32.xlu0 %v366_v13, %s4353_s23  ;;  %v4671_v55 = vpop.permute.xlu1 %1299  ;;  %v565_v12 = vmul.f32 %v4591_v9, %v4513_v45 }
  0xb8   :  { %388 = vrot.lane.b32.xlu1 %v367_v15, %s4353_s23  ;;  %390 = vrot.lane.b32.xlu0 %v368_v16, %s4353_s23  ;;  %v4713_v15 = vpop.permute.xlu0 %1433  ;;  %v634_v16 = vmul.f32 %v4661_v51, %v4472_v31 }
  0xb9   :  { %v4685_v0 = vpop.permute.xlu1 %1366 }
  0xbc   :  { %392 = vrot.lane.b32.xlu1 %v369_v19, %s4353_s23  ;;  %260 = vrot.lane.b32.xlu0 %v236_v20, %s4351_s21  ;;  %v633_v19 = vmul.f32 %v4661_v51, %v4476_v32 }
  0xbe   :  { %v4697_v6 = vpop.permute.xlu1 %1500 }
  0xc0   :  { %382 = vrot.lane.b32.xlu1 %v364_v23, %s4353_s23  ;;  %451 = vrot.lane.b32.xlu0 %v432_v21, %s4354_s24  ;;  %v4725_v21 = vpop.permute.xlu0 %1634  ;;  %v636_v23 = vmul.f32 %v4661_v51, %v4493_v40 }
  0xc3   :  { %v4711_v13 = vpop.permute.xlu1 %1567 }
  0xc4   :  { %453 = vrot.lane.b32.xlu1 %v433_v24, %s4354_s24  ;;  %455 = vrot.lane.b32.xlu0 %v434_v25, %s4354_s24  ;;  %v635_v24 = vmul.f32 %v4661_v51, %v4498_v41 }
  0xc8   :  { %457 = vrot.lane.b32.xlu1 %v435_v38, %s4354_s24  ;;  %459 = vrot.lane.b32.xlu0 %v436_v39, %s4354_s24  ;;  %v4723_v20 = vpop.permute.xlu1 %24  ;;  %v504_v39 = vmul.f32 %v4579_v4, %v4559_v61 }
  0xc9   :  { %7122 = vst [vmem:[#allocation16_spill] sm:$0xff] %v4723_v20 }
  0xcc   :  { %327 = vrot.lane.b32.xlu1 %v303_v43, %s4352_s22  ;;  %449 = vrot.lane.b32.xlu0 %v431_v47, %s4354_s24  ;;  %v637_v43 = vmul.f32 %v4661_v51, %v4509_v44 }
  0xd0   :  { %518 = vrot.lane.b32.xlu1 %v499_v48, %s4355_s25  ;;  %520 = vrot.lane.b32.xlu0 %v500_v49, %s4355_s25  ;;  %v700_v49 = vmul.f32 %v4605_v14, %v4476_v32 }
  0xd4   :  { %522 = vrot.lane.b32.xlu1 %v501_v52, %s4355_s25  ;;  %524 = vrot.lane.b32.xlu0 %v502_v54, %s4355_s25  ;;  %v632_v52 = vmul.f32 %v4661_v51, %v4513_v45 }
  0xd8   :  { %526 = vrot.lane.b32.xlu1 %v503_v57, %s4355_s25  ;;  %394 = vrot.lane.b32.xlu0 %v370_v59, %s4353_s23  ;;  %v702_v59 = vmul.f32 %v4605_v14, %v4498_v41 }
  0xdc   :  { %516 = vrot.lane.b32.xlu1 %v498_v60, %s4355_s25  ;;  %585 = vrot.lane.b32.xlu0 %v566_v63, %s4356_s26  ;;  %v701_v60 = vmul.f32 %v4605_v14, %v4472_v31 }
  0xe0   :  { %587 = vrot.lane.b32.xlu1 %v567_v3, %s4356_s26  ;;  %589 = vrot.lane.b32.xlu0 %v568_v5, %s4356_s26  ;;  %v704_v5 = vmul.f32 %v4605_v14, %v4509_v44 }
  0xe4   :  { %591 = vrot.lane.b32.xlu1 %v569_v8, %s4356_s26  ;;  %593 = vrot.lane.b32.xlu0 %v570_v10, %s4356_s26  ;;  %v703_v8 = vmul.f32 %v4605_v14, %v4493_v40 }
  0xe8   :  { %461 = vrot.lane.b32.xlu1 %v437_v11, %s4354_s24  ;;  %583 = vrot.lane.b32.xlu0 %v565_v12, %s4356_s26  ;;  %v699_v12 = vmul.f32 %v4605_v14, %v4513_v45 }
  0xec   :  { %654 = vrot.lane.b32.xlu0 %v634_v16, %s4357_s27  ;;  %652 = vrot.lane.b32.xlu1 %v633_v19, %s4357_s27  ;;  %v571_v16 = vmul.f32 %v4591_v9, %v4559_v61 }
  0xf0   :  { %658 = vrot.lane.b32.xlu0 %v636_v23, %s4357_s27  ;;  %656 = vrot.lane.b32.xlu1 %v635_v24, %s4357_s27  ;;  %v768_v24 = vmul.f32 %v4613_v17, %v4472_v31 }
  0xf2   :  { %v4733_v25 = vpop.permute.xlu1 %116  ;;  %v4735_v38 = vpop.permute.xlu0 %118 }
  0xf4   :  { %528 = vrot.lane.b32.xlu0 %v504_v39, %s4355_s25  ;;  %660 = vrot.lane.b32.xlu1 %v637_v43, %s4357_s27  ;;  %v767_v39 = vmul.f32 %v4613_v17, %v4476_v32 }
  0xf6   :  { %v4743_v47 = vpop.permute.xlu1 %120  ;;  %v4745_v48 = vpop.permute.xlu0 %122 }
  0xf8   :  { %719 = vrot.lane.b32.xlu0 %v700_v49, %s4358_s28  ;;  %650 = vrot.lane.b32.xlu1 %v632_v52, %s4357_s27  ;;  %v770_v52 = vmul.f32 %v4613_v17, %v4493_v40 }
  0xfa   :  { %v4753_v54 = vpop.permute.xlu1 %124  ;;  %v4755_v57 = vpop.permute.xlu0 %114 }
  0xfc   :  { %723 = vrot.lane.b32.xlu0 %v702_v59, %s4358_s28  ;;  %721 = vrot.lane.b32.xlu1 %v701_v60, %s4358_s28  ;;  %v769_v59 = vmul.f32 %v4613_v17, %v4498_v41 }
  0xfe   :  { %v4763_v63 = vpop.permute.xlu1 %183  ;;  %v4765_v3 = vpop.permute.xlu0 %185 }
 0x100   :  { %727 = vrot.lane.b32.xlu0 %v704_v5, %s4358_s28  ;;  %725 = vrot.lane.b32.xlu1 %v703_v8, %s4358_s28  ;;  %v638_v8 = vmul.f32 %v4661_v51, %v4559_v61 }
 0x102   :  { %v4773_v10 = vpop.permute.xlu1 %187  ;;  %v4775_v11 = vpop.permute.xlu0 %189 }
 0x104   :  { %717 = vrot.lane.b32.xlu0 %v699_v12, %s4358_s28  ;;  %595 = vrot.lane.b32.xlu1 %v571_v16, %s4356_s26  ;;  %v771_v12 = vmul.f32 %v4613_v17, %v4509_v44 }
 0x106   :  { %v4783_v19 = vpop.permute.xlu1 %191  ;;  %v4785_v23 = vpop.permute.xlu0 %181 }
 0x108   :  { %788 = vrot.lane.b32.xlu0 %v768_v24, %s4359_s29  ;;  %786 = vrot.lane.b32.xlu1 %v767_v39, %s4359_s29  ;;  %v766_v39 = vmul.f32 %v4613_v17, %v4513_v45 }
 0x10a   :  { %v4793_v43 = vpop.permute.xlu1 %250  ;;  %v4795_v49 = vpop.permute.xlu0 %252 }
 0x10c   :  { %792 = vrot.lane.b32.xlu0 %v770_v52, %s4359_s29  ;;  %790 = vrot.lane.b32.xlu1 %v769_v59, %s4359_s29  ;;  %v834_v52 = vmul.f32 %v4673_v56, %v4476_v32 }
 0x10e   :  { %v4803_v60 = vpop.permute.xlu1 %254  ;;  %v4805_v5 = vpop.permute.xlu0 %256 }
 0x110   :  { %662 = vrot.lane.b32.xlu0 %v638_v8, %s4357_s27  ;;  %794 = vrot.lane.b32.xlu1 %v771_v12, %s4359_s29  ;;  %v835_v12 = vmul.f32 %v4673_v56, %v4472_v31 }
 0x112   :  { %v4813_v16 = vpop.permute.xlu1 %258  ;;  %v4815_v24 = vpop.permute.xlu0 %126 }
 0x114   :  { %784 = vrot.lane.b32.xlu1 %v766_v39, %s4359_s29  ;;  %853 = vrot.lane.b32.xlu0 %v834_v52, %s4360_s30  ;;  %v837_v52 = vmul.f32 %v4673_v56, %v4493_v40 }
 0x116   :  { %v4823_v59 = vpop.permute.xlu1 %248  ;;  %v4825_v8 = vpop.permute.xlu0 %317 }
 0x117   :  { %7123 = vst [vmem:[#allocation17_spill] sm:$0xff] %v4825_v8 }
 0x118   :  { %855 = vrot.lane.b32.xlu1 %v835_v12, %s4360_s30  ;;  %857 = vrot.lane.b32.xlu0 %v836_v58, %s4360_s30  ;;  %v705_v58 = vmul.f32 %v4605_v14, %v4559_v61  ;;  %v833_v12 = vmul.f32 %v4673_v56, %v4513_v45 }
 0x11a   :  { %v4833_v36 = vpop.permute.xlu1 %319  ;;  %v4835_v39 = vpop.permute.xlu0 %321 }
 0x11b   :  { %7124 = vst [vmem:[#allocation18_spill] sm:$0xff] %v4833_v36  ;;  %7125 = vst [vmem:[#allocation19_spill] sm:$0xff] %v4835_v39 }
 0x11c   :  { %859 = vrot.lane.b32.xlu1 %v837_v52, %s4360_s30  ;;  %861 = vrot.lane.b32.xlu0 %v838_v33, %s4360_s30  ;;  %v901_v33 = vmul.f32 %v4627_v22, %v4476_v32  ;;  %v902_v52 = vmul.f32 %v4627_v22, %v4472_v31 }
 0x11e   :  { %v4843_v28 = vpop.permute.xlu1 %323  ;;  %v4845_v34 = vpop.permute.xlu0 %325 }
 0x11f   :  { %7126 = vst [vmem:[#allocation20_spill] sm:$0xff] %v4843_v28  ;;  %7127 = vst [vmem:[#allocation21_spill] sm:$0xff] %v4845_v34 }
 0x120   :  { %729 = vrot.lane.b32.xlu1 %v705_v58, %s4358_s28  ;;  %851 = vrot.lane.b32.xlu0 %v833_v12, %s4360_s30  ;;  %v903_v12 = vmul.f32 %v4627_v22, %v4498_v41 }
 0x122   :  { %v4853_v39 = vpop.permute.xlu1 %193  ;;  %v4855_v8 = vpop.permute.xlu0 %315 }
 0x123   :  { %7128 = vst [vmem:[#allocation22_spill] sm:$0xff] %v4853_v39  ;;  %7129 = vst [vmem:[#allocation23_spill] sm:$0xff] %v4855_v8  ;;  %v904_v8 = vmul.f32 %v4627_v22, %v4493_v40 }
 0x124   :  { %920 = vrot.lane.b32.xlu1 %v901_v33, %s4361_s5  ;;  %922 = vrot.lane.b32.xlu0 %v902_v52, %s4361_s5  ;;  %v905_v33 = vmul.f32 %v4627_v22, %v4509_v44  ;;  %v772_v52 = vmul.f32 %v4613_v17, %v4559_v61 }
 0x126   :  { %v4863_v34 = vpop.permute.xlu1 %384  ;;  %v4865_v58 = vpop.permute.xlu0 %386 }
 0x127   :  { %7130 = vst [vmem:[#allocation24_spill] sm:$0xff] %v4863_v34  ;;  %7131 = vst [vmem:[#allocation25_spill] sm:$0xff] %v4865_v58 }
 0x128   :  { %924 = vrot.lane.b32.xlu1 %v903_v12, %s4361_s5  ;;  %926 = vrot.lane.b32.xlu0 %v904_v8, %s4361_s5  ;;  %v900_v8 = vmul.f32 %v4627_v22, %v4513_v45  ;;  %v968_v12 = vmul.f32 %v4637_v26, %v4476_v32 }
 0x12a   :  { %v4873_v39 = vpop.permute.xlu1 %388  ;;  %v4875_v28 = vpop.permute.xlu0 %390 }
 0x12b   :  { %7132 = vst [vmem:[#allocation26_spill] sm:$0xff] %v4873_v39  ;;  %7133 = vst [vmem:[#allocation27_spill] sm:$0xff] %v4875_v28 }
 0x12c   :  { %928 = vrot.lane.b32.xlu1 %v905_v33, %s4361_s5  ;;  %796 = vrot.lane.b32.xlu0 %v772_v52, %s4359_s29  ;;  %v969_v52 = vmul.f32 %v4637_v26, %v4472_v31 }
 0x12e   :  { %v4883_v34 = vpop.permute.xlu1 %392  ;;  %v4885_v58 = vpop.permute.xlu0 %260 }
 0x12f   :  { %7134 = vst [vmem:[#allocation28_spill] sm:$0xff] %v4883_v34  ;;  %7135 = vst [vmem:[#allocation29_spill] sm:$0xff] %v4885_v58  ;;  %v970_v58 = vmul.f32 %v4637_v26, %v4498_v41 }
 0x130   :  { %918 = vrot.lane.b32.xlu1 %v900_v8, %s4361_s5  ;;  %987 = vrot.lane.b32.xlu0 %v968_v12, %s4362_s6  ;;  %v971_v12 = vmul.f32 %v4637_v26, %v4493_v40 }
 0x132   :  { %v4893_v28 = vpop.permute.xlu1 %382  ;;  %v4895_v33 = vpop.permute.xlu0 %451 }
 0x133   :  { %7136 = vst [vmem:[#allocation30_spill] sm:$0xff] %v4893_v28  ;;  %7137 = vst [vmem:[#allocation31_spill] sm:$0xff] %v4895_v33  ;;  %v972_v33 = vmul.f32 %v4637_v26, %v4509_v44 }
 0x134   :  { %989 = vrot.lane.b32.xlu1 %v969_v52, %s4362_s6  ;;  %991 = vrot.lane.b32.xlu0 %v970_v58, %s4362_s6  ;;  %v839_v58 = vmul.f32 %v4673_v56, %v4559_v61  ;;  %v967_v52 = vmul.f32 %v4637_v26, %v4513_v45 }
 0x136   :  { %v4903_v34 = vpop.permute.xlu1 %453  ;;  %v4905_v8 = vpop.permute.xlu0 %455 }
 0x137   :  { %7138 = vst [vmem:[#allocation32_spill] sm:$0xff] %v4903_v34  ;;  %7139 = vst [vmem:[#allocation33_spill] sm:$0xff] %v4905_v8 }
 0x138   :  { %993 = vrot.lane.b32.xlu1 %v971_v12, %s4362_s6  ;;  %995 = vrot.lane.b32.xlu0 %v972_v33, %s4362_s6  ;;  %v1035_v33 = vmul.f32 %v4687_v1, %v4476_v32  ;;  %v1036_v12 = vmul.f32 %v4687_v1, %v4472_v31 }
 0x13a   :  { %v4913_v28 = vpop.permute.xlu1 %457  ;;  %v4915_v39 = vpop.permute.xlu0 %459 }
 0x13b   :  { %7140 = vst [vmem:[#allocation34_spill] sm:$0xff] %v4913_v28  ;;  %7141 = vst [vmem:[#allocation35_spill] sm:$0xff] %v4915_v39 }
 0x13c   :  { %863 = vrot.lane.b32.xlu1 %v839_v58, %s4360_s30  ;;  %985 = vrot.lane.b32.xlu0 %v967_v52, %s4362_s6  ;;  %v1037_v52 = vmul.f32 %v4687_v1, %v4498_v41 }
 0x13e   :  { %v4923_v8 = vpop.permute.xlu1 %327  ;;  %v4925_v34 = vpop.permute.xlu0 %449 }
 0x13f   :  { %7142 = vst [vmem:[#allocation36_spill] sm:$0xff] %v4923_v8  ;;  %7143 = vst [vmem:[#allocation37_spill] sm:$0xff] %v4925_v34  ;;  %v1038_v34 = vmul.f32 %v4687_v1, %v4493_v40 }
 0x140   :  { %1054 = vrot.lane.b32.xlu1 %v1035_v33, %s4363_s7  ;;  %1056 = vrot.lane.b32.xlu0 %v1036_v12, %s4363_s7  ;;  %v1039_v33 = vmul.f32 %v4687_v1, %v4509_v44  ;;  %v906_v12 = vmul.f32 %v4627_v22, %v4559_v61 }
 0x142   :  { %v4933_v39 = vpop.permute.xlu1 %518  ;;  %v4935_v58 = vpop.permute.xlu0 %520 }
 0x143   :  { %7144 = vst [vmem:[#allocation38_spill] sm:$0xff] %v4933_v39  ;;  %7145 = vst [vmem:[#allocation39_spill] sm:$0xff] %v4935_v58 }
 0x144   :  { %1058 = vrot.lane.b32.xlu1 %v1037_v52, %s4363_s7  ;;  %1060 = vrot.lane.b32.xlu0 %v1038_v34, %s4363_s7  ;;  %v1034_v34 = vmul.f32 %v4687_v1, %v4513_v45  ;;  %v1102_v52 = vmul.f32 %v4647_v42, %v4476_v32 }
 0x146   :  { %v4943_v8 = vpop.permute.xlu1 %522  ;;  %v4945_v28 = vpop.permute.xlu0 %524 }
 0x147   :  { %7146 = vst [vmem:[#allocation40_spill] sm:$0xff] %v4943_v8  ;;  %7147 = vst [vmem:[#allocation41_spill] sm:$0xff] %v4945_v28 }
 0x148   :  { %1062 = vrot.lane.b32.xlu1 %v1039_v33, %s4363_s7  ;;  %930 = vrot.lane.b32.xlu0 %v906_v12, %s4361_s5  ;;  %v1103_v12 = vmul.f32 %v4647_v42, %v4472_v31 }
 0x14a   :  { %v4953_v39 = vpop.permute.xlu1 %526  ;;  %v4955_v58 = vpop.permute.xlu0 %394 }
 0x14b   :  { %7148 = vst [vmem:[#allocation42_spill] sm:$0xff] %v4953_v39  ;;  %7149 = vst [vmem:[#allocation43_spill] sm:$0xff] %v4955_v58  ;;  %v1104_v58 = vmul.f32 %v4647_v42, %v4498_v41  ;;  %v7018_v39 = vsub.s32 7, %v4458_v27 }
 0x14c   :  { %1052 = vrot.lane.b32.xlu1 %v1034_v34, %s4363_s7  ;;  %1121 = vrot.lane.b32.xlu0 %v1102_v52, %s4364_s8  ;;  %v1105_v52 = vmul.f32 %v4647_v42, %v4493_v40 }
 0x14e   :  { %v4963_v28 = vpop.permute.xlu1 %516  ;;  %v4965_v33 = vpop.permute.xlu0 %585 }
 0x14f   :  { %7150 = vst [vmem:[#allocation44_spill] sm:$0xff] %v4963_v28  ;;  %7151 = vst [vmem:[#allocation45_spill] sm:$0xff] %v4965_v33  ;;  %v1106_v33 = vmul.f32 %v4647_v42, %v4509_v44  ;;  %v4985_v28 = vrot.slane %v4467_v30, %v7018_v39 }
 0x150   :  { %1123 = vrot.lane.b32.xlu1 %v1103_v12, %s4364_s8  ;;  %1125 = vrot.lane.b32.xlu0 %v1104_v58, %s4364_s8  ;;  %v4990_v12 = vld [vmem:[%s6981_s0 + $0x8] ss:$0 sm:$0xff]  ;;  %v4365_v58 = vmov 32  }
 0x151   :  { %7154 = vst [vmem:[#allocation48_spill] sm:$0xff] %v4985_v28  ;;  %4134 = vset.pattern.permute.xlu0 %v4365_v58  ;;  %v103_v36 = vmul.f32 %v4480_v35, %v4985_v28  ;;  %v104_v30 = vmul.f32 %v4990_v12, %v4480_v35  ;;  %v1101_v58 = vmul.f32 %v4647_v42, %v4513_v45 }
 0x152   :  { %v4974_v34 = vpop.permute.xlu1 %587  ;;  %v4976_v8 = vpop.permute.xlu0 %589 }
 0x153   :  { %7152 = vst [vmem:[#allocation46_spill] sm:$0xff] %v4974_v34  ;;  %7153 = vst [vmem:[#allocation47_spill] sm:$0xff] %v4976_v8 }
 0x154   :  { %1127 = vrot.lane.b32.xlu1 %v1105_v52, %s4364_s8  ;;  %1129 = vrot.lane.b32.xlu0 %v1106_v33, %s4364_s8  ;;  %v973_v33 = vmul.f32 %v4637_v26, %v4559_v61 }
 0x156   :  { %v4994_v8 = vpop.permute.xlu1 %591  ;;  %v4996_v34 = vpop.permute.xlu0 %593 }
 0x157   :  { %7155 = vst [vmem:[#allocation49_spill] sm:$0xff] %v4996_v34 }
 0x158   :  { %128 = vrot.lane.b32.xlu1 %v103_v36, %s4349_s19  ;;  %130 = vrot.lane.b32.xlu0 %v104_v30, %s4349_s19  ;;  %v1169_v36 = vmul.f32 %v4659_v50, %v4476_v32  ;;  %v1170_v30 = vmul.f32 %v4659_v50, %v4472_v31 }
 0x15a   :  { %v5004_v39 = vpop.permute.xlu1 %461  ;;  %v5006_v52 = vpop.permute.xlu0 %583 }
 0x15b   :  { %7156 = vst [vmem:[#allocation50_spill] sm:$0xff] %v5004_v39  ;;  %7157 = vst [vmem:[#allocation51_spill] sm:$0xff] %v5006_v52 }
 0x15c   :  { %997 = vrot.lane.b32.xlu1 %v973_v33, %s4362_s6  ;;  %1119 = vrot.lane.b32.xlu0 %v1101_v58, %s4364_s8  ;;  %v1171_v58 = vmul.f32 %v4659_v50, %v4498_v41 }
 0x15e   :  { %v5014_v34 = vpop.permute.xlu1 %652  ;;  %v5016_v35 = vpop.permute.xlu0 %654 }
 0x15f   :  { %7158 = vst [vmem:[#allocation52_spill] sm:$0xff] %v5014_v34  ;;  %7159 = vst [vmem:[#allocation53_spill] sm:$0xff] %v5016_v35  ;;  %v1172_v34 = vmul.f32 %v4659_v50, %v4493_v40 }
 0x160   :  { %1188 = vrot.lane.b32.xlu1 %v1169_v36, %s4366_s11  ;;  %1190 = vrot.lane.b32.xlu0 %v1170_v30, %s4366_s11  ;;  %v1173_v36 = vmul.f32 %v4659_v50, %v4509_v44  ;;  %v170_v30 = vmul.f32 %v4517_v46, %v4985_v28 }
 0x162   :  { %v5024_v52 = vpop.permute.xlu1 %656  ;;  %v5026_v33 = vpop.permute.xlu0 %658 }
 0x163   :  { %7160 = vst [vmem:[#allocation54_spill] sm:$0xff] %v5024_v52  ;;  %7161 = vst [vmem:[#allocation55_spill] sm:$0xff] %v5026_v33 }
 0x164   :  { %1192 = vrot.lane.b32.xlu1 %v1171_v58, %s4366_s11  ;;  %1194 = vrot.lane.b32.xlu0 %v1172_v34, %s4366_s11  ;;  %v171_v34 = vmul.f32 %v4990_v12, %v4517_v46  ;;  %v1040_v58 = vmul.f32 %v4687_v1, %v4559_v61 }
 0x166   :  { %v5034_v35 = vpop.permute.xlu1 %660  ;;  %v5036_v39 = vpop.permute.xlu0 %528 }
 0x167   :  { %7162 = vst [vmem:[#allocation56_spill] sm:$0xff] %v5034_v35  ;;  %7163 = vst [vmem:[#allocation57_spill] sm:$0xff] %v5036_v39 }
 0x168   :  { %1196 = vrot.lane.b32.xlu1 %v1173_v36, %s4366_s11  ;;  %195 = vrot.lane.b32.xlu0 %v170_v30, %s4350_s20  ;;  %v1168_v36 = vmul.f32 %v4659_v50, %v4513_v45  ;;  %v1236_v30 = vmul.f32 %v4699_v7, %v4476_v32 }
 0x16a   :  { %v5044_v33 = vpop.permute.xlu1 %650  ;;  %v5046_v52 = vpop.permute.xlu0 %719 }
 0x16b   :  { %7164 = vst [vmem:[#allocation58_spill] sm:$0xff] %v5046_v52 }
 0x16c   :  { %197 = vrot.lane.b32.xlu1 %v171_v34, %s4350_s20  ;;  %1064 = vrot.lane.b32.xlu0 %v1040_v58, %s4363_s7  ;;  %v1237_v58 = vmul.f32 %v4699_v7, %v4472_v31 }
 0x16e   :  { %v5054_v39 = vpop.permute.xlu1 %721  ;;  %v5056_v35 = vpop.permute.xlu0 %723 }
 0x16f   :  { %7165 = vst [vmem:[#allocation59_spill] sm:$0xff] %v5054_v39  ;;  %7166 = vst [vmem:[#allocation60_spill] sm:$0xff] %v5056_v35  ;;  %v1238_v35 = vmul.f32 %v4699_v7, %v4498_v41 }
 0x170   :  { %1186 = vrot.lane.b32.xlu1 %v1168_v36, %s4366_s11  ;;  %1255 = vrot.lane.b32.xlu0 %v1236_v30, %s4367_s12  ;;  %v1239_v30 = vmul.f32 %v4699_v7, %v4493_v40 }
 0x172   :  { %v5064_v46 = vpop.permute.xlu1 %725  ;;  %v5066_v34 = vpop.permute.xlu0 %727 }
 0x173   :  { %7167 = vst [vmem:[#allocation61_spill] sm:$0xff] %v5064_v46  ;;  %7168 = vst [vmem:[#allocation62_spill] sm:$0xff] %v5066_v34  ;;  %v1240_v34 = vmul.f32 %v4699_v7, %v4509_v44 }
 0x174   :  { %1257 = vrot.lane.b32.xlu1 %v1237_v58, %s4367_s12  ;;  %1259 = vrot.lane.b32.xlu0 %v1238_v35, %s4367_s12  ;;  %v237_v35 = vmul.f32 %v4537_v53, %v4985_v28  ;;  %v238_v58 = vmul.f32 %v4990_v12, %v4537_v53 }
 0x176   :  { %v5074_v52 = vpop.permute.xlu1 %595  ;;  %v5076_v36 = vpop.permute.xlu0 %717 }
 0x177   :  { %7169 = vst [vmem:[#allocation63_spill] sm:$0xff] %v5074_v52  ;;  %7170 = vst [vmem:[#allocation64_spill] sm:$0xff] %v5076_v36 }
 0x178   :  { %1261 = vrot.lane.b32.xlu1 %v1239_v30, %s4367_s12  ;;  %1263 = vrot.lane.b32.xlu0 %v1240_v34, %s4367_s12  ;;  %v1107_v34 = vmul.f32 %v4647_v42, %v4559_v61  ;;  %v1235_v30 = vmul.f32 %v4699_v7, %v4513_v45 }
 0x17a   :  { %v5084_v46 = vpop.permute.xlu1 %786  ;;  %v5086_v39 = vpop.permute.xlu0 %788 }
 0x17b   :  { %7171 = vst [vmem:[#allocation65_spill] sm:$0xff] %v5084_v46 }
 0x17c   :  { %262 = vrot.lane.b32.xlu1 %v237_v35, %s4351_s21  ;;  %264 = vrot.lane.b32.xlu0 %v238_v58, %s4351_s21  ;;  %v1303_v35 = vmul.f32 %v4671_v55, %v4476_v32  ;;  %v1304_v58 = vmul.f32 %v4671_v55, %v4472_v31 }
 0x17e   :  { %v5094_v36 = vpop.permute.xlu1 %790  ;;  %v5096_v52 = vpop.permute.xlu0 %792 }
 0x17f   :  { %7172 = vst [vmem:[#allocation66_spill] sm:$0xff] %v5094_v36  ;;  %7173 = vst [vmem:[#allocation67_spill] sm:$0xff] %v5096_v52 }
 0x180   :  { %1131 = vrot.lane.b32.xlu1 %v1107_v34, %s4364_s8  ;;  %1253 = vrot.lane.b32.xlu0 %v1235_v30, %s4367_s12  ;;  %v1305_v30 = vmul.f32 %v4671_v55, %v4498_v41 }
 0x182   :  { %v5104_v46 = vpop.permute.xlu1 %794  ;;  %v5106_v53 = vpop.permute.xlu0 %662 }
 0x183   :  { %7174 = vst [vmem:[#allocation68_spill] sm:$0xff] %v5104_v46  ;;  %7175 = vst [vmem:[#allocation69_spill] sm:$0xff] %v5106_v53  ;;  %v1306_v53 = vmul.f32 %v4671_v55, %v4493_v40 }
 0x184   :  { %1322 = vrot.lane.b32.xlu1 %v1303_v35, %s4368_s13  ;;  %1324 = vrot.lane.b32.xlu0 %v1304_v58, %s4368_s13  ;;  %v1307_v35 = vmul.f32 %v4671_v55, %v4509_v44  ;;  %v304_v58 = vmul.f32 %v4563_v62, %v4985_v28 }
 0x186   :  { %v5114_v52 = vpop.permute.xlu1 %784  ;;  %v5116_v34 = vpop.permute.xlu0 %853 }
 0x187   :  { %7176 = vst [vmem:[#allocation70_spill] sm:$0xff] %v5114_v52  ;;  %7177 = vst [vmem:[#allocation71_spill] sm:$0xff] %v5116_v34 }
 0x188   :  { %1326 = vrot.lane.b32.xlu1 %v1305_v30, %s4368_s13  ;;  %1328 = vrot.lane.b32.xlu0 %v1306_v53, %s4368_s13  ;;  %v305_v53 = vmul.f32 %v4990_v12, %v4563_v62  ;;  %v1174_v30 = vmul.f32 %v4659_v50, %v4559_v61 }
 0x18a   :  { %v5124_v46 = vpop.permute.xlu1 %855  ;;  %v5126_v36 = vpop.permute.xlu0 %857 }
 0x18b   :  { %7178 = vst [vmem:[#allocation72_spill] sm:$0xff] %v5124_v46  ;;  %7179 = vst [vmem:[#allocation73_spill] sm:$0xff] %v5126_v36 }
 0x18c   :  { %1330 = vrot.lane.b32.xlu1 %v1307_v35, %s4368_s13  ;;  %329 = vrot.lane.b32.xlu0 %v304_v58, %s4352_s22  ;;  %v1302_v35 = vmul.f32 %v4671_v55, %v4513_v45  ;;  %v1370_v58 = vmul.f32 %v4685_v0, %v4476_v32 }
 0x18e   :  { %v5134_v34 = vpop.permute.xlu1 %859  ;;  %v5136_v52 = vpop.permute.xlu0 %861 }
 0x18f   :  { %7180 = vst [vmem:[#allocation74_spill] sm:$0xff] %v5136_v52 }
 0x190   :  { %331 = vrot.lane.b32.xlu1 %v305_v53, %s4352_s22  ;;  %1198 = vrot.lane.b32.xlu0 %v1174_v30, %s4366_s11  ;;  %v1371_v30 = vmul.f32 %v4685_v0, %v4472_v31 }
 0x192   :  { %v5144_v36 = vpop.permute.xlu1 %729  ;;  %v5146_v46 = vpop.permute.xlu0 %851 }
 0x193   :  { %7181 = vst [vmem:[#allocation75_spill] sm:$0xff] %v5144_v36  ;;  %7182 = vst [vmem:[#allocation76_spill] sm:$0xff] %v5146_v46  ;;  %v1372_v46 = vmul.f32 %v4685_v0, %v4498_v41 }
 0x194   :  { %1320 = vrot.lane.b32.xlu1 %v1302_v35, %s4368_s13  ;;  %1389 = vrot.lane.b32.xlu0 %v1370_v58, %s4369_s14  ;;  %v1373_v58 = vmul.f32 %v4685_v0, %v4493_v40 }
 0x196   :  { %v5154_v62 = vpop.permute.xlu1 %920  ;;  %v5156_v53 = vpop.permute.xlu0 %922 }
 0x197   :  { %7183 = vst [vmem:[#allocation77_spill] sm:$0xff] %v5154_v62  ;;  %7184 = vst [vmem:[#allocation78_spill] sm:$0xff] %v5156_v53  ;;  %v1374_v62 = vmul.f32 %v4685_v0, %v4509_v44 }
 0x198   :  { %1391 = vrot.lane.b32.xlu1 %v1371_v30, %s4369_s14  ;;  %1393 = vrot.lane.b32.xlu0 %v1372_v46, %s4369_s14  ;;  %v371_v46 = vmul.f32 %v4573_v2, %v4985_v28  ;;  %v372_v30 = vmul.f32 %v4990_v12, %v4573_v2 }
 0x19a   :  { %v5164_v36 = vpop.permute.xlu1 %924  ;;  %v5166_v35 = vpop.permute.xlu0 %926 }
 0x19b   :  { %7185 = vst [vmem:[#allocation79_spill] sm:$0xff] %v5164_v36  ;;  %7186 = vst [vmem:[#allocation80_spill] sm:$0xff] %v5166_v35 }
 0x19c   :  { %1395 = vrot.lane.b32.xlu1 %v1373_v58, %s4369_s14  ;;  %1397 = vrot.lane.b32.xlu0 %v1374_v62, %s4369_s14  ;;  %v1241_v62 = vmul.f32 %v4699_v7, %v4559_v61  ;;  %v1369_v58 = vmul.f32 %v4685_v0, %v4513_v45 }
 0x19e   :  { %v5174_v53 = vpop.permute.xlu1 %928  ;;  %v5176_v52 = vpop.permute.xlu0 %796 }
 0x19f   :  { %7187 = vst [vmem:[#allocation81_spill] sm:$0xff] %v5176_v52 }
 0x1a0   :  { %396 = vrot.lane.b32.xlu1 %v371_v46, %s4353_s23  ;;  %398 = vrot.lane.b32.xlu0 %v372_v30, %s4353_s23  ;;  %v1437_v46 = vmul.f32 %v4713_v15, %v4476_v32  ;;  %v1438_v30 = vmul.f32 %v4713_v15, %v4472_v31 }
 0x1a2   :  { %v5184_v35 = vpop.permute.xlu1 %918  ;;  %v5186_v36 = vpop.permute.xlu0 %987 }
 0x1a3   :  { %7188 = vst [vmem:[#allocation82_spill] sm:$0xff] %v5184_v35  ;;  %7189 = vst [vmem:[#allocation83_spill] sm:$0xff] %v5186_v36 }
 0x1a4   :  { %1265 = vrot.lane.b32.xlu1 %v1241_v62, %s4367_s12  ;;  %1387 = vrot.lane.b32.xlu0 %v1369_v58, %s4369_s14  ;;  %v1439_v58 = vmul.f32 %v4713_v15, %v4498_v41 }
 0x1a6   :  { %v5194_v52 = vpop.permute.xlu1 %989  ;;  %v5196_v2 = vpop.permute.xlu0 %991 }
 0x1a7   :  { %7190 = vst [vmem:[#allocation84_spill] sm:$0xff] %v5194_v52  ;;  %7191 = vst [vmem:[#allocation85_spill] sm:$0xff] %v5196_v2  ;;  %v1440_v2 = vmul.f32 %v4713_v15, %v4493_v40 }
 0x1a8   :  { %1456 = vrot.lane.b32.xlu1 %v1437_v46, %s4370_s15  ;;  %1458 = vrot.lane.b32.xlu0 %v1438_v30, %s4370_s15  ;;  %v1441_v46 = vmul.f32 %v4713_v15, %v4509_v44  ;;  %v438_v30 = vmul.f32 %v4617_v18, %v4985_v28 }
 0x1aa   :  { %v5204_v36 = vpop.permute.xlu1 %993  ;;  %v5206_v62 = vpop.permute.xlu0 %995 }
 0x1ab   :  { %7192 = vst [vmem:[#allocation86_spill] sm:$0xff] %v5204_v36  ;;  %7193 = vst [vmem:[#allocation87_spill] sm:$0xff] %v5206_v62 }
 0x1ac   :  { %1460 = vrot.lane.b32.xlu1 %v1439_v58, %s4370_s15  ;;  %1462 = vrot.lane.b32.xlu0 %v1440_v2, %s4370_s15  ;;  %v439_v2 = vmul.f32 %v4990_v12, %v4617_v18  ;;  %v1308_v58 = vmul.f32 %v4671_v55, %v4559_v61 }
 0x1ae   :  { %v5214_v52 = vpop.permute.xlu1 %863  ;;  %v5216_v35 = vpop.permute.xlu0 %985 }
 0x1af   :  { %7194 = vst [vmem:[#allocation88_spill] sm:$0xff] %v5214_v52  ;;  %7195 = vst [vmem:[#allocation89_spill] sm:$0xff] %v5216_v35 }
 0x1b0   :  { %1464 = vrot.lane.b32.xlu1 %v1441_v46, %s4370_s15  ;;  %463 = vrot.lane.b32.xlu0 %v438_v30, %s4354_s24  ;;  %v1436_v46 = vmul.f32 %v4713_v15, %v4513_v45  ;;  %v1504_v30 = vmul.f32 %v4697_v6, %v4476_v32 }
 0x1b2   :  { %v5224_v62 = vpop.permute.xlu1 %1054  ;;  %v5226_v36 = vpop.permute.xlu0 %1056 }
 0x1b3   :  { %7196 = vst [vmem:[#allocation90_spill] sm:$0xff] %v5224_v62 }
 0x1b4   :  { %465 = vrot.lane.b32.xlu1 %v439_v2, %s4354_s24  ;;  %1332 = vrot.lane.b32.xlu0 %v1308_v58, %s4368_s13  ;;  %v1505_v58 = vmul.f32 %v4697_v6, %v4472_v31 }
 0x1b6   :  { %v5234_v35 = vpop.permute.xlu1 %1058  ;;  %v5236_v52 = vpop.permute.xlu0 %1060 }
 0x1b7   :  { %7197 = vst [vmem:[#allocation91_spill] sm:$0xff] %v5234_v35  ;;  %7198 = vst [vmem:[#allocation92_spill] sm:$0xff] %v5236_v52  ;;  %v1506_v52 = vmul.f32 %v4697_v6, %v4498_v41 }
 0x1b8   :  { %1454 = vrot.lane.b32.xlu1 %v1436_v46, %s4370_s15  ;;  %1523 = vrot.lane.b32.xlu0 %v1504_v30, %s4371_s16  ;;  %v1507_v30 = vmul.f32 %v4697_v6, %v4493_v40 }
 0x1ba   :  { %v5244_v18 = vpop.permute.xlu1 %1062  ;;  %v5246_v2 = vpop.permute.xlu0 %930 }
 0x1bb   :  { %7199 = vst [vmem:[#allocation93_spill] sm:$0xff] %v5244_v18  ;;  %7200 = vst [vmem:[#allocation94_spill] sm:$0xff] %v5246_v2  ;;  %v1508_v2 = vmul.f32 %v4697_v6, %v4509_v44 }
 0x1bc   :  { %1525 = vrot.lane.b32.xlu1 %v1505_v58, %s4371_s16  ;;  %1527 = vrot.lane.b32.xlu0 %v1506_v52, %s4371_s16  ;;  %v505_v52 = vmul.f32 %v4579_v4, %v4985_v28  ;;  %v506_v58 = vmul.f32 %v4990_v12, %v4579_v4 }
 0x1be   :  { %v5254_v35 = vpop.permute.xlu1 %1052  ;;  %v5256_v46 = vpop.permute.xlu0 %1121 }
 0x1bf   :  { %7201 = vst [vmem:[#allocation95_spill] sm:$0xff] %v5254_v35  ;;  %7202 = vst [vmem:[#allocation96_spill] sm:$0xff] %v5256_v46 }
 0x1c0   :  { %1529 = vrot.lane.b32.xlu1 %v1507_v30, %s4371_s16  ;;  %1531 = vrot.lane.b32.xlu0 %v1508_v2, %s4371_s16  ;;  %v1375_v2 = vmul.f32 %v4685_v0, %v4559_v61  ;;  %v1503_v30 = vmul.f32 %v4697_v6, %v4513_v45 }
 0x1c2   :  { %v5264_v18 = vpop.permute.xlu1 %1123  ;;  %v5266_v62 = vpop.permute.xlu0 %1125 }
 0x1c3   :  { %7203 = vst [vmem:[#allocation97_spill] sm:$0xff] %v5266_v62 }
 0x1c4   :  { %530 = vrot.lane.b32.xlu1 %v505_v52, %s4355_s25  ;;  %532 = vrot.lane.b32.xlu0 %v506_v58, %s4355_s25  ;;  %v1571_v52 = vmul.f32 %v4711_v13, %v4476_v32  ;;  %v1572_v58 = vmul.f32 %v4711_v13, %v4472_v31 }
 0x1c6   :  { %v5274_v46 = vpop.permute.xlu1 %1127  ;;  %v5276_v35 = vpop.permute.xlu0 %1129 }
 0x1c7   :  { %7204 = vst [vmem:[#allocation98_spill] sm:$0xff] %v5274_v46  ;;  %7205 = vst [vmem:[#allocation99_spill] sm:$0xff] %v5276_v35 }
 0x1c8   :  { %1399 = vrot.lane.b32.xlu1 %v1375_v2, %s4369_s14  ;;  %1521 = vrot.lane.b32.xlu0 %v1503_v30, %s4371_s16  ;;  %v1573_v30 = vmul.f32 %v4711_v13, %v4498_v41 }
 0x1ca   :  { %v5284_v62 = vpop.permute.xlu1 %128  ;;  %v5286_v4 = vpop.permute.xlu0 %130 }
 0x1cb   :  { %7206 = vst [vmem:[#allocation100_spill] sm:$0xff] %v5284_v62  ;;  %7207 = vst [vmem:[#allocation101_spill] sm:$0xff] %v5286_v4  ;;  %v1574_v4 = vmul.f32 %v4711_v13, %v4493_v40 }
 0x1cc   :  { %1590 = vrot.lane.b32.xlu1 %v1571_v52, %s4372_s17  ;;  %1592 = vrot.lane.b32.xlu0 %v1572_v58, %s4372_s17  ;;  %v1575_v52 = vmul.f32 %v4711_v13, %v4509_v44  ;;  %v4299_v58 = vld [vmem:[%s6983_s2] sm:$0x3f] }
 0x1ce   :  { %v5294_v35 = vpop.permute.xlu1 %997  ;;  %v5296_v2 = vpop.permute.xlu0 %1119 }
 0x1cf   :  { %7208 = vst [vmem:[#allocation102_spill] sm:$0xff] %v5294_v35  ;;  %7209 = vst [vmem:[#allocation103_spill] sm:$0xff] %v5296_v2 }
 0x1d0   :  { %1594 = vrot.lane.b32.xlu1 %v1573_v30, %s4372_s17  ;;  %1596 = vrot.lane.b32.xlu0 %v1574_v4, %s4372_s17  ;;  %v572_v4 = vmul.f32 %v4591_v9, %v4985_v28  ;;  %v1442_v30 = vmul.f32 %v4713_v15, %v4559_v61 }
 0x1d2   :  { %v5304_v62 = vpop.permute.xlu1 %1188  ;;  %v5306_v46 = vpop.permute.xlu0 %1190 }
 0x1d3   :  { %7210 = vst [vmem:[#allocation104_spill] sm:$0xff] %v5304_v62 }
 0x1d4   :  { %1598 = vrot.lane.b32.xlu1 %v1575_v52, %s4372_s17  ;;  %1702 = vperm.xlu0 %4134, %v4299_v58   ;;  %v573_v58 = vmul.f32 %v4990_v12, %v4591_v9 }
 0x1d6   :  { %v5314_v2 = vpop.permute.xlu1 %1192  ;;  %v5316_v35 = vpop.permute.xlu0 %1194 }
 0x1d7   :  { %7211 = vst [vmem:[#allocation105_spill] sm:$0xff] %v5314_v2  ;;  %7212 = vst [vmem:[#allocation106_spill] sm:$0xff] %v5316_v35  ;;  %v1638_v35 = vmul.f32 %v4725_v21, %v4476_v32 }
 0x1d8   :  { %597 = vrot.lane.b32.xlu1 %v572_v4, %s4356_s26  ;;  %1466 = vrot.lane.b32.xlu0 %v1442_v30, %s4370_s15  ;;  %v1570_v30 = vmul.f32 %v4711_v13, %v4513_v45 }
 0x1da   :  { %v5324_v52 = vpop.permute.xlu1 %1196  ;;  %v5326_v62 = vpop.permute.xlu0 %195 }
 0x1db   :  { %7213 = vst [vmem:[#allocation107_spill] sm:$0xff] %v5324_v52  ;;  %7214 = vst [vmem:[#allocation108_spill] sm:$0xff] %v5326_v62  ;;  %v1640_v62 = vmul.f32 %v4725_v21, %v4498_v41 }
 0x1dc   :  { %599 = vrot.lane.b32.xlu1 %v573_v58, %s4356_s26  ;;  %1657 = vrot.lane.b32.xlu0 %v1638_v35, %s4373_s10  ;;  %v1639_v35 = vmul.f32 %v4725_v21, %v4472_v31 }
 0x1de   :  { %v5334_v2 = vpop.permute.xlu1 %197  ;;  %v5336_v4 = vpop.permute.xlu0 %1064 }
 0x1df   :  { %7215 = vst [vmem:[#allocation109_spill] sm:$0xff] %v5334_v2  ;;  %7216 = vst [vmem:[#allocation110_spill] sm:$0xff] %v5336_v4  ;;  %v1642_v2 = vmul.f32 %v4725_v21, %v4509_v44 }
 0x1e0   :  { %1588 = vrot.lane.b32.xlu1 %v1570_v30, %s4372_s17  ;;  %1661 = vrot.lane.b32.xlu0 %v1640_v62, %s4373_s10  ;;  %v1641_v62 = vmul.f32 %v4725_v21, %v4493_v40  ;;  %v640_v30 = vmul.f32 %v4990_v12, %v4661_v51 }
 0x1e2   :  { %v5344_v9 = vpop.permute.xlu1 %1186  ;;  %v5346_v58 = vpop.permute.xlu0 %1255 }
 0x1e3   :  { %7217 = vst [vmem:[#allocation111_spill] sm:$0xff] %v5344_v9  ;;  %7218 = vst [vmem:[#allocation112_spill] sm:$0xff] %v5346_v58 }
 0x1e4   :  { %1659 = vrot.lane.b32.xlu1 %v1639_v35, %s4373_s10  ;;  %1665 = vrot.lane.b32.xlu0 %v1642_v2, %s4373_s10  ;;  %v639_v2 = vmul.f32 %v4661_v51, %v4985_v28  ;;  %v1637_v35 = vmul.f32 %v4725_v21, %v4513_v45 }
 0x1e6   :  { %v5354_v4 = vpop.permute.xlu1 %1257  ;;  %v5356_v52 = vpop.permute.xlu0 %1259 }
 0x1e7   :  { %7219 = vst [vmem:[#allocation113_spill] sm:$0xff] %v5354_v4  ;;  %7220 = vst [vmem:[#allocation114_spill] sm:$0xff] %v5356_v52 }
 0x1e8   :  { %1663 = vrot.lane.b32.xlu1 %v1641_v62, %s4373_s10  ;;  %666 = vrot.lane.b32.xlu0 %v640_v30, %s4357_s27  ;;  %v1509_v62 = vmul.f32 %v4697_v6, %v4559_v61  ;;  %v707_v30 = vmul.f32 %v4990_v12, %v4605_v14 }
 0x1ea   :  { %v5364_v9 = vpop.permute.xlu1 %1261  ;;  %v5366_v58 = vpop.permute.xlu0 %1263 }
 0x1eb   :  { %7221 = vst [vmem:[#allocation115_spill] sm:$0xff] %v5366_v58 }
 0x1ec   :  { %664 = vrot.lane.b32.xlu1 %v639_v2, %s4357_s27  ;;  %1655 = vrot.lane.b32.xlu0 %v1637_v35, %s4373_s10  ;;  %v706_v2 = vmul.f32 %v4605_v14, %v4985_v28  ;;  %v773_v35 = vmul.f32 %v4613_v17, %v4985_v28  ;;  %v1643_v14 = vmul.f32 %v4725_v21, %v4559_v61 }
 0x1ee   :  { %v5374_v52 = vpop.permute.xlu1 %262  ;;  %v5376_v4 = vpop.permute.xlu0 %264 }
 0x1ef   :  { %7222 = vst [vmem:[#allocation116_spill] sm:$0xff] %v5374_v52  ;;  %7223 = vst [vmem:[#allocation117_spill] sm:$0xff] %v5376_v4  ;;  %v1576_v52 = vmul.f32 %v4711_v13, %v4559_v61 }
 0x1f0   :  { %1533 = vrot.lane.b32.xlu1 %v1509_v62, %s4371_s16  ;;  %733 = vrot.lane.b32.xlu0 %v707_v30, %s4358_s28  ;;  %v5397_v62 = vld [vmem:[%s6982_s1] sm:$0xff] }
 0x1f2   :  { %v5384_v51 = vpop.permute.xlu1 %1131  ;;  %v5386_v58 = vpop.permute.xlu0 %1253 }
 0x1f3   :  { %7224 = vst [vmem:[#allocation118_spill] sm:$0xff] %v5384_v51  ;;  %7225 = vst [vmem:[#allocation119_spill] sm:$0xff] %v5386_v58  ;;  %v774_v58 = vmul.f32 %v4990_v12, %v4613_v17  ;;  %v7231_v17 = vsub.s32 2, %v4458_v27 }
 0x1f4   :  { %731 = vrot.lane.b32.xlu1 %v706_v2, %s4358_s28  ;;  %798 = vrot.lane.b32.xlu0 %v773_v35, %s4359_s29  ;;  %v1731_v2 = vrot.slane %v5397_v62, %v4462_v29 }
 0x1f6   :  { %v5399_v30 = vpop.permute.xlu1 %1322  ;;  %v5401_v4 = vpop.permute.xlu0 %1324 }
 0x1f8   :  { %1600 = vrot.lane.b32.xlu1 %v1576_v52, %s4372_s17  ;;  %1667 = vrot.lane.b32.xlu0 %v1643_v14, %s4373_s10  ;;  %v1727_v52 = vrot.slane %v5397_v62, %v4484_v37  ;;  %v7228_v14 = vsub.s32 3, %v4458_v27  ;;  %v840_v37 = vmul.f32 %v4673_v56, %v4985_v28 }
 0x1fa   :  { %v5411_v35 = vpop.permute.xlu1 %1326  ;;  %v5413_v51 = vpop.permute.xlu0 %1328  ;;  %v1739_v61 = vrot.slane %v5397_v62, %v7228_v14  ;;  %v7234_v14 = vsub.s32 4, %v4458_v27 }
 0x1fb   :  { %7226 = vst [vmem:[#allocation120_spill] sm:$0xff] %v5411_v35  ;;  %7227 = vst [vmem:[#allocation121_spill] sm:$0xff] %v5413_v51 }
 0x1fc   :  { %800 = vrot.lane.b32.xlu1 %v774_v58, %s4359_s29  ;;  %1758 = vrot.lane.b32.xlu0 %v1731_v2, %s4374_s18  ;;  %v1735_v58 = vrot.slane %v5397_v62, %v7231_v17  ;;  %v907_v17 = vmul.f32 %v4627_v22, %v4985_v28  ;;  %s4375_s29 = smov 110  }
 0x1fe   :  { %v5424_v29 = vpop.permute.xlu1 %1330  ;;  %v5426_v35 = vpop.permute.xlu0 %329 }
 0x1ff   :  { %7229 = vst [vmem:[#allocation122_spill] sm:$0xff] %v5424_v29  ;;  %7230 = vst [vmem:[#allocation123_spill] sm:$0xff] %v5426_v35  ;;  %v908_v29 = vmul.f32 %v4990_v12, %v4627_v22 }
 0x200   :  { %1756 = vrot.lane.b32.xlu1 %v1727_v52, %s4374_s18  ;;  %1762 = vrot.lane.b32.xlu0 %v1739_v61, %s4374_s18  ;;  %v1743_v52 = vrot.slane %v5397_v62, %v7234_v14  ;;  %v974_v14 = vmul.f32 %v4637_v26, %v4985_v28 }
 0x202   :  { %v5433_v2 = vpop.permute.xlu1 %331  ;;  %v5435_v51 = vpop.permute.xlu0 %1198 }
 0x203   :  { %7232 = vst [vmem:[#allocation124_spill] sm:$0xff] %v5433_v2  ;;  %7233 = vst [vmem:[#allocation125_spill] sm:$0xff] %v5435_v51  ;;  %v7236_v51 = vsub.s32 5, %v4458_v27 }
 0x204   :  { %1760 = vrot.lane.b32.xlu1 %v1735_v58, %s4374_s18  ;;  %865 = vrot.lane.b32.xlu0 %v840_v37, %s4360_s30  ;;  %v841_v37 = vmul.f32 %v4990_v12, %v4673_v56 }
 0x206   :  { %v5444_v61 = vpop.permute.xlu1 %1320  ;;  %v5446_v35 = vpop.permute.xlu0 %1389 }
 0x207   :  { %7235 = vst [vmem:[#allocation126_spill] sm:$0xff] %v5444_v61 }
 0x208   :  { %1764 = vrot.lane.b32.xlu1 %v1743_v52, %s4374_s18  ;;  %932 = vrot.lane.b32.xlu0 %v907_v17, %s4361_s5  ;;  %v1747_v52 = vrot.slane %v5397_v62, %v7236_v51  ;;  %v1042_v51 = vmul.f32 %v4990_v12, %v4687_v1 }
 0x20a   :  { %v5452_v2 = vpop.permute.xlu1 %1391  ;;  %v5454_v58 = vpop.permute.xlu0 %1393 }
 0x20c   :  { %867 = vrot.lane.b32.xlu1 %v841_v37, %s4360_s30  ;;  %999 = vrot.lane.b32.xlu0 %v974_v14, %s4362_s6  ;;  %v975_v14 = vmul.f32 %v4990_v12, %v4637_v26  ;;  %s4387_s30 = smov 48  }
 0x20e   :  { %v5465_v61 = vpop.permute.xlu1 %1395  ;;  %v5467_v17 = vpop.permute.xlu0 %1397 }
 0x20f   :  { %7237 = vst [vmem:[#allocation127_spill] sm:$0xff] %v5467_v17 }
 0x210   :  { %934 = vrot.lane.b32.xlu1 %v908_v29, %s4361_s5  ;;  %1766 = vrot.lane.b32.xlu0 %v1747_v52, %s4374_s18  ;;  %v1041_v29 = vmul.f32 %v4687_v1, %v4985_v28  ;;  %v1109_v52 = vmul.f32 %v4990_v12, %v4647_v42  ;;  %s4388_s5 = smov 96  }
 0x212   :  { %v5473_v56 = vpop.permute.xlu1 %396  ;;  %v5475_v37 = vpop.permute.xlu0 %398 }
 0x213   :  { %7238 = vst [vmem:[#allocation128_spill] sm:$0xff] %v5473_v56  ;;  %7239 = vst [vmem:[#allocation129_spill] sm:$0xff] %v5475_v37 }
 0x214   :  { %1001 = vrot.lane.b32.xlu1 %v975_v14, %s4362_s6  ;;  %1068 = vrot.lane.b32.xlu0 %v1042_v51, %s4363_s7  ;;  %v1108_v14 = vmul.f32 %v4647_v42, %v4985_v28  ;;  %v1176_v51 = vmul.f32 %v4990_v12, %v4659_v50 }
 0x216   :  { %v5483_v17 = vpop.permute.xlu1 %1265  ;;  %v5485_v22 = vpop.permute.xlu0 %1387 }
 0x217   :  { %7240 = vst [vmem:[#allocation130_spill] sm:$0xff] %v5483_v17  ;;  %7241 = vst [vmem:[#allocation131_spill] sm:$0xff] %v5485_v22 }
 0x218   :  { %1066 = vrot.lane.b32.xlu1 %v1041_v29, %s4363_s7  ;;  %1135 = vrot.lane.b32.xlu0 %v1109_v52, %s4364_s8  ;;  %v1175_v29 = vmul.f32 %v4659_v50, %v4985_v28  ;;  %v1243_v52 = vmul.f32 %v4990_v12, %v4699_v7 }
 0x21a   :  { %v5493_v26 = vpop.permute.xlu1 %1456  ;;  %v5495_v37 = vpop.permute.xlu0 %1458 }
 0x21c   :  { %1133 = vrot.lane.b32.xlu1 %v1108_v14, %s4364_s8  ;;  %1202 = vrot.lane.b32.xlu0 %v1176_v51, %s4366_s11  ;;  %v1242_v14 = vmul.f32 %v4699_v7, %v4985_v28  ;;  %v1310_v51 = vmul.f32 %v4990_v12, %v4671_v55  ;;  %s4389_s8 = smov 112  }
 0x21e   :  { %v5503_v1 = vpop.permute.xlu1 %1460  ;;  %v5505_v56 = vpop.permute.xlu0 %1462 }
 0x220   :  { %1200 = vrot.lane.b32.xlu1 %v1175_v29, %s4366_s11  ;;  %1269 = vrot.lane.b32.xlu0 %v1243_v52, %s4367_s12  ;;  %v1309_v29 = vmul.f32 %v4671_v55, %v4985_v28  ;;  %v1377_v52 = vmul.f32 %v4990_v12, %v4685_v0  ;;  %v1444_v55 = vmul.f32 %v4990_v12, %v4713_v15 }
 0x222   :  { %v5513_v42 = vpop.permute.xlu1 %1464  ;;  %v5515_v17 = vpop.permute.xlu0 %463 }
 0x223   :  { %7242 = vst [vmem:[#allocation132_spill] sm:$0xff] %v5513_v42  ;;  %7243 = vst [vmem:[#allocation133_spill] sm:$0xff] %v5515_v17  ;;  %v1511_v17 = vmul.f32 %v4990_v12, %v4697_v6  ;;  %v78_v42 = vmul.f32 %v4493_v40, %v4723_v20  ;;  %v133_v40 = vsel %vm132_vm0, %v4755_v57, %v4733_v25 }
 0x224   :  { %1267 = vrot.lane.b32.xlu1 %v1242_v14, %s4367_s12  ;;  %1336 = vrot.lane.b32.xlu0 %v1310_v51, %s4368_s13  ;;  %v1376_v51 = vmul.f32 %v4685_v0, %v4985_v28  ;;  %v5555_v0 = vmul.f32 %v4725_v21, %v4985_v28  ;;  %v204_v57 = vsel %vm7114_vm1, %v4775_v11, %v4783_v19 }
 0x226   :  { %v5523_v50 = vpop.permute.xlu1 %465  ;;  %v5525_v22 = vpop.permute.xlu0 %1332 }
 0x227   :  { %7244 = vst [vmem:[#allocation134_spill] sm:$0xff] %v5523_v50  ;;  %7245 = vst [vmem:[#allocation135_spill] sm:$0xff] %v5525_v22  ;;  %v1443_v50 = vmul.f32 %v4713_v15, %v4985_v28  ;;  %v1510_v22 = vmul.f32 %v4697_v6, %v4985_v28  ;;  %v134_v15 = vsel %vm132_vm0, %v4733_v25, %v4735_v38 }
 0x228   :  { %1334 = vrot.lane.b32.xlu1 %v1309_v29, %s4368_s13  ;;  %1403 = vrot.lane.b32.xlu0 %v1377_v52, %s4369_s14  ;;  %v5545_v29 = vmul.f32 %v4990_v12, %v4725_v21  ;;  %v75_v52 = vmul.f32 %v4476_v32, %v4723_v20  ;;  %v1578_v32 = vmul.f32 %v4990_v12, %v4711_v13 }
 0x229   :  { %v76_v6 = vmul.f32 %v4472_v31, %v4723_v20  ;;  %v77_v21 = vmul.f32 %v4498_v41, %v4723_v20  ;;  %v135_v12 = vsel %vm132_vm0, %v4735_v38, %v4743_v47  ;;  %v137_v31 = vsel %vm132_vm0, %v4745_v48, %v4753_v54 }
 0x22a   :  { %v5533_v7 = vpop.permute.xlu1 %1454  ;;  %v5535_v14 = vpop.permute.xlu0 %1523  ;;  %v201_v38 = vsel %vm7114_vm1, %v4763_v63, %v4765_v3  ;;  %v203_v25 = vsel %vm7114_vm1, %v4773_v10, %v4775_v11  ;;  %v269_v11 = vsel %vm7115_vm2, %v4795_v49, %v4803_v60 }
 0x22b   :  { %7246 = vst [vmem:[#allocation136_spill] sm:$0xff] %v5533_v7  ;;  %v1577_v7 = vmul.f32 %v4711_v13, %v4985_v28  ;;  %v136_v13 = vsel %vm132_vm0, %v4743_v47, %v4745_v48  ;;  %v202_v47 = vsel %vm7114_vm1, %v4765_v3, %v4773_v10  ;;  %v79_v48 = vmul.f32 %v4509_v44, %v4723_v20 }
 0x22c   :  { %1401 = vrot.lane.b32.xlu1 %v1376_v51, %s4369_s14  ;;  %1470 = vrot.lane.b32.xlu0 %v1444_v55, %s4370_s15  ;;  %v74_v51 = vmul.f32 %v4513_v45, %v4723_v20  ;;  %v151_v55 = vadd.f32 %v134_v15, %v75_v52  ;;  %v200_v52 = vsel %vm7114_vm1, %v4785_v23, %v4763_v63 }
 0x22d   :  { %v152_v3 = vadd.f32 %v135_v12, %v76_v6  ;;  %v153_v15 = vadd.f32 %v136_v13, %v77_v21  ;;  %v154_v44 = vadd.f32 %v137_v31, %v78_v42  ;;  %v268_v10 = vsel %vm7115_vm2, %v4793_v43, %v4795_v49  ;;  %v7247_v31 = vld [vmem:[#allocation18_spill] sm:$0xff] }
 0x22e   :  { %v5586_v41 = vpop.permute.xlu1 %1525  ;;  %v5588_v45 = vpop.permute.xlu0 %1527  ;;  %v150_v28 = vadd.f32 %v133_v40, %v74_v51  ;;  %v218_v20 = vadd.f32 %v201_v38, %v151_v55  ;;  %v270_v63 = vsel %vm7115_vm2, %v4803_v60, %v4805_v5  ;;  %v271_v51 = vsel %vm7115_vm2, %v4805_v5, %v4813_v16  ;;  %v7248_v40 = vld [vmem:[#allocation17_spill] sm:$0xff]  ;;  %v7249_v55 = vld [vmem:[#allocation19_spill] sm:$0xff]  ;;  %v7250_v38 = vld [vmem:[#allocation20_spill] sm:$0xff] }
 0x22f   :  { %v221_v6 = vadd.f32 %v204_v57, %v154_v44  ;;  %v138_v49 = vsel %vm132_vm0, %v4753_v54, %v4815_v24  ;;  %v267_v60 = vsel %vm7115_vm2, %v4823_v59, %v4793_v43  ;;  %v335_v5 = vsel %vm333_vm3, %v7248_v40, %v7247_v31  ;;  %v7251_v59 = vld [vmem:[#allocation21_spill] sm:$0xff] }
 0x230   :  { %1468 = vrot.lane.b32.xlu1 %v1443_v50, %s4370_s15  ;;  %1537 = vrot.lane.b32.xlu0 %v1511_v17, %s4371_s16  ;;  %v219_v17 = vadd.f32 %v202_v47, %v152_v3  ;;  %v220_v50 = vadd.f32 %v203_v25, %v153_v15  ;;  %v217_v42 = vadd.f32 %v200_v52, %v150_v28  ;;  %v7254_v3 = vld [vmem:[#allocation23_spill] sm:$0xff] }
 0x231   :  { %v285_v28 = vadd.f32 %v268_v10, %v218_v20  ;;  %v336_v54 = vsel %vm333_vm3, %v7247_v31, %v7249_v55  ;;  %v337_v43 = vsel %vm333_vm3, %v7249_v55, %v7250_v38  ;;  %v288_v25 = vadd.f32 %v271_v51, %v221_v6  ;;  %v7255_v10 = vld [vmem:[#allocation25_spill] sm:$0xff]  ;;  %v7260_v31 = vld [vmem:[#allocation27_spill] sm:$0xff] }
 0x232   :  { %v5618_v23 = vpop.permute.xlu1 %1529  ;;  %v5620_v21 = vpop.permute.xlu0 %1531  ;;  %v286_v12 = vadd.f32 %v269_v11, %v219_v17  ;;  %v287_v13 = vadd.f32 %v270_v63, %v220_v50  ;;  %v155_v57 = vadd.f32 %v138_v49, %v79_v48  ;;  %v284_v52 = vadd.f32 %v267_v60, %v217_v42  ;;  %v7256_v11 = vld [vmem:[#allocation24_spill] sm:$0xff]  ;;  %v7259_v60 = vld [vmem:[#allocation26_spill] sm:$0xff] }
 0x233   :  { %v334_v15 = vsel %vm333_vm3, %v7254_v3, %v7248_v40  ;;  %v352_v44 = vadd.f32 %v335_v5, %v285_v28  ;;  %v402_v63 = vsel %vm7117_vm4, %v7256_v11, %v7255_v10  ;;  %v403_v28 = vsel %vm7117_vm4, %v7255_v10, %v7259_v60 }
 0x234   :  { %1535 = vrot.lane.b32.xlu1 %v1510_v22, %s4371_s16  ;;  %1604 = vrot.lane.b32.xlu0 %v1578_v32, %s4372_s17  ;;  %v338_v22 = vsel %vm333_vm3, %v7250_v38, %v7251_v59  ;;  %v7252_v32 = vld [vmem:[#allocation22_spill] sm:$0xff]  ;;  %v353_v17 = vadd.f32 %v336_v54, %v286_v12  ;;  %v354_v50 = vadd.f32 %v337_v43, %v287_v13  ;;  %v7262_v13 = vld [vmem:[#allocation29_spill] sm:$0xff]  ;;  %v7264_v43 = vld [vmem:[#allocation32_spill] sm:$0xff] }
 0x235   :  { %v205_v20 = vsel %vm7114_vm1, %v4783_v19, %v7252_v32  ;;  %v7257_v19 = vsub.s32 7, %v4458_v27  ;;  %v355_v6 = vadd.f32 %v338_v22, %v288_v25  ;;  %v351_v49 = vadd.f32 %v334_v15, %v284_v52  ;;  %v7263_v54 = vld [vmem:[#allocation30_spill] sm:$0xff]  ;;  %v7265_v22 = vld [vmem:[#allocation31_spill] sm:$0xff]  ;;  %v7266_v25 = vld [vmem:[#allocation33_spill] sm:$0xff] }
 0x236   :  { %v5648_v47 = vpop.permute.xlu1 %530  ;;  %v222_v42 = vadd.f32 %v205_v20, %v155_v57  ;;  %v5662_v51 = vpop.permute.xlu0 %532  ;;  %v419_v12 = vadd.f32 %v402_v63, %v352_v44  ;;  %v272_v55 = vsel %vm7115_vm2, %v4813_v16, %v7262_v13  ;;  %v401_v38 = vsel %vm7117_vm4, %v7263_v54, %v7256_v11  ;;  %v7267_v52 = vld [vmem:[#allocation34_spill] sm:$0xff]  ;;  %v7269_v63 = vld [vmem:[#allocation35_spill] sm:$0xff] }
 0x237   :  { %7253 = vst [vmem:[#allocation18_spill] sm:$0xff] %v5648_v47  ;;  %v1755_v48 = vrot.slane %v5397_v62, %v7257_v19  ;;  %7258 = vst [vmem:[#allocation17_spill] sm:$0xff] %v5662_v51  ;;  %v469_v20 = vsel %vm7116_vm5, %v7265_v22, %v7264_v43  ;;  %v470_v57 = vsel %vm7116_vm5, %v7264_v43, %v7266_v25  ;;  %v7268_v16 = vsub.s32 6, %v4458_v27  ;;  %v7286_v27 = vld [vmem:[#allocation52_spill] sm:$0xff]  ;;  %v7298_v47 = vld [vmem:[#allocation65_spill] sm:$0xff] }
 0x238   :  { %1602 = vrot.lane.b32.xlu1 %v1577_v7, %s4372_s17  ;;  %1671 = vrot.lane.b32.xlu0 %v5545_v29, %s4373_s10  ;;  %v404_v7 = vsel %vm7117_vm4, %v7259_v60, %v7260_v31  ;;  %v7261_v29 = vld [vmem:[#allocation28_spill] sm:$0xff]  ;;  %v471_v3 = vsel %vm7116_vm5, %v7266_v25, %v7267_v52  ;;  %v420_v44 = vadd.f32 %v403_v28, %v353_v17  ;;  %v7273_v25 = vld [vmem:[#allocation38_spill] sm:$0xff] }
 0x239   :  { %v405_v40 = vsel %vm7117_vm4, %v7260_v31, %v7261_v29  ;;  %v1751_v15 = vrot.slane %v5397_v62, %v7268_v16  ;;  %v421_v10 = vadd.f32 %v404_v7, %v354_v50  ;;  %v472_v19 = vsel %vm7116_vm5, %v7267_v52, %v7269_v63  ;;  %v7270_v31 = vld [vmem:[#allocation36_spill] sm:$0xff]  ;;  %v7272_v62 = vld [vmem:[#allocation39_spill] sm:$0xff]  ;;  %v7275_v52 = vld [vmem:[#allocation41_spill] sm:$0xff] }
 0x23a   :  { %v5673_v5 = vpop.permute.xlu1 %1399  ;;  %v422_v11 = vadd.f32 %v405_v40, %v355_v6  ;;  %v289_v60 = vadd.f32 %v272_v55, %v222_v42  ;;  %v339_v54 = vsel %vm333_vm3, %v7251_v59, %v7270_v31  ;;  %v418_v50 = vadd.f32 %v401_v38, %v351_v49  ;;  %v5710_v42 = vpop.permute.xlu0 %1521  ;;  %v7274_v55 = vld [vmem:[#allocation40_spill] sm:$0xff]  ;;  %v7276_v16 = vld [vmem:[#allocation42_spill] sm:$0xff] }
 0x23b   :  { %v486_v6 = vadd.f32 %v469_v20, %v419_v12  ;;  %v487_v28 = vadd.f32 %v470_v57, %v420_v44  ;;  %v488_v7 = vadd.f32 %v471_v3, %v421_v10  ;;  %v537_v59 = vsel %vm7112_vm6, %v7272_v62, %v7274_v55  ;;  %v7277_v20 = vld [vmem:[#allocation43_spill] sm:$0xff]  ;;  %v7278_v3 = vld [vmem:[#allocation44_spill] sm:$0xff]  ;;  %v7279_v10 = vld [vmem:[#allocation46_spill] sm:$0xff] }
 0x23c   :  { %1669 = vrot.lane.b32.xlu1 %v5555_v0, %s4373_s10  ;;  %1770 = vrot.lane.b32.xlu0 %v1755_v48, %s4374_s18  ;;  %v7271_v0 = vld [vmem:[#allocation37_spill] sm:$0xff]  ;;  %v536_v48 = vsel %vm7112_vm6, %v7273_v25, %v7272_v62  ;;  %v489_v40 = vadd.f32 %v472_v19, %v422_v11  ;;  %v356_v49 = vadd.f32 %v339_v54, %v289_v60  ;;  %v7281_v62 = vld [vmem:[#allocation47_spill] sm:$0xff] }
 0x23d   :  { %v468_v43 = vsel %vm7116_vm5, %v7271_v0, %v7265_v22  ;;  %v538_v22 = vsel %vm7112_vm6, %v7274_v55, %v7275_v52  ;;  %v539_v0 = vsel %vm7112_vm6, %v7275_v52, %v7276_v16  ;;  %v553_v38 = vadd.f32 %v536_v48, %v486_v6  ;;  %v7280_v11 = vld [vmem:[#allocation45_spill] sm:$0xff]  ;;  %v7283_v6 = vld [vmem:[#allocation50_spill] sm:$0xff] }
 0x23e   :  { %v5708_v17 = vpop.permute.xlu1 %1590  ;;  %v485_v12 = vadd.f32 %v468_v43, %v418_v50  ;;  %v406_v57 = vsel %vm7117_vm4, %v7261_v29, %v7277_v20  ;;  %v535_v44 = vsel %vm7112_vm6, %v7278_v3, %v7273_v25  ;;  %v603_v19 = vsel %vm7109_vm7, %v7280_v11, %v7279_v10  ;;  %v7282_v48 = vld [vmem:[#allocation49_spill] sm:$0xff]  ;;  %v7284_v3 = vld [vmem:[#allocation51_spill] sm:$0xff]  ;;  %v7337_v20 = vld [vmem:[#allocation104_spill] sm:$0xff] }
 0x23f   :  { %v604_v55 = vsel %vm7109_vm7, %v7279_v10, %v7281_v62  ;;  %v554_v54 = vadd.f32 %v537_v59, %v487_v28  ;;  %v555_v29 = vadd.f32 %v538_v22, %v488_v7  ;;  %v556_v43 = vadd.f32 %v539_v0, %v489_v40 }
 0x240   :  { %1768 = vrot.lane.b32.xlu1 %v1751_v15, %s4374_s18  ;;  %v605_v15 = vsel %vm7109_vm7, %v7281_v62, %v4994_v8  ;;  %v606_v25 = vsel %vm7109_vm7, %v4994_v8, %v7282_v48  ;;  %v423_v50 = vadd.f32 %v406_v57, %v356_v49  ;;  %v473_v52 = vsel %vm7116_vm5, %v7269_v63, %v7283_v6  ;;  %v7285_v62 = vld [vmem:[#allocation53_spill] sm:$0xff]  ;;  %v5751_v8 = vpop.permute.xlu0 %1592  ;;  %v7287_v49 = vld [vmem:[#allocation54_spill] sm:$0xff]  ;;  %v7288_v57 = vld [vmem:[#allocation55_spill] sm:$0xff]  ;;  %s4382_s18 = smov 95  }
 0x241   :  { %v602_v10 = vsel %vm7109_vm7, %v7284_v3, %v7280_v11  ;;  %v670_v28 = vsel %vm7104_vm8, %v7286_v27, %v7285_v62  ;;  %v552_v7 = vadd.f32 %v535_v44, %v485_v12  ;;  %v620_v40 = vadd.f32 %v603_v19, %v553_v38  ;;  %v7289_v3 = vld [vmem:[#allocation56_spill] sm:$0xff]  ;;  %v7325_v6 = vld [vmem:[#allocation90_spill] sm:$0xff] }
 0x242   :  { %v5737_v60 = vpop.permute.xlu1 %1594  ;;  %v621_v59 = vadd.f32 %v604_v55, %v554_v54  ;;  %v622_v22 = vadd.f32 %v605_v15, %v555_v29  ;;  %v623_v0 = vadd.f32 %v606_v25, %v556_v43  ;;  %v671_v63 = vsel %vm7104_vm8, %v7285_v62, %v7287_v49  ;;  %v7290_v55 = vld [vmem:[#allocation57_spill] sm:$0xff]  ;;  %v7291_v29 = vld [vmem:[#allocation59_spill] sm:$0xff]  ;;  %v7292_v43 = vld [vmem:[#allocation58_spill] sm:$0xff] }
 0x243   :  { %v672_v11 = vsel %vm7104_vm8, %v7287_v49, %v7288_v57  ;;  %v673_v51 = vsel %vm7104_vm8, %v7288_v57, %v7289_v3  ;;  %v490_v38 = vadd.f32 %v473_v52, %v423_v50  ;;  %v619_v44 = vadd.f32 %v602_v10, %v552_v7  ;;  %v7293_v62 = vld [vmem:[#allocation60_spill] sm:$0xff]  ;;  %v7294_v57 = vld [vmem:[#allocation61_spill] sm:$0xff] }
 0x244   :  { %v687_v19 = vadd.f32 %v670_v28, %v620_v40  ;;  %v540_v15 = vsel %vm7112_vm6, %v7276_v16, %v7290_v55  ;;  %v669_v54 = vsel %vm7104_vm8, %v5044_v33, %v7286_v27  ;;  %v737_v25 = vsel %vm7106_vm9, %v7292_v43, %v7291_v29  ;;  %v7295_v16 = vld [vmem:[#allocation62_spill] sm:$0xff]  ;;  %v7296_v33 = vld [vmem:[#allocation63_spill] sm:$0xff]  ;;  %v7297_v55 = vld [vmem:[#allocation64_spill] sm:$0xff] }
 0x245   :  { %v738_v49 = vsel %vm7106_vm9, %v7291_v29, %v7293_v62  ;;  %v739_v50 = vsel %vm7106_vm9, %v7293_v62, %v7294_v57  ;;  %v688_v52 = vadd.f32 %v671_v63, %v621_v59  ;;  %v689_v10 = vadd.f32 %v672_v11, %v622_v22  ;;  %v7300_v62 = vld [vmem:[#allocation66_spill] sm:$0xff] }
 0x246   :  { %v5762_v12 = vpop.permute.xlu1 %1598  ;;  %v690_v28 = vadd.f32 %v673_v51, %v623_v0  ;;  %v740_v7 = vsel %vm7106_vm9, %v7294_v57, %v7295_v16  ;;  %v557_v27 = vadd.f32 %v540_v15, %v490_v38  ;;  %v607_v40 = vsel %vm7109_vm7, %v7282_v48, %v7296_v33  ;;  %v5793_v38 = vpop.permute.xlu0 %1596  ;;  %v7301_v57 = vld [vmem:[#allocation67_spill] sm:$0xff] }
 0x247   :  { %v736_v29 = vsel %vm7106_vm9, %v7297_v55, %v7292_v43  ;;  %v804_v59 = vsel %vm7107_vm10, %v7298_v47, %v5086_v39  ;;  %v686_v51 = vadd.f32 %v669_v54, %v619_v44  ;;  %v754_v0 = vadd.f32 %v737_v25, %v687_v19  ;;  %v7302_v43 = vld [vmem:[#allocation68_spill] sm:$0xff]  ;;  %v7303_v25 = vld [vmem:[#allocation69_spill] sm:$0xff] }
 0x248   :  { %v755_v63 = vadd.f32 %v738_v49, %v688_v52  ;;  %v756_v11 = vadd.f32 %v739_v50, %v689_v10  ;;  %v757_v15 = vadd.f32 %v740_v7, %v690_v28  ;;  %v805_v48 = vsel %vm7107_vm10, %v5086_v39, %v7300_v62  ;;  %v7304_v50 = vld [vmem:[#allocation70_spill] sm:$0xff]  ;;  %v7305_v39 = vld [vmem:[#allocation72_spill] sm:$0xff]  ;;  %v7306_v10 = vld [vmem:[#allocation71_spill] sm:$0xff] }
 0x249   :  { %v806_v55 = vsel %vm7107_vm10, %v7300_v62, %v7301_v57  ;;  %v807_v33 = vsel %vm7107_vm10, %v7301_v57, %v7302_v43  ;;  %v624_v44 = vadd.f32 %v607_v40, %v557_v27  ;;  %v753_v19 = vadd.f32 %v736_v29, %v686_v51  ;;  %v7307_v7 = vld [vmem:[#allocation73_spill] sm:$0xff]  ;;  %v7309_v51 = vld [vmem:[#allocation74_spill] sm:$0xff] }
 0x24a   :  { %v5791_v22 = vpop.permute.xlu1 %597  ;;  %v821_v54 = vadd.f32 %v804_v59, %v754_v0  ;;  %v674_v49 = vsel %vm7104_vm8, %v7289_v3, %v7303_v25  ;;  %v803_v52 = vsel %vm7107_vm10, %v7304_v50, %v7298_v47  ;;  %v871_v28 = vsel %vm7108_vm11, %v7306_v10, %v7305_v39  ;;  %v7310_v50 = vld [vmem:[#allocation75_spill] sm:$0xff]  ;;  %v7311_v25 = vld [vmem:[#allocation76_spill] sm:$0xff] }
 0x24b   :  { %7299 = vst [vmem:[#allocation19_spill] sm:$0xff] %v5791_v22  ;;  %v872_v62 = vsel %vm7108_vm11, %v7305_v39, %v7307_v7  ;;  %v873_v27 = vsel %vm7108_vm11, %v7307_v7, %v5134_v34  ;;  %v822_v29 = vadd.f32 %v805_v48, %v755_v63  ;;  %v823_v3 = vadd.f32 %v806_v55, %v756_v11  ;;  %v7313_v63 = vld [vmem:[#allocation77_spill] sm:$0xff]  ;;  %v7314_v22 = vld [vmem:[#allocation79_spill] sm:$0xff] }
 0x24c   :  { %v824_v59 = vadd.f32 %v807_v33, %v757_v15  ;;  %v874_v47 = vsel %vm7108_vm11, %v5134_v34, %v7309_v51  ;;  %v691_v57 = vadd.f32 %v674_v49, %v624_v44  ;;  %v741_v39 = vsel %vm7106_vm9, %v7295_v16, %v7310_v50  ;;  %v7315_v49 = vld [vmem:[#allocation80_spill] sm:$0xff]  ;;  %v7324_v50 = vld [vmem:[#allocation89_spill] sm:$0xff] }
 0x24d   :  { %v870_v7 = vsel %vm7108_vm11, %v7311_v25, %v7306_v10  ;;  %v820_v11 = vadd.f32 %v803_v52, %v753_v19  ;;  %v888_v15 = vadd.f32 %v871_v28, %v821_v54  ;;  %v889_v48 = vadd.f32 %v872_v62, %v822_v29  ;;  %v7316_v28 = vld [vmem:[#allocation81_spill] sm:$0xff] }
 0x24e   :  { %v5819_v40 = vpop.permute.xlu1 %599  ;;  %v890_v34 = vadd.f32 %v873_v27, %v823_v3  ;;  %vm1204_vm8 = vcmask 490496   ;;  %v891_v55 = vadd.f32 %v874_v47, %v824_v59  ;;  %v940_v16 = vsel %vm7110_vm12, %v7314_v22, %v7315_v49  ;;  %v7319_v3 = vld [vmem:[#allocation83_spill] sm:$0xff]  ;;  %v7320_v47 = vld [vmem:[#allocation85_spill] sm:$0xff] }
 0x24f   :  { %7308 = vst [vmem:[#allocation20_spill] sm:$0xff] %v5819_v40  ;;  %v5824_v0 = vpop.permute.xlu0 %1702  ;;  %v7312_v40 = vld [vmem:[#allocation78_spill] sm:$0xff]  ;;  %v941_v25 = vsel %vm7110_vm12, %v7315_v49, %v5174_v53  ;;  %v758_v19 = vadd.f32 %v741_v39, %v691_v57  ;;  %v887_v54 = vadd.f32 %v870_v7, %v820_v11  ;;  %v808_v62 = vsel %vm7107_vm10, %v7302_v43, %v7316_v28 }
 0x250   :  { %v938_v33 = vsel %vm7110_vm12, %v7313_v63, %v7312_v40  ;;  %v939_v44 = vsel %vm7110_vm12, %v7312_v40, %v7314_v22  ;;  %v7317_v40 = vld [vmem:[#allocation82_spill] sm:$0xff]  ;;  %v7318_v22 = vld [vmem:[#allocation84_spill] sm:$0xff]  ;;  %vm7113_vm9 = vcmask 482304   ;;  %v958_v11 = vadd.f32 %v941_v25, %v891_v55 }
 0x251   :  { %v955_v52 = vadd.f32 %v938_v33, %v888_v15  ;;  %v937_v29 = vsel %vm7110_vm12, %v7317_v40, %v7313_v63  ;;  %v1005_v59 = vsel %vm7111_vm13, %v7319_v3, %v7318_v22  ;;  %v1006_v57 = vsel %vm7111_vm13, %v7318_v22, %v7320_v47  ;;  %v7321_v39 = vld [vmem:[#allocation86_spill] sm:$0xff]  ;;  %v7322_v15 = vld [vmem:[#allocation87_spill] sm:$0xff]  ;;  %v7323_v40 = vld [vmem:[#allocation88_spill] sm:$0xff] }
 0x252   :  { %v5844_v10 = vpop.permute.xlu1 %1588  ;;  %v1007_v7 = vsel %vm7111_vm13, %v7320_v47, %v7321_v39  ;;  %v956_v43 = vadd.f32 %v939_v44, %v889_v48  ;;  %v957_v33 = vadd.f32 %v940_v16, %v890_v34  ;;  %v1008_v63 = vsel %vm7111_vm13, %v7321_v39, %v7322_v15  ;;  %v7327_v39 = vld [vmem:[#allocation92_spill] sm:$0xff] }
 0x253   :  { %v5849_v27 = vpop.permute.xlu0 %1466  ;;  %v825_v49 = vadd.f32 %v808_v62, %v758_v19  ;;  %v875_v28 = vsel %vm7108_vm11, %v7309_v51, %v7323_v40  ;;  %v1004_v22 = vsel %vm7111_vm13, %v7324_v50, %v7319_v3  ;;  %v1072_v47 = vsel %vm1070_vm14, %v7325_v6, %v5226_v36  ;;  %v7326_v62 = vld [vmem:[#allocation91_spill] sm:$0xff]  ;;  %v7328_v3 = vld [vmem:[#allocation93_spill] sm:$0xff] }
 0x254   :  { %vm1338_vm10 = vcmask 474112   ;;  %v954_v34 = vadd.f32 %v937_v29, %v887_v54  ;;  %v1022_v55 = vadd.f32 %v1005_v59, %v955_v52  ;;  %v1023_v44 = vadd.f32 %v1006_v57, %v956_v43  ;;  %v7329_v59 = vld [vmem:[#allocation94_spill] sm:$0xff]  ;;  %v7331_v43 = vld [vmem:[#allocation96_spill] sm:$0xff] }
 0x255   :  { %v1024_v16 = vadd.f32 %v1007_v7, %v957_v33  ;;  %v1025_v19 = vadd.f32 %v1008_v63, %v958_v11  ;;  %v1073_v51 = vsel %vm1070_vm14, %v5226_v36, %v7326_v62  ;;  %v1074_v50 = vsel %vm1070_vm14, %v7326_v62, %v7327_v39  ;;  %v7330_v7 = vld [vmem:[#allocation95_spill] sm:$0xff]  ;;  %v7332_v11 = vld [vmem:[#allocation97_spill] sm:$0xff]  ;;  %v7333_v62 = vld [vmem:[#allocation98_spill] sm:$0xff] }
 0x256   :  { %v5875_v48 = vpop.permute.xlu1 %1659  ;;  %v1075_v40 = vsel %vm1070_vm14, %v7327_v39, %v7328_v3  ;;  %vm1405_vm11 = vcmask 326656   ;;  %v892_v54 = vadd.f32 %v875_v28, %v825_v49  ;;  %v1021_v52 = vadd.f32 %v1004_v22, %v954_v34  ;;  %v7334_v34 = vld [vmem:[#allocation99_spill] sm:$0xff] }
 0x257   :  { %v5877_v25 = vpop.permute.xlu0 %1657  ;;  %v1089_v29 = vadd.f32 %v1072_v47, %v1022_v55  ;;  %v942_v57 = vsel %vm7110_vm12, %v5174_v53, %v7329_v59  ;;  %v1071_v36 = vsel %vm1070_vm14, %v7330_v7, %v7325_v6  ;;  %v1139_v33 = vsel %vm1137_vm15, %v7331_v43, %v5264_v18  ;;  %v7335_v7 = vld [vmem:[#allocation102_spill] sm:$0xff]  ;;  %v7336_v59 = vld [vmem:[#allocation103_spill] sm:$0xff] }
 0x258   :  { %v1140_v63 = vsel %vm1137_vm15, %v5264_v18, %v7332_v11  ;;  %v1141_v28 = vsel %vm1137_vm15, %v7332_v11, %v7333_v62  ;;  %vm1472_vm7 = vcmask 318464   ;;  %v1090_v53 = vadd.f32 %v1073_v51, %v1023_v44 }
 0x259   :  { %v1091_v22 = vadd.f32 %v1074_v50, %v1024_v16  ;;  %v1092_v47 = vadd.f32 %v1075_v40, %v1025_v19  ;;  %v1142_v6 = vsel %vm1137_vm15, %v7333_v62, %v7334_v34  ;;  %v959_v39 = vadd.f32 %v942_v57, %v892_v54  ;;  %v7338_v62 = vld [vmem:[#allocation105_spill] sm:$0xff]  ;;  %v7339_v57 = vld [vmem:[#allocation106_spill] sm:$0xff] }
 0x25a   :  { %v5903_v49 = vpop.permute.xlu1 %1663  ;;  %v1009_v18 = vsel %vm7111_vm13, %v7322_v15, %v7335_v7  ;;  %v1138_v11 = vsel %vm1137_vm15, %v7336_v59, %v7331_v43  ;;  %v1206_v44 = vsel %vm1204_vm8, %v7337_v20, %v5306_v46  ;;  %vm1539_vm12 = vcmask 310272   ;;  %v7340_v7 = vld [vmem:[#allocation107_spill] sm:$0xff] }
 0x25b   :  { %v5908_v55 = vpop.permute.xlu0 %1661  ;;  %v1088_v40 = vadd.f32 %v1071_v36, %v1021_v52  ;;  %v1156_v16 = vadd.f32 %v1139_v33, %v1089_v29  ;;  %v1157_v19 = vadd.f32 %v1140_v63, %v1090_v53  ;;  %v1158_v51 = vadd.f32 %v1141_v28, %v1091_v22  ;;  %v7341_v33 = vld [vmem:[#allocation113_spill] sm:$0xff]  ;;  %v7342_v63 = vld [vmem:[#allocation112_spill] sm:$0xff]  ;;  %v7343_v53 = vld [vmem:[#allocation111_spill] sm:$0xff] }
 0x25c   :  { %v1159_v50 = vadd.f32 %v1142_v6, %v1092_v47  ;;  %v1207_v54 = vsel %vm1204_vm8, %v5306_v46, %v7338_v62  ;;  %v1208_v15 = vsel %vm1204_vm8, %v7338_v62, %v7339_v57  ;;  %v1209_v59 = vsel %vm1204_vm8, %v7339_v57, %v7340_v7  ;;  %v7344_v47 = vld [vmem:[#allocation114_spill] sm:$0xff]  ;;  %v7346_v57 = vld [vmem:[#allocation115_spill] sm:$0xff] }
 0x25d   :  { %vm1606_vm13 = vcmask 302080   ;;  %v5930_v52 = vadd.f32 %v1009_v18, %v959_v39  ;;  %v1155_v29 = vadd.f32 %v1138_v11, %v1088_v40  ;;  %v1223_v36 = vadd.f32 %v1206_v44, %v1156_v16  ;;  %v7345_v16 = vld [vmem:[#allocation110_spill] sm:$0xff] }
 0x25e   :  { %v5928_v43 = vpop.permute.xlu1 %664  ;;  %v1273_v28 = vsel %vm7113_vm9, %v7342_v63, %v7341_v33  ;;  %v1205_v22 = vsel %vm1204_vm8, %v7343_v53, %v7337_v20  ;;  %v1274_v6 = vsel %vm7113_vm9, %v7341_v33, %v7344_v47  ;;  %v1275_v39 = vsel %vm7113_vm9, %v7344_v47, %v5364_v9  ;;  %v7347_v53 = vld [vmem:[#allocation120_spill] sm:$0xff]  ;;  %v7349_v47 = vld [vmem:[#allocation121_spill] sm:$0xff] }
 0x25f   :  { %v5935_v46 = vpop.permute.xlu0 %1665  ;;  %vm1673_vm6 = vcmask 293888   ;;  %v1224_v18 = vadd.f32 %v1207_v54, %v1157_v19  ;;  %v1225_v11 = vadd.f32 %v1208_v15, %v1158_v51  ;;  %v1226_v44 = vadd.f32 %v1209_v59, %v1159_v50 }
 0x260   :  { %v1340_v40 = vsel %vm1338_vm10, %v5399_v30, %v5401_v4  ;;  %v5952_v20 = vsel %vm1070_vm14, %v7328_v3, %v7345_v16  ;;  %v1290_v62 = vadd.f32 %v1273_v28, %v1223_v36  ;;  %v1276_v33 = vsel %vm7113_vm9, %v5364_v9, %v7346_v57  ;;  %v7348_v36 = vld [vmem:[#allocation119_spill] sm:$0xff] }
 0x261   :  { %v1341_v19 = vsel %vm1338_vm10, %v5401_v4, %v7347_v53  ;;  %v1222_v50 = vadd.f32 %v1205_v22, %v1155_v29  ;;  %v1291_v54 = vadd.f32 %v1274_v6, %v1224_v18  ;;  %v1292_v15 = vadd.f32 %v1275_v39, %v1225_v11  ;;  %v7350_v39 = vld [vmem:[#allocation122_spill] sm:$0xff] }
 0x262   :  { %v5960_v51 = vpop.permute.xlu1 %1533  ;;  %v1407_v59 = vsel %vm1405_vm11, %v5446_v35, %v5452_v2  ;;  %v1272_v28 = vsel %vm7113_vm9, %v7348_v36, %v7342_v63  ;;  %v1357_v9 = vadd.f32 %v1340_v40, %v1290_v62  ;;  %v1342_v4 = vsel %vm1338_vm10, %v7347_v53, %v7349_v47  ;;  %v7351_v63 = vld [vmem:[#allocation118_spill] sm:$0xff] }
 0x263   :  { %v5965_v3 = vpop.permute.xlu0 %666  ;;  %v1408_v29 = vsel %vm1405_vm11, %v5452_v2, %v5454_v58  ;;  %v1293_v22 = vadd.f32 %v1276_v33, %v1226_v44  ;;  %v1358_v6 = vadd.f32 %v1341_v19, %v1291_v54  ;;  %v1343_v18 = vsel %vm1338_vm10, %v7349_v47, %v7350_v39 }
 0x264   :  { %v1474_v11 = vsel %vm1472_vm7, %v5493_v26, %v5495_v37  ;;  %v1143_v40 = vsel %vm1137_vm15, %v7334_v34, %v7351_v63  ;;  %v1424_v62 = vadd.f32 %v1407_v59, %v1357_v9  ;;  %v1409_v53 = vsel %vm1405_vm11, %v5454_v58, %v5465_v61  ;;  %v7352_v59 = vld [vmem:[#allocation127_spill] sm:$0xff]  ;;  %v7353_v63 = vld [vmem:[#allocation126_spill] sm:$0xff] }
 0x265   :  { %v1475_v2 = vsel %vm1472_vm7, %v5495_v37, %v5503_v1  ;;  %v1289_v33 = vadd.f32 %v1272_v28, %v1222_v50  ;;  %v1359_v19 = vadd.f32 %v1342_v4, %v1292_v15  ;;  %v1425_v54 = vadd.f32 %v1408_v29, %v1358_v6 }
 0x266   :  { %v5991_v44 = vpop.permute.xlu1 %731  ;;  %v1541_v36 = vsel %vm1539_vm12, %v5535_v14, %v5586_v41  ;;  %v1360_v34 = vadd.f32 %v1343_v18, %v1293_v22  ;;  %v1410_v9 = vsel %vm1405_vm11, %v5465_v61, %v7352_v59  ;;  %v1491_v58 = vadd.f32 %v1474_v11, %v1424_v62  ;;  %v7354_v61 = vld [vmem:[#allocation132_spill] sm:$0xff]  ;;  %v7355_v11 = vld [vmem:[#allocation131_spill] sm:$0xff] }
 0x267   :  { %v1656_v47 = vpop.permute.xlu0 %1655  ;;  %v1542_v37 = vsel %vm1539_vm12, %v5586_v41, %v5588_v45  ;;  %v1339_v50 = vsel %vm1338_vm10, %v7353_v63, %v5399_v30  ;;  %v1426_v15 = vadd.f32 %v1409_v53, %v1359_v19  ;;  %v1492_v28 = vadd.f32 %v1475_v2, %v1425_v54 }
 0x268   :  { %v1608_v4 = vsel %vm1606_vm13, %v5708_v17, %v5751_v8  ;;  %v1476_v29 = vsel %vm1472_vm7, %v5503_v1, %v5505_v56  ;;  %v1477_v22 = vsel %vm1472_vm7, %v5505_v56, %v7354_v61  ;;  %v1558_v6 = vadd.f32 %v1541_v36, %v1491_v58 }
 0x269   :  { %v1609_v41 = vsel %vm1606_vm13, %v5751_v8, %v5737_v60  ;;  %v1427_v18 = vadd.f32 %v1410_v9, %v1360_v34  ;;  %v1406_v63 = vsel %vm1405_vm11, %v7355_v11, %v5446_v35  ;;  %v1559_v62 = vadd.f32 %v1542_v37, %v1492_v28  ;;  %v7356_v9 = vld [vmem:[#allocation136_spill] sm:$0xff] }
 0x26a   :  { %v6017_v30 = vpop.permute.xlu1 %1600  ;;  %v1675_v1 = vsel %vm1673_vm6, %v5877_v25, %v5875_v48  ;;  %v1543_v56 = vsel %vm1539_vm12, %v5588_v45, %v5618_v23  ;;  %v1544_v8 = vsel %vm1539_vm12, %v5618_v23, %v5620_v21  ;;  %v1625_v2 = vadd.f32 %v1608_v4, %v1558_v6 }
 0x26b   :  { %v6025_v53 = vpop.permute.xlu0 %733  ;;  %v1676_v35 = vsel %vm1673_vm6, %v5875_v48, %v5908_v55  ;;  %v1356_v19 = vadd.f32 %v1339_v50, %v1289_v33  ;;  %v1493_v54 = vadd.f32 %v1476_v29, %v1426_v15  ;;  %v1494_v36 = vadd.f32 %v1477_v22, %v1427_v18  ;;  %v7357_v22 = vld [vmem:[#allocation125_spill] sm:$0xff] }
 0x26c   :  { %v1626_v34 = vadd.f32 %v1609_v41, %v1559_v62  ;;  %v1473_v58 = vsel %vm1472_vm7, %v7356_v9, %v5493_v26  ;;  %v1610_v45 = vsel %vm1606_vm13, %v5737_v60, %v5793_v38  ;;  %v1611_v23 = vsel %vm1606_vm13, %v5793_v38, %v5762_v12 }
 0x26d   :  { %v1692_v37 = vadd.f32 %v1675_v1, %v1625_v2  ;;  %v1423_v48 = vadd.f32 %v1406_v63, %v1356_v19  ;;  %v1560_v33 = vadd.f32 %v1543_v56, %v1493_v54  ;;  %v1561_v50 = vadd.f32 %v1544_v8, %v1494_v36 }
 0x26e   :  { %v6045_v28 = vpop.permute.xlu1 %800  ;;  %v1693_v15 = vadd.f32 %v1676_v35, %v1626_v34  ;;  %v1093_v26 = vadd.f32 %v5952_v20, %v5930_v52  ;;  %v1540_v60 = vsel %vm1539_vm12, %v5710_v42, %v5535_v14  ;;  %v1677_v38 = vsel %vm1673_vm6, %v5908_v55, %v5903_v49  ;;  %v7358_v20 = vld [vmem:[#allocation130_spill] sm:$0xff]  ;;  %v7359_v35 = vld [vmem:[#allocation135_spill] sm:$0xff] }
 0x26f   :  { %v6047_v4 = vpop.permute.xlu0 %798  ;;  %v1678_v29 = vsel %vm1673_vm6, %v5903_v49, %v5935_v46  ;;  %v1210_v6 = vsel %vm1204_vm8, %v7340_v7, %v7357_v22  ;;  %v1490_v41 = vadd.f32 %v1473_v58, %v1423_v48  ;;  %v1627_v18 = vadd.f32 %v1610_v45, %v1560_v33 }
 0x270   :  { %v1628_v11 = vadd.f32 %v1611_v23, %v1561_v50  ;;  %v1160_v52 = vadd.f32 %v1143_v40, %v1093_v26  ;;  %v1277_v14 = vsel %vm7113_vm9, %v7346_v57, %v7358_v20  ;;  %v1607_v42 = vsel %vm1606_vm13, %v5844_v10, %v5708_v17 }
 0x271   :  { %v1706_v55 = vadd.f32 %v5824_v0, %v1692_v37  ;;  %v1557_v49 = vadd.f32 %v1540_v60, %v1490_v41  ;;  %v1694_v62 = vadd.f32 %v1677_v38, %v1627_v18  ;;  %v1707_v1 = vadd.f32 %v5824_v0, %v1693_v15 }
 0x272   :  { %v1757_v63 = vpop.permute.xlu1 %1756  ;;  %v1695_v7 = vadd.f32 %v1678_v29, %v1628_v11  ;;  %v1227_v8 = vadd.f32 %v1210_v6, %v1160_v52  ;;  %v1674_v40 = vsel %vm1673_vm6, %v1656_v47, %v5877_v25  ;;  %vm1772_vm9 = vcmask 146432   ;;  %v7360_v6 = vld [vmem:[#allocation100_spill] sm:$0xff] }
 0x273   :  { %v6071_v56 = vpop.permute.xlu0 %1667  ;;  %v1624_v2 = vadd.f32 %v1607_v42, %v1557_v49  ;;  %v1344_v17 = vsel %vm1338_vm10, %v7350_v39, %v7359_v35  ;;  %v1715_v19 = vmax.f32 %v1706_v55, 0.0  ;;  %v1708_v54 = vadd.f32 %v5824_v0, %v1694_v62  ;;  %v7362_v42 = vld [vmem:[#allocation15_spill] sm:$0xff]  ;;  %v7363_v62 = vld [vmem:[#allocation108_spill] sm:$0xff] }
 0x274   :  { %v1294_v57 = vadd.f32 %v1277_v14, %v1227_v8  ;;  %v1709_v36 = vadd.f32 %v5824_v0, %v1695_v7  ;;  %v1716_v9 = vmax.f32 %v1707_v1, 0.0  ;;  %v1411_v25 = vsel %vm1405_vm11, %v7352_v59, %v5673_v5  ;;  %v7361_v14 = vld [vmem:[#allocation16_spill] sm:$0xff] }
 0x275   :  { %v1691_v34 = vadd.f32 %v1674_v40, %v1624_v2  ;;  %v1478_v48 = vsel %vm1472_vm7, %v7354_v61, %v5849_v27  ;;  %v1717_v59 = vmax.f32 %v1708_v54, 0.0  ;;  %v1545_v38 = vsel %vm1539_vm12, %v5620_v21, %v5960_v51 }
 0x276   :  { %v1761_v10 = vpop.permute.xlu1 %1760  ;;  %v1361_v23 = vadd.f32 %v1344_v17, %v1294_v57  ;;  %v1718_v26 = vmax.f32 %v1709_v36, 0.0  ;;  %v139_v41 = vsel %vm132_vm0, %v4815_v24, %v7360_v6  ;;  %v80_v55 = vmul.f32 %v7362_v42, %v7361_v14 }
 0x277   :  { %v1759_v58 = vpop.permute.xlu0 %1758  ;;  %v1705_v15 = vadd.f32 %v5824_v0, %v1691_v34  ;;  %v1612_v49 = vsel %vm1606_vm13, %v5762_v12, %v6017_v30  ;;  %v206_v1 = vsel %vm7114_vm1, %v7252_v32, %v7363_v62  ;;  %v1679_v2 = vsel %vm1673_vm6, %v5935_v46, %v6071_v56  ;;  %v7364_v12 = vld [vmem:[#allocation116_spill] sm:$0xff]  ;;  %v7365_v34 = vld [vmem:[#allocation123_spill] sm:$0xff] }
 0x278   :  { %v1773_v47 = vsel %vm1772_vm9, %v1757_v63, %v1759_v58  ;;  %v1774_v45 = vsel %vm1772_vm9, %v1759_v58, %v1761_v10  ;;  %v1428_v50 = vadd.f32 %v1411_v25, %v1361_v23  ;;  %v156_v40 = vadd.f32 %v139_v41, %v80_v55  ;;  %v4300_v32 = vld [vmem:[%s6981_s0 + $0x8] ss:$0 sm:$0xff]  ;;  %v7374_v55 = vld [vmem:[#allocation18_spill] sm:$0xff]  ;;  %s4380_s0 = smov 117  }
 0x279   :  { %v1790_v37 = vmul.f32 %v1773_v47, %v1715_v19  ;;  %v1791_v39 = vmul.f32 %v1774_v45, %v1716_v9  ;;  %v1714_v8 = vmax.f32 %v1705_v15, 0.0  ;;  %v273_v57 = vsel %vm7115_vm2, %v7262_v13, %v7364_v12  ;;  %v7366_v13 = vld [vmem:[#allocation101_spill] sm:$0xff]  ;;  %v7367_v45 = vld [vmem:[#allocation48_spill] sm:$0xff] }
 0x27a   :  { %v6088_v33 = vpop.permute.xlu1 %1764  ;;  %v1495_v18 = vadd.f32 %v1478_v48, %v1428_v50  ;;  %v82_v19 = vmul.f32 %v4300_v32, %v7361_v14  ;;  %v223_v54 = vadd.f32 %v206_v1, %v156_v40  ;;  %v340_v9 = vsel %vm333_vm3, %v7270_v31, %v7365_v34  ;;  %v7370_v31 = vld [vmem:[#allocation109_spill] sm:$0xff]  ;;  %v7377_v1 = vld [vmem:[#allocation124_spill] sm:$0xff] }
 0x27b   :  { %1811 = vrot.lane.b32.xlu0 %v1791_v39, %s4375_s29  ;;  %1809 = vrot.lane.b32.xlu1 %v1790_v37, %s4375_s29  ;;  %v1763_v60 = vpop.permute.xlu0 %1762  ;;  %v81_v23 = vmul.f32 %v7367_v45, %v7361_v14  ;;  %v7368_v37 = vld [vmem:[#allocation128_spill] sm:$0xff]  ;;  %v7369_v39 = vld [vmem:[#allocation43_spill] sm:$0xff]  ;;  %v207_v50 = vsel %vm7114_vm1, %v7363_v62, %v7370_v31  ;;  %vm7376_vm1 = vcmask 850944  }
 0x27c   :  { %v1775_v29 = vsel %vm1772_vm9, %v1761_v10, %v1763_v60  ;;  %v1776_v61 = vsel %vm1772_vm9, %v1763_v60, %v6088_v33  ;;  %v1562_v7 = vadd.f32 %v1545_v38, %v1495_v18  ;;  %v1789_v10 = vmul.f32 %v1757_v63, %v1714_v8  ;;  %v7371_v38 = vld [vmem:[#allocation133_spill] sm:$0xff] }
 0x27d   :  { %v1792_v11 = vmul.f32 %v1775_v29, %v1717_v59  ;;  %v1793_v52 = vmul.f32 %v1776_v61, %v1718_v26  ;;  %v140_v63 = vsel %vm132_vm0, %v7360_v6, %v7366_v13  ;;  %v158_v25 = vadd.f32 %v7366_v13, %v82_v19  ;;  %v7372_v29 = vld [vmem:[#allocation50_spill] sm:$0xff]  ;;  %v7373_v18 = vld [vmem:[#allocation117_spill] sm:$0xff] }
 0x27e   :  { %v6107_v21 = vpop.permute.xlu1 %867  ;;  %v1629_v17 = vadd.f32 %v1612_v49, %v1562_v7  ;;  %v290_v47 = vadd.f32 %v273_v57, %v223_v54  ;;  %v407_v48 = vsel %vm7117_vm4, %v7369_v39, %v7368_v37  ;;  %v157_v60 = vadd.f32 %v140_v63, %v81_v23  ;;  %v7375_v49 = vld [vmem:[#allocation57_spill] sm:$0xff]  ;;  %v7384_v23 = vld [vmem:[#allocation134_spill] sm:$0xff] }
 0x27f   :  { %1815 = vrot.lane.b32.xlu0 %v1793_v52, %s4375_s29  ;;  %1813 = vrot.lane.b32.xlu1 %v1792_v11, %s4375_s29  ;;  %v6114_v24 = vpop.permute.xlu0 %865  ;;  %v225_v15 = vadd.f32 %v7370_v31, %v158_v25  ;;  %v474_v61 = vsel %vm7116_vm5, %v7372_v29, %v7371_v38  ;;  %v274_v11 = vsel %vm7115_vm2, %v7364_v12, %v7373_v18  ;;  %v7379_v12 = vld [vmem:[#allocation63_spill] sm:$0xff]  ;;  %vm7380_vm2 = vcmask 842752   ;;  %v7381_v54 = vld [vmem:[#allocation129_spill] sm:$0xff] }
 0x280   :  { %v1696_v46 = vadd.f32 %v1679_v2, %v1629_v17  ;;  %v357_v59 = vadd.f32 %v340_v9, %v290_v47  ;;  %v224_v42 = vadd.f32 %v207_v50, %v157_v60  ;;  %v541_v62 = vsel %vm7376_vm1, %v7375_v49, %v7374_v55  ;;  %v7378_v17 = vld [vmem:[#allocation19_spill] sm:$0xff]  ;;  %v7382_v25 = vld [vmem:[#allocation69_spill] sm:$0xff] }
 0x281   :  { %v292_v52 = vadd.f32 %v7373_v18, %v225_v15  ;;  %v341_v7 = vsel %vm333_vm3, %v7365_v34, %v7377_v1  ;;  %v408_v9 = vsel %vm7117_vm4, %v7368_v37, %v7381_v54  ;;  %vm7383_vm1 = vcmask 834560   ;;  %v7385_v15 = vld [vmem:[#allocation75_spill] sm:$0xff]  ;;  %v7387_v60 = vld [vmem:[#allocation17_spill] sm:$0xff] }
 0x282   :  { %v6126_v36 = vpop.permute.xlu1 %934  ;;  %v1710_v6 = vadd.f32 %v5824_v0, %v1696_v46  ;;  %v424_v14 = vadd.f32 %v407_v48, %v357_v59  ;;  %v291_v57 = vadd.f32 %v274_v11, %v224_v42  ;;  %v675_v47 = vsel %vm7383_vm1, %v7382_v25, %v5928_v43  ;;  %v7389_v18 = vld [vmem:[#allocation81_spill] sm:$0xff] }
 0x283   :  { %1807 = vrot.lane.b32.xlu1 %v1789_v10, %s4375_s29  ;;  %v6132_v58 = vpop.permute.xlu0 %932  ;;  %v359_v8 = vadd.f32 %v7377_v1, %v292_v52  ;;  %v608_v10 = vsel %vm7380_vm2, %v7379_v12, %v7378_v17  ;;  %v475_v39 = vsel %vm7116_vm5, %v7371_v38, %v7384_v23  ;;  %vm7386_vm2 = vcmask 687104   ;;  %v7391_v52 = vld [vmem:[#allocation20_spill] sm:$0xff] }
 0x284   :  { %v491_v40 = vadd.f32 %v474_v61, %v424_v14  ;;  %v1719_v32 = vmax.f32 %v1710_v6, 0.0  ;;  %v358_v63 = vadd.f32 %v341_v7, %v291_v57  ;;  %v742_v59 = vsel %vm7386_vm2, %v7385_v15, %v5991_v44  ;;  %v7393_v7 = vld [vmem:[#allocation88_spill] sm:$0xff] }
 0x285   :  { %v426_v46 = vadd.f32 %v7381_v54, %v359_v8  ;;  %vm7388_vm1 = vcmask 850944   ;;  %vm7390_vm5 = vcmask 678912   ;;  %vm7392_vm4 = vcmask 842752  }
 0x286   :  { %v6147_v26 = vpop.permute.xlu1 %1001  ;;  %v558_v34 = vadd.f32 %v541_v62, %v491_v40  ;;  %v425_v50 = vadd.f32 %v408_v9, %v358_v63  ;;  %v542_v29 = vsel %vm7388_vm1, %v7374_v55, %v7387_v60  ;;  %v809_v11 = vsel %vm7390_vm5, %v7389_v18, %v6047_v4  ;;  %v7399_v63 = vld [vmem:[#allocation102_spill] sm:$0xff] }
 0x287   :  { %v6153_v41 = vpop.permute.xlu0 %999  ;;  %v493_v48 = vadd.f32 %v7384_v23, %v426_v46  ;;  %v609_v14 = vsel %vm7392_vm4, %v7378_v17, %v7391_v52  ;;  %vm7394_vm2 = vcmask 670720   ;;  %vm7395_vm1 = vcmask 834560   ;;  %v7396_v17 = vld [vmem:[#allocation94_spill] sm:$0xff] }
 0x288   :  { %v625_v37 = vadd.f32 %v608_v10, %v558_v34  ;;  %v492_v38 = vadd.f32 %v475_v39, %v425_v50  ;;  %v876_v55 = vsel %vm7394_vm2, %v7393_v7, %v6114_v24  ;;  %v676_v40 = vsel %vm7395_vm1, %v5928_v43, %v5965_v3 }
 0x289   :  { %v560_v61 = vadd.f32 %v7387_v60, %v493_v48  ;;  %vm7397_vm4 = vcmask 662528   ;;  %vm7398_vm5 = vcmask 687104   ;;  %vm7400_vm2 = vcmask 654336  }
 0x28a   :  { %v6166_v2 = vpop.permute.xlu1 %1066  ;;  %v692_v6 = vadd.f32 %v675_v47, %v625_v37  ;;  %v559_v1 = vadd.f32 %v542_v29, %v492_v38  ;;  %v743_v54 = vsel %vm7398_vm5, %v5991_v44, %v6025_v53  ;;  %v1010_v43 = vsel %vm7400_vm2, %v7399_v63, %v6153_v41 }
 0x28b   :  { %v6171_v19 = vpop.permute.xlu0 %1766  ;;  %v627_v42 = vadd.f32 %v7391_v52, %v560_v61  ;;  %vm7401_vm1 = vcmask 678912   ;;  %v1077_v37 = vsel %vm1070_vm14, %v7345_v16, %v6166_v2  ;;  %vm7403_vm5 = vcmask 662528  }
 0x28c   :  { %v1777_v13 = vsel %vm1772_vm9, %v6088_v33, %v6171_v19  ;;  %v759_v49 = vadd.f32 %v742_v59, %v692_v6  ;;  %v626_v10 = vadd.f32 %v609_v14, %v559_v1  ;;  %v810_v25 = vsel %vm7401_vm1, %v6047_v4, %v6045_v28 }
 0x28d   :  { %v1794_v45 = vmul.f32 %v1777_v13, %v1719_v32  ;;  %v694_v57 = vadd.f32 %v5965_v3, %v627_v42  ;;  %v943_v32 = vsel %vm7397_vm4, %v7396_v17, %v6132_v58  ;;  %vm7402_vm4 = vcmask 670720  }
 0x28e   :  { %v1134_v31 = vpop.permute.xlu1 %1133  ;;  %v826_v12 = vadd.f32 %v809_v11, %v759_v49  ;;  %v693_v13 = vadd.f32 %v676_v40, %v626_v10  ;;  %v877_v44 = vsel %vm7402_vm4, %v6114_v24, %v6107_v21  ;;  %v944_v4 = vsel %vm7403_vm5, %v6132_v58, %v6126_v36 }
 0x28f   :  { %1817 = vrot.lane.b32.xlu0 %v1794_v45, %s4375_s29  ;;  %v1069_v33 = vpop.permute.xlu0 %1068  ;;  %v761_v9 = vadd.f32 %v6025_v53, %v694_v57  ;;  %v1011_v29 = vsel %vm7400_vm2, %v6153_v41, %v6147_v26  ;;  %vm7405_vm1 = vcmask 482304   ;;  %vm4377_vm2 = vmmov 0  }
 0x290   :  { %v893_v46 = vadd.f32 %v876_v55, %v826_v12  ;;  %v760_v45 = vadd.f32 %v743_v54, %v693_v13  ;;  %v1078_v11 = vsel %vm1070_vm14, %v6166_v2, %v1069_v33  ;;  %vm7406_vm4 = vmmov %vm7405_vm1 }
 0x291   :  { %v828_v23 = vadd.f32 %v6045_v28, %v761_v9  ;;  %v7404_v28 = vld [vmem:[#allocation118_spill] sm:$0xff] }
 0x292   :  { %v1201_v62 = vpop.permute.xlu1 %1200  ;;  %v960_v47 = vadd.f32 %v943_v32, %v893_v46  ;;  %v827_v48 = vadd.f32 %v810_v25, %v760_v45  ;;  %v1144_v60 = vsel %vm1137_vm15, %v7404_v28, %v1134_v31 }
 0x293   :  { %v1136_v8 = vpop.permute.xlu0 %1135  ;;  %v895_v15 = vadd.f32 %v6107_v21, %v828_v23  ;;  %v1211_v21 = vsel %vm1204_vm8, %v7357_v22, %v1201_v62 }
 0x294   :  { %v1027_v53 = vadd.f32 %v1010_v43, %v960_v47  ;;  %v894_v59 = vadd.f32 %v877_v44, %v827_v48  ;;  %v1145_v41 = vsel %vm1137_vm15, %v1134_v31, %v1136_v8 }
 0x295   :  { %v962_v24 = vadd.f32 %v6126_v36, %v895_v15 }
 0x296   :  { %v1268_v34 = vpop.permute.xlu1 %1267  ;;  %v1094_v61 = vadd.f32 %v1077_v37, %v1027_v53  ;;  %v961_v16 = vadd.f32 %v944_v4, %v894_v59 }
 0x297   :  { %v1203_v3 = vpop.permute.xlu0 %1202  ;;  %v1029_v18 = vadd.f32 %v6147_v26, %v962_v24  ;;  %v1278_v36 = vsel %vm7405_vm1, %v7358_v20, %v1268_v34 }
 0x298   :  { %v1161_v58 = vadd.f32 %v1144_v60, %v1094_v61  ;;  %v1028_v52 = vadd.f32 %v1011_v29, %v961_v16  ;;  %v1212_v40 = vsel %vm1204_vm8, %v1201_v62, %v1203_v3  ;;  %vm7408_vm8 = vcmask 1022976  }
 0x299   :  { %v1096_v14 = vadd.f32 %v1069_v33, %v1029_v18  ;;  %vm7414_vm5 = vmmov %vm7408_vm8 }
 0x29a   :  { %v1335_v39 = vpop.permute.xlu1 %1334  ;;  %v1228_v42 = vadd.f32 %v1211_v21, %v1161_v58  ;;  %v1095_v1 = vadd.f32 %v1078_v11, %v1028_v52 }
 0x29b   :  { %v1270_v50 = vpop.permute.xlu0 %1269  ;;  %v1345_v22 = vsel %vm1338_vm10, %v7359_v35, %v1335_v39  ;;  %v1163_v55 = vadd.f32 %v1136_v8, %v1096_v14 }
 0x29c   :  { %v1295_v26 = vadd.f32 %v1278_v36, %v1228_v42  ;;  %v1162_v57 = vadd.f32 %v1145_v41, %v1095_v1  ;;  %v1279_v33 = vsel %vm7406_vm4, %v1268_v34, %v1270_v50 }
 0x29d   :  { %v1230_v12 = vadd.f32 %v1203_v3, %v1163_v55 }
 0x29e   :  { %v1402_v6 = vpop.permute.xlu1 %1401  ;;  %v1362_v20 = vadd.f32 %v1345_v22, %v1295_v26  ;;  %v1229_v31 = vadd.f32 %v1212_v40, %v1162_v57 }
 0x29f   :  { %v1337_v38 = vpop.permute.xlu0 %1336  ;;  %v1412_v2 = vsel %vm1405_vm11, %v5673_v5, %v1402_v6  ;;  %v1297_v35 = vadd.f32 %v1270_v50, %v1230_v12 }
 0x2a0   :  { %v1429_v54 = vadd.f32 %v1412_v2, %v1362_v20  ;;  %v1346_v8 = vsel %vm1338_vm10, %v1335_v39, %v1337_v38  ;;  %v1296_v9 = vadd.f32 %v1279_v33, %v1229_v31  ;;  %vm7410_vm10 = vmmov %vm7408_vm8 }
 0x2a1   :  { %v1364_v46 = vadd.f32 %v1337_v38, %v1297_v35 }
 0x2a2   :  { %v1469_v49 = vpop.permute.xlu1 %1468  ;;  %v1363_v34 = vadd.f32 %v1346_v8, %v1296_v9 }
 0x2a3   :  { %v1404_v7 = vpop.permute.xlu0 %1403  ;;  %v1479_v17 = vsel %vm1472_vm7, %v5849_v27, %v1469_v49 }
 0x2a4   :  { %v1496_v5 = vadd.f32 %v1479_v17, %v1429_v54  ;;  %v1413_v13 = vsel %vm1405_vm11, %v1402_v6, %v1404_v7  ;;  %v1431_v27 = vadd.f32 %v1404_v7, %v1364_v46 }
 0x2a5   :  { %v1430_v45 = vadd.f32 %v1413_v13, %v1363_v34  ;;  %v6367_v13 = vld [vmem:[%s6984_s3 + $0x80] sm:$0xff]   ;;  %v6377_v34 = vld [vmem:[%s6984_s3 + $0x78] sm:$0xff]  }
 0x2a6   :  { %v1536_v10 = vpop.permute.xlu1 %1535  ;;  %3841 = vmatprep.subr.bf16.mxu0 %v6367_v13 }
 0x2a7   :  { %v1471_v32 = vpop.permute.xlu0 %1470  ;;  %v1546_v62 = vsel %vm1539_vm12, %v5960_v51, %v1536_v10 }
 0x2a8   :  { %v1563_v25 = vadd.f32 %v1546_v62, %v1496_v5  ;;  %v1480_v47 = vsel %vm1472_vm7, %v1469_v49, %v1471_v32  ;;  %v1498_v23 = vadd.f32 %v1471_v32, %v1431_v27  ;;  %v6390_v27 = vld [vmem:[%s6984_s3 + $0x38] sm:$0xff]   ;;  %vm7407_vm7 = vcmask 1031168  }
 0x2a9   :  { %v1497_v39 = vadd.f32 %v1480_v47, %v1430_v45  ;;  %vm7413_vm15 = vmmov %vm7407_vm7 }
 0x2aa   :  { %v1603_v63 = vpop.permute.xlu1 %1602  ;;  %vm7415_vm1 = vmmov %vm7407_vm7 }
 0x2ab   :  { %v1613_v43 = vsel %vm1606_vm13, %v6017_v30, %v1603_v63  ;;  %v1538_v3 = vpop.permute.xlu0 %1537  ;;  %vm7416_vm4 = vmmov %vm7415_vm1 }
 0x2ac   :  { %v1630_v44 = vadd.f32 %v1613_v43, %v1563_v25  ;;  %v1547_v53 = vsel %vm1539_vm12, %v1536_v10, %v1538_v3  ;;  %v1565_v50 = vadd.f32 %v1538_v3, %v1498_v23  ;;  %v4376_v43 = vmov 0.0   ;;  %v6383_v3 = vld [vmem:[%s6984_s3 + $0xc0] sm:$0xff]   ;;  %vm7411_vm12 = vmmov %vm7407_vm7 }
 0x2ad   :  { %v1564_v4 = vadd.f32 %v1547_v53, %v1497_v39  ;;  %3948 = vmatprep.subr.bf16.mxu1 %v4376_v43  ;;  %3964 = vmatprep.mubr.msk.bf16.mxu1 %vm4377_vm2, %v4376_v43 }
 0x2ae   :  { %v1670_v51 = vpop.permute.xlu1 %1669  ;;  %3949 = vmatpush3.bf16.msra.mxu1 %v6383_v3 }
 0x2af   :  { %v1680_v48 = vsel %vm1673_vm6, %v6071_v56, %v1670_v51  ;;  %v1605_v37 = vpop.permute.xlu0 %1604  ;;  %3950 = vmatprep.subr.bf16.mxu1 %v4376_v43 }
 0x2b0   :  { %v1697_v15 = vadd.f32 %v1680_v48, %v1630_v44  ;;  %v1614_v30 = vsel %vm1606_vm13, %v1603_v63, %v1605_v37  ;;  %v1632_v28 = vadd.f32 %v1605_v37, %v1565_v50  ;;  %v6372_v63 = vld [vmem:[%s6984_s3 + $0x40] sm:$0xff]   ;;  %vm7412_vm13 = vmmov %vm7408_vm8 }
 0x2b1   :  { %v1631_v24 = vadd.f32 %v1614_v30, %v1564_v4  ;;  %3842 = vmatpush3.bf16.msra.mxu0 %v6372_v63 }
 0x2b2   :  { %v1711_v59 = vadd.f32 %v5824_v0, %v1697_v15  ;;  %v1769_v60 = vpop.permute.xlu1 %1768  ;;  %3843 = vmatprep.subr.bf16.mxu0 %v6377_v34 }
 0x2b3   :  { %v1672_v29 = vpop.permute.xlu0 %1671  ;;  %v1778_v21 = vsel %vm1772_vm9, %v6171_v19, %v1769_v60 }
 0x2b4   :  { %v1720_v61 = vmax.f32 %v1711_v59, 0.0  ;;  %v1681_v6 = vsel %vm1673_vm6, %v1670_v51, %v1672_v29  ;;  %v1699_v16 = vadd.f32 %v1672_v29, %v1632_v28  ;;  %vm1825_vm6 = vcmask 900096  }
 0x2b5   :  { %v1698_v56 = vadd.f32 %v1681_v6, %v1631_v24  ;;  %3844 = vmatpush3.bf16.msra.mxu0 %v6390_v27 }
 0x2b6   :  { %v1795_v38 = vmul.f32 %v1778_v21, %v1720_v61  ;;  %v1713_v18 = vadd.f32 %v5824_v0, %v1699_v16 }
 0x2b7   :  { %v1712_v58 = vadd.f32 %v5824_v0, %v1698_v56  ;;  %v1771_v11 = vpop.permute.xlu0 %1770 }
 0x2b8   :  { %1819 = vrot.lane.b32.xlu1 %v1795_v38, %s4375_s29  ;;  %v1722_v52 = vmax.f32 %v1713_v18, 0.0  ;;  %v1779_v36 = vsel %vm1772_vm9, %v1769_v60, %v1771_v11  ;;  %vm7409_vm9 = vmmov %vm7407_vm7 }
 0x2b9   :  { %v1721_v14 = vmax.f32 %v1712_v58, 0.0 }
 0x2ba   :  { %v1797_v42 = vmul.f32 %v1771_v11, %v1722_v52 }
 0x2bb   :  { %v1796_v41 = vmul.f32 %v1779_v36, %v1721_v14 }
 0x2bc   :  { %1823 = vrot.lane.b32.xlu1 %v1797_v42, %s4375_s29 }
 0x2bd   :  { %1821 = vrot.lane.b32.xlu0 %v1796_v41, %s4375_s29  ;;  %s4386_s29 = smov 64  }
 0x2ed   :  { %v1810_v19 = vpop.permute.xlu1 %1809  ;;  %v1812_v49 = vpop.permute.xlu0 %1811 }
 0x2ee   :  { %v1827_v1 = vsel %vm1825_vm6, %v1810_v19, %v1812_v49 }
 0x2ef   :  { %1843 = vst [vmem:[#allocation2] sm:$0x3f] %v1827_v1 }
 0x2f1   :  { %v1814_v0 = vpop.permute.xlu1 %1813  ;;  %v1816_v22 = vpop.permute.xlu0 %1815 }
 0x2f2   :  { %v1828_v7 = vsel %vm1825_vm6, %v1812_v49, %v1814_v0  ;;  %v1829_v55 = vsel %vm1825_vm6, %v1814_v0, %v1816_v22 }
 0x2f3   :  { %1844 = vst [vmem:[#allocation2 + $0x18] sm:$0x3f] %v1828_v7  ;;  %1845 = vst [vmem:[#allocation2 + $0x10] sm:$0x3f] %v1829_v55 }
 0x2f5   :  { %v1808_v26 = vpop.permute.xlu1 %1807 }
 0x2f6   :  { %v1826_v40 = vsel %vm1825_vm6, %v1808_v26, %v1810_v19  ;;  %v6280_v57 = vld [vmem:[#allocation2] sm:$0x3f]  ;;  %v6421_v26 = vld [vmem:[%s6984_s3 + $0x70] sm:$0xff]  }
 0x2f7   :  { %1842 = vst [vmem:[#allocation2 + $0x30] sm:$0x3f] %v1826_v40  ;;  %1868 = vrot.lane.b32.xlu0 %v6280_v57, %s4349_s19  ;;  %v6426_v40 = vld [vmem:[%s6984_s3 + $0x30] sm:$0xff]   ;;  %3845 = vmatprep.subr.bf16.mxu0 %v6421_v26 }
 0x2f8   :  { %3846 = vmatpush3.bf16.msra.mxu0 %v6426_v40 }
 0x2fa   :  { %v6284_v2 = vld [vmem:[#allocation2 + $0x18] sm:$0x3f]  ;;  %v6286_v12 = vld [vmem:[#allocation2 + $0x10] sm:$0x3f] }
 0x2fb   :  { %1870 = vrot.lane.b32.xlu1 %v6284_v2, %s4349_s19  ;;  %1872 = vrot.lane.b32.xlu0 %v6286_v12, %s4349_s19 }
 0x2fe   :  { %v6292_v20 = vld [vmem:[#allocation2 + $0x30] sm:$0x3f] }
 0x2ff   :  { %1866 = vrot.lane.b32.xlu1 %v6292_v20, %s4349_s19  ;;  %1907 = vrot.lane.b32.xlu0 %v6280_v57, %s4350_s20 }
 0x301   :  { %v1818_v33 = vpop.permute.xlu0 %1817 }
 0x302   :  { %v1830_v10 = vsel %vm1825_vm6, %v1816_v22, %v1818_v33 }
 0x303   :  { %1846 = vst [vmem:[#allocation2 + $0x8] sm:$0x3f] %v1830_v10  ;;  %1909 = vrot.lane.b32.xlu1 %v6284_v2, %s4350_s20  ;;  %1911 = vrot.lane.b32.xlu0 %v6286_v12, %s4350_s20 }
 0x307   :  { %1905 = vrot.lane.b32.xlu1 %v6292_v20, %s4350_s20  ;;  %1946 = vrot.lane.b32.xlu0 %v6280_v57, %s4351_s21 }
 0x30a   :  { %v6311_v31 = vld [vmem:[#allocation2 + $0x8] sm:$0x3f] }
 0x30b   :  { %1948 = vrot.lane.b32.xlu1 %v6284_v2, %s4351_s21  ;;  %1950 = vrot.lane.b32.xlu0 %v6286_v12, %s4351_s21 }
 0x30f   :  { %1944 = vrot.lane.b32.xlu0 %v6292_v20, %s4351_s21  ;;  %1874 = vrot.lane.b32.xlu1 %v6311_v31, %s4349_s19 }
 0x313   :  { %1987 = vrot.lane.b32.xlu0 %v6284_v2, %s4352_s22  ;;  %1985 = vrot.lane.b32.xlu1 %v6280_v57, %s4352_s22 }
 0x317   :  { %1913 = vrot.lane.b32.xlu0 %v6311_v31, %s4350_s20  ;;  %1989 = vrot.lane.b32.xlu1 %v6286_v12, %s4352_s22 }
 0x31b   :  { %1952 = vrot.lane.b32.xlu0 %v6311_v31, %s4351_s21  ;;  %1983 = vrot.lane.b32.xlu1 %v6292_v20, %s4352_s22 }
 0x31f   :  { %1991 = vrot.lane.b32.xlu1 %v6311_v31, %s4352_s22 }
 0x32a   :  { %v1820_v17 = vpop.permute.xlu1 %1819 }
 0x32b   :  { %v1831_v32 = vsel %vm1825_vm6, %v1818_v33, %v1820_v17 }
 0x32c   :  { %1847 = vst [vmem:[#allocation2 + $0x20] sm:$0x3f] %v1831_v32 }
 0x32e   :  { %v1824_v35 = vpop.permute.xlu1 %1823 }
 0x32f   :  { %v1822_v54 = vpop.permute.xlu0 %1821 }
 0x330   :  { %v1832_v8 = vsel %vm1825_vm6, %v1820_v17, %v1822_v54  ;;  %v1833_v9 = vsel %vm1825_vm6, %v1822_v54, %v1824_v35  ;;  %v6444_v35 = vld [vmem:[%s6984_s3 + $0x68] sm:$0xff]   ;;  %vm7417_vm6 = vmmov %vm7414_vm5 }
 0x331   :  { %1848 = vst [vmem:[#allocation2 + $0x28] sm:$0x3f] %v1832_v8  ;;  %1849 = vst [vmem:[#allocation2 + $0x38] sm:$0x3f] %v1833_v9  ;;  %v6456_v9 = vld [vmem:[%s6984_s3 + $0x28] sm:$0xff]   ;;  %3847 = vmatprep.subr.bf16.mxu0 %v6444_v35 }
 0x332   :  { %3848 = vmatpush3.bf16.msra.mxu0 %v6456_v9 }
 0x333   :  { %v6334_v62 = vld [vmem:[#allocation2 + $0x20] sm:$0x3f] }
 0x334   :  { %1876 = vrot.lane.b32.xlu0 %v6334_v62, %s4349_s19 }
 0x338   :  { %v6338_v46 = vld [vmem:[#allocation2 + $0x38] sm:$0x3f]  ;;  %v6340_v5 = vld [vmem:[#allocation2 + $0x28] sm:$0x3f] }
 0x339   :  { %1880 = vrot.lane.b32.xlu0 %v6338_v46, %s4349_s19  ;;  %1878 = vrot.lane.b32.xlu1 %v6340_v5, %s4349_s19 }
 0x33d   :  { %1917 = vrot.lane.b32.xlu0 %v6340_v5, %s4350_s20  ;;  %1915 = vrot.lane.b32.xlu1 %v6334_v62, %s4350_s20 }
 0x341   :  { %1954 = vrot.lane.b32.xlu0 %v6334_v62, %s4351_s21  ;;  %1919 = vrot.lane.b32.xlu1 %v6338_v46, %s4350_s20 }
 0x345   :  { %1958 = vrot.lane.b32.xlu0 %v6338_v46, %s4351_s21  ;;  %1956 = vrot.lane.b32.xlu1 %v6340_v5, %s4351_s21 }
 0x349   :  { %1995 = vrot.lane.b32.xlu0 %v6340_v5, %s4352_s22  ;;  %1993 = vrot.lane.b32.xlu1 %v6334_v62, %s4352_s22 }
 0x34d   :  { %1997 = vrot.lane.b32.xlu1 %v6338_v46, %s4352_s22 }
 0x369   :  { %v1869_v25 = vpop.permute.xlu0 %1868 }
 0x36d   :  { %v1871_v47 = vpop.permute.xlu1 %1870  ;;  %v1873_v45 = vpop.permute.xlu0 %1872 }
 0x36e   :  { %v1883_v15 = vsel %vm132_vm0, %v1869_v25, %v1871_v47  ;;  %v1884_v60 = vsel %vm132_vm0, %v1871_v47, %v1873_v45 }
 0x36f   :  { %v1898_v4 = vmax.f32 %v6280_v57, %v1883_v15  ;;  %v1899_v6 = vmax.f32 %v6284_v2, %v1884_v60  ;;  %v6431_v57 = vld [vmem:[%s6984_s3 + $0xb8] sm:$0xff]  }
 0x370   :  { %3951 = vmatpush3.bf16.msra.mxu1 %v6431_v57  ;;  %v6498_v15 = vld [vmem:[%s6984_s3 + $0x18] sm:$0xff]  }
 0x371   :  { %v1867_v23 = vpop.permute.xlu1 %1866  ;;  %v1908_v44 = vpop.permute.xlu0 %1907  ;;  %3952 = vmatprep.subr.bf16.mxu1 %v4376_v43 }
 0x372   :  { %v1882_v38 = vsel %vm132_vm0, %v1867_v23, %v1869_v25 }
 0x373   :  { %v1897_v14 = vmax.f32 %v6292_v20, %v1882_v38 }
 0x375   :  { %v1910_v53 = vpop.permute.xlu1 %1909  ;;  %v1912_v51 = vpop.permute.xlu0 %1911 }
 0x376   :  { %v1922_v30 = vsel %vm7407_vm7, %v1908_v44, %v1910_v53  ;;  %v1923_v61 = vsel %vm7409_vm9, %v1910_v53, %v1912_v51  ;;  %vm7418_vm7 = vmmov %vm7414_vm5 }
 0x377   :  { %v1937_v29 = vmax.f32 %v1898_v4, %v1922_v30  ;;  %v1938_v11 = vmax.f32 %v1899_v6, %v1923_v61  ;;  %v6505_v30 = vld [vmem:[%s6984_s3 + $0xa0] sm:$0xff]   ;;  %v6538_v6 = vld [vmem:[%s6984_s3 + $0x48] sm:$0xff]   ;;  %vm7420_vm9 = vmmov %vm7414_vm5 }
 0x379   :  { %v1906_v39 = vpop.permute.xlu1 %1905  ;;  %v1947_v48 = vpop.permute.xlu0 %1946 }
 0x37a   :  { %v1921_v36 = vsel %vm7411_vm12, %v1906_v39, %v1908_v44  ;;  %v6478_v39 = vld [vmem:[%s6984_s3 + $0x20] sm:$0xff]   ;;  %vm7421_vm12 = vcmask 867328  }
 0x37b   :  { %v1936_v22 = vmax.f32 %v1897_v14, %v1921_v36 }
 0x37d   :  { %v1949_v37 = vpop.permute.xlu1 %1948  ;;  %v1951_v50 = vpop.permute.xlu0 %1950 }
 0x37e   :  { %v1961_v24 = vsel %vm7408_vm8, %v1947_v48, %v1949_v37  ;;  %v1962_v18 = vsel %vm7410_vm10, %v1949_v37, %v1951_v50  ;;  %v6485_v37 = vld [vmem:[%s6984_s3 + $0xa8] sm:$0xff]   ;;  %vm7419_vm8 = vmmov %vm7415_vm1  ;;  %vm2029_vm10 = vcmask 1012736  }
 0x37f   :  { %v1976_v16 = vmax.f32 %v1937_v29, %v1961_v24  ;;  %v1977_v42 = vmax.f32 %v1938_v11, %v1962_v18  ;;  %v6521_v24 = vld [vmem:[%s6984_s3 + $0x10] sm:$0xff]   ;;  %v6526_v29 = vld [vmem:[%s6984_s3 + $0x98] sm:$0xff]  }
 0x381   :  { %v6399_v59 = vpop.permute.xlu1 %1874  ;;  %v1945_v28 = vpop.permute.xlu0 %1944 }
 0x382   :  { %v1885_v49 = vsel %vm132_vm0, %v1873_v45, %v6399_v59  ;;  %v1960_v1 = vsel %vm7412_vm13, %v1945_v28, %v1947_v48  ;;  %v6515_v28 = vld [vmem:[%s6984_s3 + $0x50] sm:$0xff]   ;;  %vm7422_vm13 = vcmask 687104  }
 0x383   :  { %v1900_v2 = vmax.f32 %v6286_v12, %v1885_v49  ;;  %v1975_v20 = vmax.f32 %v1936_v22, %v1960_v1  ;;  %v6449_v12 = vld [vmem:[%s6984_s3 + $0xb0] sm:$0xff]  }
 0x384   :  { %3953 = vmatpush3.bf16.msra.mxu1 %v6449_v12 }
 0x385   :  { %v1986_v21 = vpop.permute.xlu1 %1985  ;;  %v1988_v56 = vpop.permute.xlu0 %1987  ;;  %3954 = vmatprep.subr.bf16.mxu1 %v4376_v43 }
 0x386   :  { %v2000_v58 = vsel %vm333_vm3, %v1986_v21, %v1988_v56 }
 0x387   :  { %v2015_v52 = vmax.f32 %v1976_v16, %v2000_v58  ;;  %v6544_v16 = vld [vmem:[%s6984_s3 + $0x8] sm:$0xff]  }
 0x388   :  { %3955 = vmatpush3.bf16.msra.mxu1 %v6485_v37 }
 0x389   :  { %2023 = vst [vmem:[#allocation3 + $0x8] sm:$0x3f] %v2015_v52  ;;  %v1990_v41 = vpop.permute.xlu1 %1989  ;;  %v6410_v19 = vpop.permute.xlu0 %1913  ;;  %3956 = vmatprep.subr.bf16.mxu1 %v4376_v43 }
 0x38a   :  { %v2001_v0 = vsel %vm333_vm3, %v1988_v56, %v1990_v41  ;;  %v1924_v55 = vsel %vm7413_vm15, %v1912_v51, %v6410_v19  ;;  %v6473_v51 = vld [vmem:[%s6984_s3 + $0x60] sm:$0xff]   ;;  %v6560_v56 = vld [vmem:[%s6984_s3 + $0x88] sm:$0xff]   ;;  %vm7423_vm15 = vmmov %vm7421_vm12 }
 0x38b   :  { %v2016_v7 = vmax.f32 %v1977_v42, %v2001_v0  ;;  %v1939_v54 = vmax.f32 %v1900_v2, %v1924_v55  ;;  %3849 = vmatprep.subr.bf16.mxu0 %v6473_v51 }
 0x38c   :  { %3850 = vmatpush3.bf16.msra.mxu0 %v6478_v39  ;;  %3957 = vmatpush3.bf16.msra.mxu1 %v6505_v30 }
 0x38d   :  { %2024 = vst [vmem:[#allocation3 + $0x10] sm:$0x3f] %v2016_v7  ;;  %v1984_v33 = vpop.permute.xlu1 %1983  ;;  %v6434_v10 = vpop.permute.xlu0 %1952  ;;  %3958 = vmatprep.subr.bf16.mxu1 %v4376_v43 }
 0x38e   :  { %v1999_v17 = vsel %vm333_vm3, %v1984_v33, %v1986_v21  ;;  %v1963_v32 = vsel %vm7414_vm5, %v1951_v50, %v6434_v10  ;;  %v6491_v50 = vld [vmem:[%s6984_s3 + $0x58] sm:$0xff]   ;;  %v6549_v21 = vld [vmem:[%s6984_s3 + $0x90] sm:$0xff]   ;;  %vm7424_vm5 = vmmov %vm7421_vm12 }
 0x38f   :  { %v2014_v8 = vmax.f32 %v1975_v20, %v1999_v17  ;;  %v1978_v25 = vmax.f32 %v1939_v54, %v1963_v32  ;;  %3851 = vmatprep.subr.bf16.mxu0 %v6491_v50 }
 0x390   :  { %v6464_v44 = vld [vmem:[#allocation3 + $0x8] sm:$0x3f]  ;;  %3852 = vmatpush3.bf16.msra.mxu0 %v6498_v15  ;;  %3959 = vmatpush3.bf16.msra.mxu1 %v6526_v29 }
 0x391   :  { %2022 = vst [vmem:[#allocation3] sm:$0x3f] %v2014_v8  ;;  %v6459_v47 = vpop.permute.xlu1 %1991  ;;  %3853 = vmatprep.subr.bf16.mxu0 %v6515_v28  ;;  %3960 = vmatprep.subr.bf16.mxu1 %v4376_v43 }
 0x392   :  { %v2002_v45 = vsel %vm333_vm3, %v1990_v41, %v6459_v47 }
 0x393   :  { %v2017_v23 = vmax.f32 %v1978_v25, %v2002_v45 }
 0x394   :  { %v6468_v53 = vld [vmem:[#allocation3 + $0x10] sm:$0x3f]  ;;  %3854 = vmatpush3.bf16.msra.mxu0 %v6521_v24  ;;  %3961 = vmatpush3.bf16.msra.mxu1 %v6549_v21 }
 0x395   :  { %2025 = vst [vmem:[#allocation3 + $0x18] sm:$0x3f] %v2017_v23  ;;  %v4135_v48 = vpack.i.bf16 %v6468_v53, %v6464_v44  ;;  %3855 = vmatprep.subr.bf16.mxu0 %v6538_v6  ;;  %3962 = vmatprep.subr.bf16.mxu1 %v4376_v43 }
 0x397   :  { %4136 = vrot.lane.b32.xlu0 %v4135_v48, %s4353_s23 }
 0x398   :  { %v6509_v4 = vld [vmem:[#allocation3] sm:$0x3f]  ;;  %3856 = vmatpush3.bf16.msra.mxu0 %v6544_v16  ;;  %3963 = vmatpush3.bf16.msra.mxu1 %v6560_v56 }
 0x399   :  { %3872 = vmatprep.subr.bf16.mxu0 %v6367_v13  ;;  %3968 = vmatprep.subr.bf16.mxu1 %v4376_v43 }
 0x39b   :  { %4146 = vrot.lane.b32.xlu0 %v4135_v48, %s4358_s28 }
 0x39c   :  { %v2037_v60 = vld [vmem:[#allocation3 + $0x18] sm:$0x3f] }
 0x39d   :  { %v4140_v61 = vpack.i.bf16 %v2037_v60, %v6509_v4 }
 0x39f   :  { %4156 = vrot.lane.b32.xlu0 %v4135_v48, %s4363_s7  ;;  %4141 = vrot.lane.b32.xlu1 %v4140_v61, %s4353_s23 }
 0x3a3   :  { %4161 = vrot.lane.b32.xlu0 %v4135_v48, %s4369_s14  ;;  %4151 = vrot.lane.b32.xlu1 %v4140_v61, %s4358_s28 }
 0x3a6   :  { %v1877_v38 = vpop.permute.xlu0 %1876 }
 0x3a7   :  { %2121 = vrot.lane.b32.xlu0 %v2037_v60, %s4363_s7  ;;  %2115 = vrot.lane.b32.xlu1 %v6509_v4, %s4363_s7  ;;  %v1886_v14 = vsel %vm132_vm0, %v6399_v59, %v1877_v38 }
 0x3a8   :  { %v1901_v1 = vmax.f32 %v6311_v31, %v1886_v14 }
 0x3ab   :  { %v1879_v18 = vpop.permute.xlu1 %1878  ;;  %2149 = vrot.lane.b32.xlu1 %v6509_v4, %s4369_s14  ;;  %v1881_v58 = vpop.permute.xlu0 %1880 }
 0x3ac   :  { %v1887_v42 = vsel %vm132_vm0, %v1877_v38, %v1879_v18  ;;  %v1888_v55 = vsel %vm132_vm0, %v1879_v18, %v1881_v58  ;;  %v1904_v17 = vmax.f32 %v6338_v46, %v1881_v58 }
 0x3ad   :  { %v1902_v0 = vmax.f32 %v6334_v62, %v1887_v42  ;;  %v1903_v32 = vmax.f32 %v6340_v5, %v1888_v55 }
 0x3af   :  { %v1916_v11 = vpop.permute.xlu1 %1915  ;;  %2155 = vrot.lane.b32.xlu1 %v2037_v60, %s4369_s14  ;;  %v1918_v52 = vpop.permute.xlu0 %1917 }
 0x3b0   :  { %v1925_v41 = vsel %vm7415_vm1, %v6410_v19, %v1916_v11  ;;  %v1926_v49 = vsel %vm7416_vm4, %v1916_v11, %v1918_v52  ;;  %vm7425_vm1 = vmmov %vm7422_vm13 }
 0x3b1   :  { %v1940_v20 = vmax.f32 %v1901_v1, %v1925_v41  ;;  %v1941_v33 = vmax.f32 %v1902_v0, %v1926_v49  ;;  %vm7426_vm4 = vmmov %vm7425_vm1 }
 0x3b3   :  { %v1920_v36 = vpop.permute.xlu1 %1919  ;;  %v1955_v13 = vpop.permute.xlu0 %1954 }
 0x3b4   :  { %v1964_v2 = vsel %vm7417_vm6, %v6434_v10, %v1955_v13  ;;  %v1927_v19 = vsel %vm7419_vm8, %v1918_v52, %v1920_v36  ;;  %v1943_v25 = vmax.f32 %v1904_v17, %v1920_v36  ;;  %vm7427_vm6 = vmmov %vm7424_vm5 }
 0x3b5   :  { %v1979_v31 = vmax.f32 %v1940_v20, %v1964_v2  ;;  %v1942_v48 = vmax.f32 %v1903_v32, %v1927_v19  ;;  %vm7429_vm8 = vmmov %vm7425_vm1 }
 0x3b7   :  { %v1957_v22 = vpop.permute.xlu1 %1956  ;;  %v1959_v7 = vpop.permute.xlu0 %1958 }
 0x3b8   :  { %v1965_v59 = vsel %vm7418_vm7, %v1955_v13, %v1957_v22  ;;  %v1966_v45 = vsel %vm7420_vm9, %v1957_v22, %v1959_v7  ;;  %v1982_v46 = vmax.f32 %v1943_v25, %v1959_v7  ;;  %vm7428_vm7 = vmmov %vm7424_vm5 }
 0x3b9   :  { %v1980_v54 = vmax.f32 %v1941_v33, %v1965_v59  ;;  %v1981_v38 = vmax.f32 %v1942_v48, %v1966_v45  ;;  %vm7430_vm9 = vmmov %vm7425_vm1 }
 0x3bb   :  { %v1994_v62 = vpop.permute.xlu1 %1993  ;;  %v1996_v8 = vpop.permute.xlu0 %1995 }
 0x3bc   :  { %v2003_v10 = vsel %vm333_vm3, %v6459_v47, %v1994_v62  ;;  %v2004_v23 = vsel %vm333_vm3, %v1994_v62, %v1996_v8 }
 0x3bd   :  { %v2018_v60 = vmax.f32 %v1979_v31, %v2003_v10  ;;  %v2019_v61 = vmax.f32 %v1980_v54, %v2004_v23 }
 0x3bf   :  { %2026 = vst [vmem:[#allocation3 + $0x20] sm:$0x3f] %v2018_v60  ;;  %2027 = vst [vmem:[#allocation3 + $0x28] sm:$0x3f] %v2019_v61  ;;  %v1998_v5 = vpop.permute.xlu1 %1997 }
 0x3c0   :  { %v2005_v18 = vsel %vm333_vm3, %v1996_v8, %v1998_v5  ;;  %v2021_v58 = vmax.f32 %v1982_v46, %v1998_v5 }
 0x3c1   :  { %v2020_v11 = vmax.f32 %v1981_v38, %v2005_v18 }
 0x3c2   :  { %2030 = vst.msk [vmem:[#allocation3 + $0x38] sm:$0x3f] %vm2029_vm10, %v2021_v58  ;;  %vm7431_vm10 = vmmov %vm7424_vm5 }
 0x3c3   :  { %2028 = vst [vmem:[#allocation3 + $0x30] sm:$0x3f] %v2020_v11 }
 0x3c6   :  { %v6593_v52 = vld [vmem:[#allocation3 + $0x20] sm:$0x3f]  ;;  %v6596_v13 = vld [vmem:[#allocation3 + $0x28] sm:$0x3f] }
 0x3c9   :  { %v2038_v47 = vld [vmem:[#allocation3 + $0x38] sm:$0x3f] }
 0x3ca   :  { %v4170_v36 = vpack.i.bf16 %v2038_v47, %v6593_v52  ;;  %v6598_v14 = vld [vmem:[#allocation3 + $0x30] sm:$0x3f] }
 0x3cb   :  { %v4165_v42 = vpack.i.bf16 %v6598_v14, %v6596_v13 }
 0x3cc   :  { %4171 = vrot.lane.b32.xlu1 %v4170_v36, %s4353_s23 }
 0x3cd   :  { %4166 = vrot.lane.b32.xlu0 %v4165_v42, %s4353_s23 }
 0x3d0   :  { %2089 = vrot.lane.b32.xlu1 %v6593_v52, %s4358_s28 }
 0x3d1   :  { %4176 = vrot.lane.b32.xlu0 %v4165_v42, %s4358_s28 }
 0x3d4   :  { %2123 = vrot.lane.b32.xlu1 %v6593_v52, %s4363_s7 }
 0x3d5   :  { %4181 = vrot.lane.b32.xlu0 %v4165_v42, %s4363_s7 }
 0x3d8   :  { %2095 = vrot.lane.b32.xlu1 %v2038_v47, %s4358_s28 }
 0x3d9   :  { %4186 = vrot.lane.b32.xlu0 %v4165_v42, %s4369_s14 }
 0x3dc   :  { %2129 = vrot.lane.b32.xlu1 %v2038_v47, %s4363_s7  ;;  %s4378_s7 = smov 116  }
 0x3dd   :  { %2157 = vrot.lane.b32.xlu0 %v6593_v52, %s4369_s14 }
 0x3e1   :  { %2163 = vrot.lane.b32.xlu0 %v2038_v47, %s4369_s14  ;;  %s4379_s14 = smov 115  }
 0x409   :  { %v4137_v41 = vpop.permute.xlu0 %4136 }
 0x40a   :  { %v4139_v49 = vunpack.i.h.bf16 %v4137_v41  ;;  %v4138_v1 = vunpack.i.l.bf16 %v4137_v41 }
 0x40c   :  { %v2064_v55 = vsel %vm7421_vm12, %v4138_v1, %v4139_v49  ;;  %vm7432_vm12 = vmmov %vm7425_vm1 }
 0x40d   :  { %v4147_v0 = vpop.permute.xlu0 %4146  ;;  %v2076_v32 = vmax.f32 %v6464_v44, %v2064_v55 }
 0x40e   :  { %v4149_v22 = vunpack.i.h.bf16 %v4147_v0  ;;  %v4148_v7 = vunpack.i.l.bf16 %v4147_v0 }
 0x410   :  { %v2098_v19 = vsel %vm7422_vm13, %v4148_v7, %v4149_v22  ;;  %vm7434_vm13 = vmmov %vm7424_vm5 }
 0x411   :  { %v4142_v2 = vpop.permute.xlu1 %4141  ;;  %v4157_v59 = vpop.permute.xlu0 %4156  ;;  %v2110_v45 = vmax.f32 %v2076_v32, %v2098_v19 }
 0x412   :  { %v4143_v20 = vunpack.i.l.bf16 %v4142_v2  ;;  %v4159_v33 = vunpack.i.h.bf16 %v4157_v59  ;;  %v4158_v17 = vunpack.i.l.bf16 %v4157_v59  ;;  %v4144_v31 = vunpack.i.h.bf16 %v4142_v2 }
 0x414   :  { %v2063_v54 = vsel %vm7423_vm15, %v4143_v20, %v4138_v1  ;;  %v2132_v62 = vsel %vm1070_vm14, %v4158_v17, %v4159_v33  ;;  %v2065_v38 = vsel %vm7424_vm5, %v4139_v49, %v4144_v31  ;;  %vm7435_vm15 = vcmask 859136  }
 0x415   :  { %v4152_v8 = vpop.permute.xlu1 %4151  ;;  %v4162_v25 = vpop.permute.xlu0 %4161  ;;  %v2075_v61 = vmax.f32 %v6509_v4, %v2063_v54  ;;  %v2144_v46 = vmax.f32 %v2110_v45, %v2132_v62  ;;  %v2077_v41 = vmax.f32 %v6468_v53, %v2065_v38  ;;  %vm2622_vm5 = vcmask 949248  }
 0x416   :  { %v4154_v10 = vunpack.i.h.bf16 %v4152_v8  ;;  %v4153_v23 = vunpack.i.l.bf16 %v4152_v8  ;;  %v4164_v48 = vunpack.i.h.bf16 %v4162_v25  ;;  %v4163_v60 = vunpack.i.l.bf16 %v4162_v25 }
 0x418   :  { %v2097_v5 = vsel %vm7425_vm1, %v4153_v23, %v4148_v7  ;;  %v2166_v44 = vsel %vm1405_vm11, %v4163_v60, %v4164_v48  ;;  %v2099_v36 = vsel %vm7426_vm4, %v4149_v22, %v4154_v10  ;;  %vm2637_vm1 = vcmask 941056  }
 0x419   :  { %v2116_v18 = vpop.permute.xlu1 %2115  ;;  %v2109_v58 = vmax.f32 %v2075_v61, %v2097_v5  ;;  %v2178_v11 = vmax.f32 %v2144_v46, %v2166_v44  ;;  %v2122_v42 = vpop.permute.xlu0 %2121  ;;  %v2111_v4 = vmax.f32 %v2077_v41, %v2099_v36  ;;  %v2672_v41 = vld [vmem:[#allocation4 + $0x8] sm:$0x7]  ;;  %vm7436_vm4 = vcmask 1031168  }
 0x41a   :  { %v2131_v47 = vsel %vm1070_vm14, %v2116_v18, %v4158_v17  ;;  %v2133_v49 = vsel %vm1070_vm14, %v4159_v33, %v2122_v42  ;;  %v6679_v42 = vld [vmem:[#allocation5] sm:$0xff]  ;;  %2677 = vrot.lane.b32.xlu0 %v2672_v41, %s4355_s25 }
 0x41b   :  { %v2234_v1 = vpack.c.bf16 %v2178_v11, %v2178_v11  ;;  %v2143_v0 = vmax.f32 %v2109_v58, %v2131_v47  ;;  %v2145_v59 = vmax.f32 %v2111_v4, %v2133_v49  ;;  %v2612_v4 = vld [vmem:[#allocation4 + $0x8] sm:$0x7] }
 0x41c   :  { %v2582_v49 = vld [vmem:[#allocation4 + $0x8] sm:$0x7] }
 0x41d   :  { %v2150_v55 = vpop.permute.xlu1 %2149  ;;  %2412 = vmatprep.mubr.bf16.mxu0 %v2234_v1  ;;  %v2642_v1 = vld [vmem:[#allocation4 + $0x8] sm:$0x7] }
 0x41e   :  { %v2165_v7 = vsel %vm1405_vm11, %v2150_v55, %v4163_v60  ;;  %2647 = vrot.lane.b32.xlu0 %v2642_v1, %s4353_s23  ;;  %v2627_v55 = vld [vmem:[#allocation4 + $0x8] sm:$0x7] }
 0x41f   :  { %v2177_v2 = vmax.f32 %v2143_v0, %v2165_v7  ;;  %v2657_v0 = vld [vmem:[#allocation4 + $0x8] sm:$0x7] }
 0x420   :  { %v2597_v7 = vld [vmem:[#allocation4 + $0x8] sm:$0x7] }
 0x421   :  { %v2233_v20 = vpack.c.bf16 %v2177_v2, %v2177_v2  ;;  %v2156_v19 = vpop.permute.xlu1 %2155  ;;  %v2566_v2 = vld [vmem:[#allocation4 + $0x8] sm:$0x7] }
 0x422   :  { %v2167_v17 = vsel %vm1405_vm11, %v4164_v48, %v2156_v19  ;;  %2662 = vrot.lane.b32.xlu0 %v2657_v0, %s4354_s24 }
 0x423   :  { %v2179_v32 = vmax.f32 %v2145_v59, %v2167_v17  ;;  %2413 = vmatmul.mubr.bf16.vlgmr.msra.gmra.mxu0 %v2233_v20 }
 0x424   :  { %3873 = vmatpush3.bf16.msra.mxu0 %v6372_v63 }
 0x425   :  { %v2235_v53 = vpack.c.bf16 %v2179_v32, %v2179_v32  ;;  %3874 = vmatprep.subr.bf16.mxu0 %v6377_v34 }
 0x426   :  { %2617 = vrot.lane.b32.xlu0 %v2612_v4, %s4378_s7 }
 0x427   :  { %3965 = vmatmul.mubr.bf16.vlgmr.msra.gmra.mxu1 %v2235_v53 }
 0x428   :  { %3875 = vmatpush3.bf16.msra.mxu0 %v6390_v27  ;;  %3969 = vmatpush3.bf16.msra.mxu1 %v6383_v3 }
 0x429   :  { %3876 = vmatprep.subr.bf16.mxu0 %v6421_v26  ;;  %3970 = vmatprep.subr.bf16.mxu1 %v4376_v43 }
 0x42a   :  { %3984 = vmatprep.mubr.msk.bf16.mxu1 %vm4377_vm2, %v4376_v43  ;;  %2632 = vrot.lane.b32.xlu0 %v2627_v55, %s4379_s14 }
 0x42c   :  { %3877 = vmatpush3.bf16.msra.mxu0 %v6426_v40  ;;  %3971 = vmatpush3.bf16.msra.mxu1 %v6431_v57 }
 0x42d   :  { %3878 = vmatprep.subr.bf16.mxu0 %v6444_v35  ;;  %3972 = vmatprep.subr.bf16.mxu1 %v4376_v43 }
 0x42e   :  { %2587 = vrot.lane.b32.xlu0 %v2582_v49, %s4350_s20 }
 0x430   :  { %3879 = vmatpush3.bf16.msra.mxu0 %v6456_v9  ;;  %3973 = vmatpush3.bf16.msra.mxu1 %v6449_v12 }
 0x431   :  { %3880 = vmatprep.subr.bf16.mxu0 %v6473_v51  ;;  %3974 = vmatprep.subr.bf16.mxu1 %v4376_v43 }
 0x432   :  { %2602 = vrot.lane.b32.xlu0 %v2597_v7, %s4380_s0 }
 0x434   :  { %3881 = vmatpush3.bf16.msra.mxu0 %v6478_v39  ;;  %3975 = vmatpush3.bf16.msra.mxu1 %v6485_v37 }
 0x435   :  { %3882 = vmatprep.subr.bf16.mxu0 %v6491_v50  ;;  %3976 = vmatprep.subr.bf16.mxu1 %v4376_v43 }
 0x436   :  { %2571 = vrot.lane.b32.xlu0 %v2566_v2, %s4349_s19 }
 0x438   :  { %3883 = vmatpush3.bf16.msra.mxu0 %v6498_v15  ;;  %3977 = vmatpush3.bf16.msra.mxu1 %v6505_v30 }
 0x439   :  { %3884 = vmatprep.subr.bf16.mxu0 %v6515_v28  ;;  %3978 = vmatprep.subr.bf16.mxu1 %v4376_v43 }
 0x43c   :  { %3885 = vmatpush3.bf16.msra.mxu0 %v6521_v24  ;;  %3979 = vmatpush3.bf16.msra.mxu1 %v6526_v29 }
 0x43d   :  { %3886 = vmatprep.subr.bf16.mxu0 %v6538_v6  ;;  %3980 = vmatprep.subr.bf16.mxu1 %v4376_v43 }
 0x43e   :  { %v4172_v63 = vpop.permute.xlu1 %4171 }
 0x43f   :  { %v4167_v34 = vpop.permute.xlu0 %4166  ;;  %v4173_v57 = vunpack.i.l.bf16 %v4172_v63  ;;  %v4174_v39 = vunpack.i.h.bf16 %v4172_v63 }
 0x440   :  { %3887 = vmatpush3.bf16.msra.mxu0 %v6544_v16  ;;  %3981 = vmatpush3.bf16.msra.mxu1 %v6549_v21  ;;  %v4169_v3 = vunpack.i.h.bf16 %v4167_v34  ;;  %v4168_v27 = vunpack.i.l.bf16 %v4167_v34 }
 0x441   :  { %3982 = vmatprep.subr.bf16.mxu1 %v4376_v43 }
 0x442   :  { %v2090_v26 = vpop.permute.xlu1 %2089  ;;  %v2067_v9 = vsel %vm7427_vm6, %v4168_v27, %v4169_v3  ;;  %v2066_v50 = vsel %vm7428_vm7, %v4173_v57, %v4168_v27  ;;  %v2068_v33 = vsel %vm7431_vm10, %v4169_v3, %v4174_v39  ;;  %vm2607_vm6 = vcmask 957440  }
 0x443   :  { %v4177_v40 = vpop.permute.xlu0 %4176  ;;  %v2079_v24 = vmax.f32 %v6596_v13, %v2067_v9  ;;  %v2078_v21 = vmax.f32 %v6593_v52, %v2066_v50  ;;  %v2080_v23 = vmax.f32 %v6598_v14, %v2068_v33  ;;  %vm3028_vm7 = vcmask 122880  }
 0x444   :  { %v4179_v35 = vunpack.i.h.bf16 %v4177_v40  ;;  %v4178_v12 = vunpack.i.l.bf16 %v4177_v40  ;;  %3983 = vmatpush3.bf16.msra.mxu1 %v6560_v56  ;;  %vm3056_vm10 = vcmask 516480  }
 0x445   :  { %3988 = vmatprep.subr.bf16.mxu1 %v4376_v43 }
 0x446   :  { %v2124_v51 = vpop.permute.xlu1 %2123  ;;  %v2101_v15 = vsel %vm7429_vm8, %v4178_v12, %v4179_v35  ;;  %v2100_v29 = vsel %vm7430_vm9, %v2090_v26, %v4178_v12  ;;  %vm3043_vm8 = vcmask 254080   ;;  %vm3049_vm9 = vcmask 385280  }
 0x447   :  { %v4182_v37 = vpop.permute.xlu0 %4181  ;;  %v2113_v56 = vmax.f32 %v2079_v24, %v2101_v15  ;;  %v2112_v8 = vmax.f32 %v2078_v21, %v2100_v29 }
 0x448   :  { %v4184_v30 = vunpack.i.h.bf16 %v4182_v37  ;;  %v4183_v28 = vunpack.i.l.bf16 %v4182_v37 }
 0x44a   :  { %v2135_v6 = vsel %vm1070_vm14, %v4183_v28, %v4184_v30  ;;  %v2096_v16 = vpop.permute.xlu1 %2095  ;;  %v2134_v62 = vsel %vm1070_vm14, %v2124_v51, %v4183_v28  ;;  %v3789_v28 = vcombine.high %v6679_v42, %v6679_v42 }
 0x44b   :  { %v4187_v22 = vpop.permute.xlu0 %4186  ;;  %v2147_v25 = vmax.f32 %v2113_v56, %v2135_v6  ;;  %v2102_v45 = vsel %vm7432_vm12, %v4179_v35, %v2096_v16  ;;  %v2146_v60 = vmax.f32 %v2112_v8, %v2134_v62  ;;  %v2704_v62 = vld [vmem:[%s6983_s2] sm:$0xff]  ;;  %v2705_v8 = vld [vmem:[%s6983_s2 + $0x8] sm:$0xff]  ;;  %vm3069_vm12 = vcmask 647680  }
 0x44c   :  { %v4189_v31 = vunpack.i.h.bf16 %v4187_v22  ;;  %v4188_v54 = vunpack.i.l.bf16 %v4187_v22  ;;  %v2114_v38 = vmax.f32 %v2080_v23, %v2102_v45  ;;  %2803 = vmatprep.subr.bf16.mxu0 %v3789_v28 }
 0x44e   :  { %v2130_v13 = vpop.permute.xlu1 %2129  ;;  %v2169_v10 = vsel %vm1405_vm11, %v4188_v54, %v4189_v31 }
 0x44f   :  { %v2158_v48 = vpop.permute.xlu0 %2157  ;;  %v2181_v52 = vmax.f32 %v2147_v25, %v2169_v10  ;;  %v2136_v61 = vsel %vm1070_vm14, %v4184_v30, %v2130_v13  ;;  %v3788_v30 = vcombine.low %v6679_v42, %v6679_v42  ;;  %v4381_v25 = vmov 33  }
 0x450   :  { %v2168_v46 = vsel %vm1405_vm11, %v2158_v48, %v4188_v54  ;;  %v2148_v18 = vmax.f32 %v2114_v38, %v2136_v61  ;;  %4190 = vset.pattern.permute.xlu1 %v4381_v25  ;;  %4191 = vset.pattern.permute.xlu0 %v4381_v25  ;;  %vm7433_vm14 = vcmask 850944  }
 0x451   :  { %v2180_v5 = vmax.f32 %v2146_v60, %v2168_v46  ;;  %v2463_v44 = vpack.c.bf16 %v2181_v52, %v2181_v52  ;;  %2714 = vperm.xlu0 %4191, %v2705_v8   ;;  %v4265_v8 = vld [vmem:[%s6984_s3] sm:$0xff]  }
 0x453   :  { %v2462_v58 = vpack.c.bf16 %v2180_v5, %v2180_v5  ;;  %v2164_v11 = vpop.permute.xlu0 %2163  ;;  %2497 = vmatprep.mubr.bf16.mxu0 %v2463_v44 }
 0x454   :  { %v2170_v47 = vsel %vm1405_vm11, %v4189_v31, %v2164_v11  ;;  %vm2575_vm11 = vcmask 1043456  }
 0x455   :  { %v2182_v36 = vmax.f32 %v2148_v18, %v2170_v47  ;;  %2498 = vmatmul.mubr.bf16.vlgmr.msra.gmra.mxu0 %v2462_v58 }
 0x456   :  { %2835 = vmatprep.mubr.bf16.mxu0 %v6679_v42  ;;  %2804 = vmatpush1.bf16.msra.mxu0 %v3788_v30 }
 0x457   :  { %v2464_v14 = vpack.c.bf16 %v2182_v36, %v2182_v36  ;;  %2805 = vmatprep.subr.bf16.mxu0 %v3789_v28 }
 0x459   :  { %3985 = vmatmul.mubr.bf16.vlgmr.msra.gmra.mxu1 %v2464_v14 }
 0x45a   :  { %3998 = vmatprep.mubr.msk.bf16.mxu1 %vm4377_vm2, %v4376_v43  ;;  %2806 = vmatpush1.bf16.msra.mxu0 %v3788_v30 }
 0x45b   :  { %2807 = vmatprep.subr.bf16.mxu0 %v3789_v28 }
 0x45e   :  { %2808 = vmatpush1.bf16.msra.mxu0 %v3788_v30 }
 0x48c   :  { %v2678_v45 = vpop.permute.xlu0 %2677 }
 0x48d   :  { %v2680_v23 = vrot.slane %v2678_v45, 4  ;;  %v2706_v45 = vld [vmem:[%s6982_s1 + $0x8] sm:$0x3] }
 0x490   :  { %v2648_v13 = vpop.permute.xlu0 %2647 }
 0x491   :  { %v2650_v46 = vrot.slane %v2648_v13, 4 }
 0x494   :  { %v2663_v10 = vpop.permute.xlu0 %2662 }
 0x495   :  { %v2665_v11 = vrot.slane %v2663_v10, 4 }
 0x498   :  { %v2618_v60 = vpop.permute.xlu0 %2617 }
 0x499   :  { %v2620_v1 = vrot.slane %v2618_v60, 4 }
 0x49c   :  { %v2633_v18 = vpop.permute.xlu0 %2632 }
 0x4a0   :  { %v2588_v49 = vpop.permute.xlu0 %2587 }
 0x4e3   :  { %v3857_v59 = vpop.f32.mrf.mxu0 }
 0x4e5   :  { %v3858_v20 = vpop.f32.mrf.mxu0 }
 0x4e6   :  { %v3859_v19 = vadd.f32 %v3858_v20, %v3857_v59 }
 0x4e7   :  { %v3860_v17 = vpop.f32.mrf.mxu0  ;;  %v2454_v32 = vpop.f32.mrf.mxu1 }
 0x4e8   :  { %v2455_v53 = vadd.f32 %v3859_v19, %v2454_v32  ;;  %v2635_v19 = vrot.slane %v2633_v18, 4 }
 0x4e9   :  { %v3861_v63 = vpop.f32.mrf.mxu0  ;;  %v3966_v34 = vpop.f32.mrf.mxu1 }
 0x4ea   :  { %v2460_v3 = vpack.c.bf16 %v2455_v53, %v2455_v53  ;;  %v2603_v63 = vpop.permute.xlu0 %2602 }
 0x4eb   :  { %v2457_v27 = vpop.f32.mrf.mxu1 }
 0x4ec   :  { %2461 = vst [vmem:[#allocation4] sm:$0x7] %v2460_v3  ;;  %v2590_v3 = vrot.slane %v2588_v49, 4  ;;  %v6758_v49 = vld [vmem:[%s6984_s3 + $0xe0] sm:$0xff]  }
 0x4ed   :  { %v3967_v26 = vpop.f32.mrf.mxu1 }
 0x515   :  { %v3888_v40 = vpop.f32.mrf.mxu0 }
 0x517   :  { %v3889_v57 = vpop.f32.mrf.mxu0 }
 0x518   :  { %v3890_v35 = vadd.f32 %v3889_v57, %v3888_v40 }
 0x519   :  { %v3891_v12 = vpop.f32.mrf.mxu0  ;;  %v2539_v9 = vpop.f32.mrf.mxu1 }
 0x51a   :  { %v2540_v51 = vadd.f32 %v3890_v35, %v2539_v9 }
 0x51b   :  { %v3892_v39 = vpop.f32.mrf.mxu0  ;;  %v3986_v37 = vpop.f32.mrf.mxu1 }
 0x51c   :  { %v2545_v50 = vpack.c.bf16 %v2540_v51, %v2540_v51  ;;  %v2605_v51 = vrot.slane %v2603_v63, 4 }
 0x51d   :  { %v2542_v15 = vpop.f32.mrf.mxu1 }
 0x51e   :  { %2546 = vst [vmem:[#allocation4 + $0x4] sm:$0x7] %v2545_v50  ;;  %v2572_v50 = vpop.permute.xlu0 %2571 }
 0x51f   :  { %v3987_v24 = vpop.f32.mrf.mxu1  ;;  %v2574_v28 = vrot.slane %v2572_v50, 4 }
 0x525   :  { %v2563_v29 = vld [vmem:[#allocation4] sm:$0x77] }
 0x526   :  { %v2671_v6 = vld [vmem:[#allocation4] sm:$0x77]  ;;  %2564 = vst [vmem:[#allocation5] sm:$0x77] %v2563_v29 }
 0x527   :  { %2675 = vrot.lane.b32.xlu1 %v2671_v6, %s4355_s25  ;;  %v2641_v16 = vld [vmem:[#allocation4] sm:$0x77] }
 0x528   :  { %v2656_v21 = vld [vmem:[#allocation4] sm:$0x77] }
 0x529   :  { %v2611_v56 = vld [vmem:[#allocation4] sm:$0x77] }
 0x52a   :  { %v2626_v22 = vld [vmem:[#allocation4] sm:$0x77] }
 0x52b   :  { %2645 = vrot.lane.b32.xlu1 %v2641_v16, %s4353_s23  ;;  %v2581_v33 = vld [vmem:[#allocation4] sm:$0x77] }
 0x52c   :  { %v2596_v31 = vld [vmem:[#allocation4] sm:$0x77] }
 0x52d   :  { %v2565_v54 = vld [vmem:[#allocation4] sm:$0x77] }
 0x52f   :  { %2660 = vrot.lane.b32.xlu1 %v2656_v21, %s4354_s24 }
 0x533   :  { %2615 = vrot.lane.b32.xlu1 %v2611_v56, %s4378_s7 }
 0x537   :  { %2630 = vrot.lane.b32.xlu1 %v2626_v22, %s4379_s14 }
 0x53b   :  { %2585 = vrot.lane.b32.xlu1 %v2581_v33, %s4350_s20 }
 0x53f   :  { %2600 = vrot.lane.b32.xlu1 %v2596_v31, %s4380_s0 }
 0x543   :  { %2569 = vrot.lane.b32.xlu1 %v2565_v54, %s4349_s19 }
 0x547   :  { %2709 = vperm.xlu1 %4190, %v2704_v62  }
 0x599   :  { %v2676_v48 = vpop.permute.xlu1 %2675 }
 0x59a   :  { %v2679_v52 = vrot.slane %v2676_v48, 4 }
 0x59c   :  { %v2681_v61 = vsel %vm2575_vm11, %v2679_v52, %v2680_v23  ;;  %v7437_v23 = vld [vmem:[#allocation14_spill] sm:$0xff]  ;;  %v2715_v52 = vpop.permute.xlu0 %2714 }
 0x59d   :  { %v2683_v38 = vsel %vm7433_vm14, %v2676_v48, %v2681_v61  ;;  %v2646_v5 = vpop.permute.xlu1 %2645  ;;  %v2854_v48 = vrot.slane %v2706_v45, %v7437_v23  ;;  %vm3082_vm14 = vcmask 910080  }
 0x59e   :  { %2685 = vst [vmem:[#allocation5 + $0x28] sm:$0x77] %v2683_v38  ;;  %v2649_v44 = vrot.slane %v2646_v5, 4 }
 0x5a0   :  { %v2651_v58 = vsel %vm2575_vm11, %v2649_v44, %v2650_v46 }
 0x5a1   :  { %v2653_v47 = vsel %vm7434_vm13, %v2646_v5, %v2651_v58  ;;  %v2661_v36 = vpop.permute.xlu1 %2660  ;;  %vm3089_vm13 = vcmask 1041280  }
 0x5a2   :  { %2655 = vst [vmem:[#allocation5 + $0x70] sm:$0x77] %v2653_v47  ;;  %v2664_v14 = vrot.slane %v2661_v36, 4  ;;  %v7438_v47 = vld [vmem:[#allocation13_spill] sm:$0xff] }
 0x5a4   :  { %v2666_v41 = vsel %vm2575_vm11, %v2664_v14, %v2665_v11 }
 0x5a5   :  { %v2668_v0 = vsel %vm7435_vm15, %v2661_v36, %v2666_v41  ;;  %v2616_v4 = vpop.permute.xlu1 %2615  ;;  %v2696_v55 = vld [vmem:[#allocation5 + $0x28] sm:$0xff]  ;;  %v2858_v36 = vrot.slane %v2706_v45, %v7438_v47 }
 0x5a6   :  { %2670 = vst [vmem:[#allocation5 + $0x10] sm:$0x77] %v2668_v0  ;;  %v2619_v7 = vrot.slane %v2616_v4, 4  ;;  %v3782_v2 = vcombine.low %v2696_v55, %v6679_v42  ;;  %v3783_v59 = vcombine.high %v2696_v55, %v6679_v42  ;;  %v6752_v55 = vld [vmem:[%s6984_s3 + $0xe8] sm:$0xff]  }
 0x5a7   :  { %3989 = vmatpush3.bf16.msra.mxu1 %v6752_v55 }
 0x5a8   :  { %v2621_v20 = vsel %vm2575_vm11, %v2619_v7, %v2620_v1  ;;  %2809 = vmatprep.subr.bf16.mxu0 %v3783_v59  ;;  %3990 = vmatprep.subr.bf16.mxu1 %v4376_v43 }
 0x5a9   :  { %v2623_v17 = vsel %vm2622_vm5, %v2616_v4, %v2621_v20  ;;  %2810 = vmatpush1.bf16.msra.mxu0 %v3782_v2  ;;  %v2631_v32 = vpop.permute.xlu1 %2630  ;;  %v2694_v40 = vld [vmem:[#allocation5 + $0x70] sm:$0xff] }
 0x5aa   :  { %2625 = vst [vmem:[#allocation5 + $0x68] sm:$0x77] %v2623_v17  ;;  %v2634_v53 = vrot.slane %v2631_v32, 4 }
 0x5ab   :  { %3991 = vmatpush3.bf16.msra.mxu1 %v6758_v49 }
 0x5ac   :  { %v2636_v34 = vsel %vm2575_vm11, %v2634_v53, %v2635_v19  ;;  %3992 = vmatprep.subr.bf16.mxu1 %v4376_v43 }
 0x5ad   :  { %v2638_v27 = vsel %vm2637_vm1, %v2631_v32, %v2636_v34  ;;  %v2586_v26 = vpop.permute.xlu1 %2585  ;;  %v2695_v57 = vld [vmem:[#allocation5 + $0x10] sm:$0xff] }
 0x5ae   :  { %2640 = vst [vmem:[#allocation5 + $0x20] sm:$0x77] %v2638_v27  ;;  %v2589_v42 = vrot.slane %v2586_v26, 4  ;;  %v3780_v35 = vcombine.low %v2694_v40, %v2695_v57  ;;  %v3781_v12 = vcombine.high %v2694_v40, %v2695_v57 }
 0x5b0   :  { %v2591_v9 = vsel %vm2575_vm11, %v2589_v42, %v2590_v3  ;;  %2811 = vmatprep.subr.bf16.mxu0 %v3781_v12 }
 0x5b1   :  { %v2593_v39 = vsel %vm7436_vm4, %v2586_v26, %v2591_v9  ;;  %2812 = vmatpush1.bf16.msra.mxu0 %v3780_v35  ;;  %v2601_v37 = vpop.permute.xlu1 %2600  ;;  %v6767_v9 = vld [vmem:[%s6984_s3 + $0xd8] sm:$0xff]  }
 0x5b2   :  { %2595 = vst [vmem:[#allocation5 + $0x50] sm:$0x77] %v2593_v39  ;;  %v2604_v15 = vrot.slane %v2601_v37, 4  ;;  %3993 = vmatpush3.bf16.msra.mxu1 %v6767_v9 }
 0x5b3   :  { %3994 = vmatprep.subr.bf16.mxu1 %v4376_v43 }
 0x5b4   :  { %v2606_v30 = vsel %vm2575_vm11, %v2604_v15, %v2605_v51  ;;  %v6775_v15 = vld [vmem:[%s6984_s3 + $0xd0] sm:$0xff]  }
 0x5b5   :  { %v2608_v24 = vsel %vm2607_vm6, %v2601_v37, %v2606_v30  ;;  %v2570_v29 = vpop.permute.xlu1 %2569  ;;  %v4256_v6 = vld [vmem:[#allocation5 + $0x68] ss:$-72 sps:$4 sm:$0xff]   ;;  %v4258_v16 = vld [vmem:[#allocation5 + $0x6c] ss:$-72 sps:$4 sm:$0xff]  }
 0x5b6   :  { %2610 = vst [vmem:[#allocation5 + $0x60] sm:$0x77] %v2608_v24  ;;  %v2573_v21 = vrot.slane %v2570_v29, 4  ;;  %2813 = vmatprep.subr.bf16.mxu0 %v4258_v16  ;;  %3995 = vmatpush3.bf16.msra.mxu1 %v6775_v15 }
 0x5b7   :  { %2814 = vmatpush1.bf16.msra.mxu0 %v4256_v6  ;;  %3996 = vmatprep.subr.bf16.mxu1 %v4376_v43 }
 0x5b8   :  { %v2576_v56 = vsel %vm2575_vm11, %v2573_v21, %v2574_v28  ;;  %v6782_v21 = vld [vmem:[%s6984_s3 + $0xc8] sm:$0xff]   ;;  %vm3076_vm11 = vcmask 778880  }
 0x5b9   :  { %v2578_v22 = vsel %vm132_vm0, %v2570_v29, %v2576_v56  ;;  %vm7439_vm0 = vcmask 654336  }
 0x5ba   :  { %2580 = vst [vmem:[#allocation5 + $0x18] sm:$0x77] %v2578_v22  ;;  %3997 = vmatpush3.bf16.msra.mxu1 %v6782_v21 }
 0x5bb   :  { %4002 = vmatprep.subr.bf16.mxu1 %v4376_v43 }
 0x5bd   :  { %v4259_v33 = vld [vmem:[#allocation5 + $0x50] ss:$16 sps:$4 sm:$0xff]   ;;  %v4261_v31 = vld [vmem:[#allocation5 + $0x54] ss:$16 sps:$4 sm:$0xff]  }
 0x5be   :  { %2815 = vmatprep.subr.bf16.mxu0 %v4261_v31 }
 0x5bf   :  { %2816 = vmatpush1.bf16.msra.mxu0 %v4259_v33 }
 0x5c1   :  { %v4262_v54 = vld [vmem:[#allocation5] ss:$24 sps:$4 sm:$0xff]   ;;  %v4264_v62 = vld [vmem:[#allocation5 + $0x4] ss:$24 sps:$4 sm:$0xff]  }
 0x5c2   :  { %2817 = vmatprep.subr.bf16.mxu0 %v4264_v62  ;;  %v2710_v25 = vpop.permute.xlu1 %2709 }
 0x5c3   :  { %2818 = vmatpush1.bf16.msra.mxu0 %v4262_v54 }
 0x5c6   :  { %2836 = vmatmul.mubr.bf16.vlgmr.msra.gmra.mxu0 %v4265_v8 }
 0x686   :  { %v2837_v13 = vpop.f32.mrf.mxu0 }
 0x687   :  { %v2838_v10 = vadd.f32 %v2837_v13, %v2710_v25 }
 0x688   :  { %v2839_v60 = vpop.f32.mrf.mxu0 }
 0x689   :  { %v2846_v61 = vmax.f32 %v2838_v10, 0.0  ;;  %v2840_v18 = vadd.f32 %v2839_v60, %v2710_v25 }
 0x68a   :  { %v2841_v46 = vpop.f32.mrf.mxu0 }
 0x68b   :  { %v2861_v38 = vmul.f32 %v2854_v48, %v2846_v61  ;;  %v2842_v5 = vadd.f32 %v2841_v46, %v2715_v52  ;;  %v2847_v11 = vmax.f32 %v2840_v18, 0.0 }
 0x68c   :  { %v2843_v14 = vpop.f32.mrf.mxu0 }
 0x68d   :  { %v2848_v44 = vmax.f32 %v2842_v5, 0.0  ;;  %2891 = vrot.lane.b32.xlu0 %v2861_v38, %s4350_s20  ;;  %2883 = vrot.lane.b32.xlu1 %v2861_v38, %s4349_s19  ;;  %v2862_v41 = vmul.f32 %v2858_v36, %v2847_v11  ;;  %v2844_v1 = vadd.f32 %v2843_v14, %v2715_v52 }
 0x68f   :  { %v2863_v58 = vmul.f32 %v2854_v48, %v2848_v44  ;;  %v2849_v0 = vmax.f32 %v2844_v1, 0.0 }
 0x691   :  { %2899 = vrot.lane.b32.xlu0 %v2861_v38, %s4351_s21  ;;  %2885 = vrot.lane.b32.xlu1 %v2863_v58, %s4349_s19  ;;  %v2864_v4 = vmul.f32 %v2858_v36, %v2849_v0 }
 0x695   :  { %2907 = vrot.lane.b32.xlu0 %v2861_v38, %s4352_s22  ;;  %2893 = vrot.lane.b32.xlu1 %v2863_v58, %s4350_s20 }
 0x699   :  { %3150 = vrot.lane.b32.xlu0 %v2862_v41, %s4349_s19  ;;  %2901 = vrot.lane.b32.xlu1 %v2863_v58, %s4351_s21 }
 0x69d   :  { %3158 = vrot.lane.b32.xlu0 %v2862_v41, %s4350_s20  ;;  %2909 = vrot.lane.b32.xlu1 %v2863_v58, %s4352_s22 }
 0x6a1   :  { %3166 = vrot.lane.b32.xlu0 %v2862_v41, %s4351_s21  ;;  %3152 = vrot.lane.b32.xlu1 %v2864_v4, %s4349_s19 }
 0x6a5   :  { %3174 = vrot.lane.b32.xlu0 %v2862_v41, %s4352_s22  ;;  %3160 = vrot.lane.b32.xlu1 %v2864_v4, %s4350_s20 }
 0x6a9   :  { %3168 = vrot.lane.b32.xlu1 %v2864_v4, %s4351_s21 }
 0x6ad   :  { %3176 = vrot.lane.b32.xlu1 %v2864_v4, %s4352_s22 }
 0x6ff   :  { %v2892_v7 = vpop.permute.xlu0 %2891  ;;  %v2884_v2 = vpop.permute.xlu1 %2883 }
 0x700   :  { %v2889_v59 = vmax.f32 %v2861_v38, %v2884_v2 }
 0x702   :  { %v2897_v20 = vmax.f32 %v2889_v59, %v2892_v7 }
 0x703   :  { %v2900_v19 = vpop.permute.xlu0 %2899  ;;  %v2886_v17 = vpop.permute.xlu1 %2885 }
 0x704   :  { %v2905_v32 = vmax.f32 %v2897_v20, %v2900_v19  ;;  %v2890_v3 = vmax.f32 %v2863_v58, %v2886_v17 }
 0x707   :  { %v2908_v53 = vpop.permute.xlu0 %2907  ;;  %v2894_v63 = vpop.permute.xlu1 %2893 }
 0x708   :  { %v2913_v34 = vmax.f32 %v2905_v32, %v2908_v53  ;;  %v2898_v40 = vmax.f32 %v2890_v3, %v2894_v63 }
 0x70a   :  { %2915 = vst.msk [vmem:[#allocation7] sm:$0xff] %vm333_vm3, %v2913_v34 }
 0x70b   :  { %v3151_v27 = vpop.permute.xlu0 %3150  ;;  %v2902_v26 = vpop.permute.xlu1 %2901 }
 0x70c   :  { %v2906_v57 = vmax.f32 %v2898_v40, %v2902_v26  ;;  %v3156_v51 = vmax.f32 %v2862_v41, %v3151_v27 }
 0x70f   :  { %v3159_v42 = vpop.permute.xlu0 %3158  ;;  %v2910_v35 = vpop.permute.xlu1 %2909 }
 0x710   :  { %v2914_v12 = vmax.f32 %v2906_v57, %v2910_v35  ;;  %v3164_v50 = vmax.f32 %v3156_v51, %v3159_v42 }
 0x711   :  { %v2917_v6 = vld [vmem:[#allocation7] sm:$0xff] }
 0x712   :  { %2916 = vst.msk [vmem:[#allocation7 + $0x8] sm:$0xff] %vm333_vm3, %v2914_v12 }
 0x713   :  { %v3167_v39 = vpop.permute.xlu0 %3166  ;;  %v3153_v37 = vpop.permute.xlu1 %3152 }
 0x714   :  { %v3172_v30 = vmax.f32 %v3164_v50, %v3167_v39  ;;  %v3157_v56 = vmax.f32 %v2864_v4, %v3153_v37 }
 0x717   :  { %v3175_v28 = vpop.permute.xlu0 %3174  ;;  %v3161_v24 = vpop.permute.xlu1 %3160 }
 0x718   :  { %v3180_v29 = vmax.f32 %v3172_v30, %v3175_v28  ;;  %v3165_v31 = vmax.f32 %v3157_v56, %v3161_v24  ;;  %v7441_v30 = vld [vmem:[#allocation12_spill] sm:$0xff] }
 0x719   :  { %v2918_v16 = vld [vmem:[#allocation7 + $0x8] sm:$0xff] }
 0x71a   :  { %3182 = vst.msk [vmem:[#allocation7] sm:$0xff] %vm333_vm3, %v3180_v29  ;;  %v4197_v22 = vpack.i.bf16 %v2918_v16, %v2917_v6 }
 0x71b   :  { %v3169_v33 = vpop.permute.xlu1 %3168 }
 0x71c   :  { %4198 = vrot.lane.b32.xlu1 %v4197_v22, %s4353_s23  ;;  %4193 = vrot.lane.b32.xlu0 %v4197_v22, %s4380_s0  ;;  %v3173_v54 = vmax.f32 %v3165_v31, %v3169_v33 }
 0x71f   :  { %v3177_v62 = vpop.permute.xlu1 %3176 }
 0x720   :  { %v3181_v8 = vmax.f32 %v3173_v54, %v3177_v62  ;;  %4208 = vrot.lane.b32.xlu1 %v4197_v22, %s4358_s28  ;;  %4203 = vrot.lane.b32.xlu0 %v4197_v22, %s4382_s18 }
 0x721   :  { %v3184_v25 = vld [vmem:[#allocation7] sm:$0xff] }
 0x722   :  { %3183 = vst.msk [vmem:[#allocation7 + $0x8] sm:$0xff] %vm333_vm3, %v3181_v8  ;;  %vm7440_vm3 = vmmov %vm7439_vm0 }
 0x729   :  { %v3185_v45 = vld [vmem:[#allocation7 + $0x8] sm:$0xff] }
 0x72a   :  { %v4217_v13 = vpack.i.bf16 %v3185_v45, %v3184_v25 }
 0x72c   :  { %4218 = vrot.lane.b32.xlu1 %v4217_v13, %s4353_s23  ;;  %4213 = vrot.lane.b32.xlu0 %v4217_v13, %s4380_s0  ;;  %s4384_s23 = smov 16  }
 0x730   :  { %4228 = vrot.lane.b32.xlu1 %v4217_v13, %s4358_s28  ;;  %4223 = vrot.lane.b32.xlu0 %v4217_v13, %s4382_s18  ;;  %s4385_s28 = smov 32  }
 0x78e   :  { %v4194_v10 = vpop.permute.xlu0 %4193  ;;  %v4199_v23 = vpop.permute.xlu1 %4198 }
 0x78f   :  { %v4196_v48 = vunpack.i.h.bf16 %v4194_v10  ;;  %v4195_v60 = vunpack.i.l.bf16 %v4194_v10  ;;  %v4201_v46 = vunpack.i.h.bf16 %v4199_v23  ;;  %v4200_v38 = vunpack.i.l.bf16 %v4199_v23 }
 0x791   :  { %v2928_v52 = vmax.f32 %v2918_v16, %v4196_v48  ;;  %v2927_v61 = vmax.f32 %v2917_v6, %v4195_v60 }
 0x792   :  { %v4204_v5 = vpop.permute.xlu0 %4203  ;;  %v4209_v44 = vpop.permute.xlu1 %4208 }
 0x793   :  { %v2936_v18 = vmax.f32 %v2928_v52, %v4201_v46  ;;  %v2935_v58 = vmax.f32 %v2927_v61, %v4200_v38  ;;  %v4206_v11 = vunpack.i.h.bf16 %v4204_v5  ;;  %v4205_v47 = vunpack.i.l.bf16 %v4204_v5 }
 0x794   :  { %v4211_v41 = vunpack.i.h.bf16 %v4209_v44  ;;  %v4210_v1 = vunpack.i.l.bf16 %v4209_v44 }
 0x795   :  { %v2943_v36 = vmax.f32 %v2935_v58, %v4205_v47  ;;  %v2944_v14 = vmax.f32 %v2936_v18, %v4206_v11  ;;  %v4271_v18 = vld [vmem:[%s6984_s3 + $0x168] sm:$0xff]  }
 0x796   :  { %v4272_v58 = vld [vmem:[%s6984_s3 + $0x128] sm:$0xff]   ;;  %3915 = vmatprep.subr.bf16.mxu0 %v4271_v18 }
 0x797   :  { %v2951_v0 = vmax.f32 %v2943_v36, %v4210_v1  ;;  %v2952_v4 = vmax.f32 %v2944_v14, %v4211_v41  ;;  %3916 = vmatpush3.bf16.msra.mxu0 %v4272_v58  ;;  %v4273_v14 = vld [vmem:[%s6984_s3 + $0x160] sm:$0xff]  }
 0x798   :  { %v4274_v41 = vld [vmem:[%s6984_s3 + $0x120] sm:$0xff]   ;;  %3917 = vmatprep.subr.bf16.mxu0 %v4273_v14 }
 0x799   :  { %v2953_v7 = vpack.c.bf16 %v2952_v4, %v2951_v0 }
 0x79b   :  { %3999 = vmatmul.mubr.msk.bf16.vlgmr.msra.gmra.mxu1 %vm7439_vm0, %v2953_v7  ;;  %3918 = vmatpush3.bf16.msra.mxu0 %v4274_v41  ;;  %v4275_v7 = vld [vmem:[%s6984_s3 + $0x158] sm:$0xff]  }
 0x79c   :  { %4003 = vmatpush3.bf16.msra.mxu1 %v6752_v55  ;;  %4012 = vmatprep.mubr.msk.bf16.mxu1 %vm4377_vm2, %v4376_v43 }
 0x79d   :  { %4004 = vmatprep.subr.bf16.mxu1 %v4376_v43  ;;  %3919 = vmatprep.subr.bf16.mxu0 %v4275_v7  ;;  %v4294_v7 = vld [vmem:[%s6984_s3 + $0x170] sm:$0xff]  }
 0x79e   :  { %v4214_v2 = vpop.permute.xlu0 %4213  ;;  %v4219_v59 = vpop.permute.xlu1 %4218 }
 0x79f   :  { %v4216_v20 = vunpack.i.h.bf16 %v4214_v2  ;;  %v4215_v19 = vunpack.i.l.bf16 %v4214_v2  ;;  %v4221_v53 = vunpack.i.h.bf16 %v4219_v59  ;;  %v4220_v63 = vunpack.i.l.bf16 %v4219_v59  ;;  %v4276_v2 = vld [vmem:[%s6984_s3 + $0x118] sm:$0xff]  }
 0x7a0   :  { %4005 = vmatpush3.bf16.msra.mxu1 %v6758_v49  ;;  %3920 = vmatpush3.bf16.msra.mxu0 %v4276_v2  ;;  %v3423_v2 = vld [vmem:[%s6984_s3 + $0x1b0] sm:$0x1] }
 0x7a1   :  { %v3195_v17 = vmax.f32 %v3185_v45, %v4216_v20  ;;  %v3194_v32 = vmax.f32 %v3184_v25, %v4215_v19  ;;  %4006 = vmatprep.subr.bf16.mxu1 %v4376_v43 }
 0x7a2   :  { %v4224_v34 = vpop.permute.xlu0 %4223  ;;  %v4229_v40 = vpop.permute.xlu1 %4228 }
 0x7a3   :  { %v3203_v3 = vmax.f32 %v3195_v17, %v4221_v53  ;;  %v3202_v55 = vmax.f32 %v3194_v32, %v4220_v63  ;;  %v4226_v27 = vunpack.i.h.bf16 %v4224_v34  ;;  %v4225_v26 = vunpack.i.l.bf16 %v4224_v34  ;;  %v4277_v17 = vld [vmem:[%s6984_s3 + $0x150] sm:$0xff]   ;;  %v4279_v34 = vld [vmem:[%s6984_s3 + $0x148] sm:$0xff]  }
 0x7a4   :  { %4007 = vmatpush3.bf16.msra.mxu1 %v6767_v9  ;;  %v4231_v35 = vunpack.i.h.bf16 %v4229_v40  ;;  %v4230_v49 = vunpack.i.l.bf16 %v4229_v40  ;;  %v4383_v9 = vmov 1983009808   ;;  %v4278_v32 = vld [vmem:[%s6984_s3 + $0x110] sm:$0xff]   ;;  %3921 = vmatprep.subr.bf16.mxu0 %v4277_v17  ;;  %v4282_v40 = vld [vmem:[%s6984_s3 + $0x100] sm:$0xff]  }
 0x7a5   :  { %v3210_v57 = vmax.f32 %v3202_v55, %v4225_v26  ;;  %v3211_v42 = vmax.f32 %v3203_v3, %v4226_v27  ;;  %4008 = vmatprep.subr.bf16.mxu1 %v4376_v43  ;;  %v3032_v37 = vunpack.c.l.s4 %v4383_v9  ;;  %3922 = vmatpush3.bf16.msra.mxu0 %v4278_v32  ;;  %v4280_v3 = vld [vmem:[%s6984_s3 + $0x108] sm:$0xff]   ;;  %v4281_v26 = vld [vmem:[%s6984_s3 + $0x140] sm:$0xff]   ;;  %v4286_v9 = vld [vmem:[%s6984_s3 + $0xf0] sm:$0xff]  }
 0x7a6   :  { %3923 = vmatprep.subr.bf16.mxu0 %v4279_v34 }
 0x7a7   :  { %v3218_v12 = vmax.f32 %v3210_v57, %v4230_v49  ;;  %v3219_v51 = vmax.f32 %v3211_v42, %v4231_v35  ;;  %v3033_v50 = vunpack.c.0.s8 %v3032_v37  ;;  %v4283_v57 = vld [vmem:[%s6984_s3 + $0x138] sm:$0xff]  }
 0x7a8   :  { %4009 = vmatpush3.bf16.msra.mxu1 %v6775_v15  ;;  %v4284_v49 = vld [vmem:[%s6984_s3 + $0xf8] sm:$0xff]  }
 0x7a9   :  { %4010 = vmatprep.subr.bf16.mxu1 %v4376_v43  ;;  %v3220_v39 = vpack.c.bf16 %v3219_v51, %v3218_v12  ;;  %v6811_v28 = vsub.s32 %v3033_v50, %v7441_v30  ;;  %3924 = vmatpush3.bf16.msra.mxu0 %v4280_v3  ;;  %v4285_v12 = vld [vmem:[%s6984_s3 + $0x130] sm:$0xff]   ;;  %v4287_v50 = vld [vmem:[%s6984_s3 + $0x1a8] sm:$0xff]   ;;  %v4288_v30 = vld [vmem:[%s6984_s3 + $0x1a0] sm:$0xff]  }
 0x7aa   :  { %3925 = vmatprep.subr.bf16.mxu0 %v4281_v26  ;;  %v3831_v3 = vld [vmem:[%s6983_s2 + $0x11] ss:$0 sm:$0xff] }
 0x7ac   :  { %4011 = vmatpush3.bf16.msra.mxu1 %v6782_v21 }
 0x7ad   :  { %4016 = vmatprep.subr.bf16.mxu1 %v4376_v43  ;;  %3926 = vmatpush3.bf16.msra.mxu0 %v4282_v40 }
 0x7ae   :  { %3927 = vmatprep.subr.bf16.mxu0 %v4283_v57 }
 0x7af   :  { %4013 = vmatmul.mubr.msk.bf16.vlgmr.msra.gmra.mxu1 %vm7440_vm3, %v3220_v39 }
 0x7b0   :  { %4032 = vmatprep.mubr.msk.bf16.mxu1 %vm4377_vm2, %v4376_v43  ;;  %4017 = vmatpush3.bf16.msra.mxu1 %v4287_v50 }
 0x7b1   :  { %3928 = vmatpush3.bf16.msra.mxu0 %v4284_v49  ;;  %4018 = vmatprep.subr.bf16.mxu1 %v4376_v43  ;;  %v3840_v49 = vld [vmem:[%s6983_s2 + $0x12] ss:$0 sm:$0xff] }
 0x7b2   :  { %3929 = vmatprep.subr.bf16.mxu0 %v4285_v12 }
 0x7b4   :  { %4019 = vmatpush3.bf16.msra.mxu1 %v4288_v30 }
 0x7b5   :  { %3930 = vmatpush3.bf16.msra.mxu0 %v4286_v9  ;;  %4020 = vmatprep.subr.bf16.mxu1 %v4376_v43 }
 0x7b6   :  { %4036 = vmatprep.subr.bf16.mxu0 %v4376_v43 }
 0x85b   :  { %v3021_v15 = vpop.f32.mrf.mxu1 }
 0x85c   :  { %3029 = vst.msk [vmem:[#allocation8] sm:$0x1] %vm3028_vm7, %v3021_v15  ;;  %v3037_v24 = vrot.slane %v3021_v15, %v6811_v28  ;;  %v3058_v33 = vcombine.high %v3021_v15, %v3021_v15  ;;  %v4290_v15 = vld [vmem:[%s6984_s3 + $0x190] sm:$0xff]  }
 0x85d   :  { %v4000_v29 = vpop.f32.mrf.mxu1 }
 0x85e   :  { %v3796_v6 = vrot.slane %v3037_v24, 9  ;;  %v3045_v22 = vcombine.high %v3037_v24, %v3037_v24  ;;  %v3065_v54 = vrot.slane %v3058_v33, %v6811_v28  ;;  %v4291_v24 = vld [vmem:[%s6984_s3 + $0x188] sm:$0xff]  }
 0x85f   :  { %v3024_v16 = vpop.f32.mrf.mxu1 }
 0x860   :  { %3091 = vst.msk [vmem:[#allocation8 + $0x2] sm:$0x1] %vm3028_vm7, %v3024_v16  ;;  %v3099_v21 = vrot.slane %v3024_v16, %v6811_v28  ;;  %3040 = vrot.lane.b32.xlu0 %v3796_v6, %s4384_s23  ;;  %v3117_v8 = vcombine.high %v3024_v16, %v3024_v16  ;;  %v3797_v45 = vrot.slane %v3045_v22, 9  ;;  %v3798_v13 = vrot.slane %v3065_v54, 9 }
 0x861   :  { %v4001_v56 = vpop.f32.mrf.mxu1  ;;  %v3078_v60 = vcombine.high %v3065_v54, %v3065_v54 }
 0x862   :  { %v3800_v31 = vrot.slane %v3099_v21, 9  ;;  %v3106_v62 = vcombine.high %v3099_v21, %v3099_v21  ;;  %v3124_v25 = vrot.slane %v3117_v8, %v6811_v28 }
 0x863   :  { %v3799_v5 = vrot.slane %v3078_v60, 9 }
 0x864   :  { %3046 = vrot.lane.b32.xlu0 %v3045_v22, %s4385_s28  ;;  %3102 = vrot.lane.b32.xlu1 %v3800_v31, %s4384_s23  ;;  %v3801_v10 = vrot.slane %v3106_v62, 9  ;;  %v3802_v52 = vrot.slane %v3124_v25, 9  ;;  %v3135_v44 = vcombine.high %v3124_v25, %v3124_v25 }
 0x866   :  { %v3803_v36 = vrot.slane %v3135_v44, 9 }
 0x868   :  { %3066 = vrot.lane.b32.xlu0 %v3065_v54, %s4386_s29  ;;  %3107 = vrot.lane.b32.xlu1 %v3106_v62, %s4385_s28 }
 0x86c   :  { %3053 = vrot.lane.b32.xlu0 %v3797_v45, %s4387_s30  ;;  %3125 = vrot.lane.b32.xlu1 %v3124_v25, %s4386_s29 }
 0x86f   :  { %v3258_v23 = vpop.f32.mrf.mxu1 }
 0x870   :  { %3265 = vst.msk [vmem:[#allocation8 + $0x1] sm:$0x1] %vm3028_vm7, %v3258_v23  ;;  %3073 = vrot.lane.b32.xlu0 %v3798_v13, %s4362_s6  ;;  %3113 = vrot.lane.b32.xlu1 %v3801_v10, %s4387_s30  ;;  %v3273_v38 = vrot.slane %v3258_v23, %v6811_v28  ;;  %v3291_v0 = vcombine.high %v3258_v23, %v3258_v23 }
 0x871   :  { %v4014_v48 = vpop.f32.mrf.mxu1 }
 0x872   :  { %v3805_v11 = vrot.slane %v3273_v38, 9  ;;  %v3280_v1 = vcombine.high %v3273_v38, %v3273_v38  ;;  %v3298_v59 = vrot.slane %v3291_v0, %v6811_v28  ;;  %v4292_v0 = vld [vmem:[%s6984_s3 + $0x180] sm:$0xff]  }
 0x873   :  { %v3261_v61 = vpop.f32.mrf.mxu1 }
 0x874   :  { %3320 = vst.msk [vmem:[#allocation8 + $0x3] sm:$0x1] %vm3028_vm7, %v3261_v61  ;;  %3079 = vrot.lane.b32.xlu0 %v3078_v60, %s4388_s5  ;;  %3131 = vrot.lane.b32.xlu1 %v3802_v52, %s4362_s6  ;;  %v3328_v47 = vrot.slane %v3261_v61, %v6811_v28  ;;  %v3346_v19 = vcombine.high %v3261_v61, %v3261_v61  ;;  %v3806_v63 = vrot.slane %v3280_v1, 9  ;;  %v3807_v55 = vrot.slane %v3298_v59, 9 }
 0x875   :  { %v4015_v46 = vpop.f32.mrf.mxu1  ;;  %v3309_v42 = vcombine.high %v3298_v59, %v3298_v59 }
 0x876   :  { %v3809_v4 = vrot.slane %v3328_v47, 9  ;;  %v3335_v20 = vcombine.high %v3328_v47, %v3328_v47  ;;  %v3353_v53 = vrot.slane %v3346_v19, %v6811_v28  ;;  %v4289_v28 = vld [vmem:[%s6984_s3 + $0x198] sm:$0xff]  }
 0x877   :  { %v3808_v51 = vrot.slane %v3309_v42, 9  ;;  %4021 = vmatpush3.bf16.msra.mxu1 %v4289_v28 }
 0x878   :  { %3086 = vrot.lane.b32.xlu0 %v3799_v5, %s4389_s8  ;;  %3136 = vrot.lane.b32.xlu1 %v3135_v44, %s4388_s5  ;;  %v3810_v27 = vrot.slane %v3335_v20, 9  ;;  %v3811_v35 = vrot.slane %v3353_v53, 9  ;;  %v3364_v39 = vcombine.high %v3353_v53, %v3353_v53 }
 0x879   :  { %4022 = vmatprep.subr.bf16.mxu1 %v4376_v43 }
 0x87a   :  { %v3812_v37 = vrot.slane %v3364_v39, 9 }
 0x87b   :  { %4023 = vmatpush3.bf16.msra.mxu1 %v4290_v15 }
 0x87c   :  { %3142 = vrot.lane.b32.xlu1 %v3803_v36, %s4389_s8  ;;  %3276 = vrot.lane.b32.xlu0 %v3805_v11, %s4384_s23 }
 0x87d   :  { %4024 = vmatprep.subr.bf16.mxu1 %v4376_v43 }
 0x87f   :  { %4025 = vmatpush3.bf16.msra.mxu1 %v4291_v24 }
 0x880   :  { %3281 = vrot.lane.b32.xlu0 %v3280_v1, %s4385_s28  ;;  %3331 = vrot.lane.b32.xlu1 %v3809_v4, %s4384_s23  ;;  %v4293_v4 = vld [vmem:[%s6984_s3 + $0x178] sm:$0xff]  }
 0x881   :  { %4026 = vmatprep.subr.bf16.mxu1 %v4376_v43 }
 0x883   :  { %4027 = vmatpush3.bf16.msra.mxu1 %v4292_v0 }
 0x884   :  { %3299 = vrot.lane.b32.xlu0 %v3298_v59, %s4386_s29  ;;  %3336 = vrot.lane.b32.xlu1 %v3335_v20, %s4385_s28  ;;  %v3814_v20 = vld [vmem:[%s6983_s2 + $0x10] ss:$0 sm:$0xff]  ;;  %s4390_s2 = smov [#allocation9]  }
 0x885   :  { %4028 = vmatprep.subr.bf16.mxu1 %v4376_v43  ;;  %s3740_s25 = sshll.u32 %s4390_s2, 4  ;;  %s3741_s25 = int_to_ptr.vmem [resolvable:$true] %s3740_s25 }
 0x886   :  { %s4302_s24 = scalar_lea.vmem %s3741_s25, 32  ;;  %p4307_p1 = scmp.lt.s32.totalorder %s3741_s25, %s3741_s25 }
 0x887   :  { %4029 = vmatpush3.bf16.msra.mxu1 %v4293_v4  ;;  %p4303_p0 = scmp.ne.s32.totalorder %s3741_s25, %s4302_s24  ;;  %p4308_p2 = scmp.lt.s32.totalorder %s4302_s24, %s4302_s24 }
 0x888   :  { %3287 = vrot.lane.b32.xlu0 %v3806_v63, %s4387_s30  ;;  %3354 = vrot.lane.b32.xlu1 %v3353_v53, %s4386_s29 }
 0x889   :  { %4030 = vmatprep.subr.bf16.mxu1 %v4376_v43  ;;  %p4309_p3 = por %p4308_p2, %p4307_p1 }
 0x88b   :  { %4031 = vmatpush3.bf16.msra.mxu1 %v4294_v7  ;;  %p4310_p4 = pnand %p4309_p3, %p4303_p0 }
 0x88c   :  { %3305 = vrot.lane.b32.xlu0 %v3807_v55, %s4362_s6  ;;  %3342 = vrot.lane.b32.xlu1 %v3810_v27, %s4387_s30 }
 0x890   :  { %3310 = vrot.lane.b32.xlu0 %v3309_v42, %s4388_s5  ;;  %3360 = vrot.lane.b32.xlu1 %v3811_v35, %s4362_s6 }
 0x894   :  { %3316 = vrot.lane.b32.xlu0 %v3808_v51, %s4389_s8  ;;  %3365 = vrot.lane.b32.xlu1 %v3364_v39, %s4388_s5 }
 0x898   :  { %3371 = vrot.lane.b32.xlu1 %v3812_v37, %s4389_s8 }
 0x8d2   :  { %v3041_v29 = vpop.permute.xlu0 %3040 }
 0x8d3   :  { %3044 = vst.msk [vmem:[#allocation8] sm:$0x1] %vm3043_vm8, %v3041_v29 }
 0x8d6   :  { %v3047_v6 = vpop.permute.xlu0 %3046  ;;  %v3103_v16 = vpop.permute.xlu1 %3102 }
 0x8d7   :  { %3050 = vst.msk [vmem:[#allocation8] sm:$0x1] %vm3049_vm9, %v3047_v6 }
 0x8d8   :  { %3105 = vst.msk [vmem:[#allocation8 + $0x2] sm:$0x1] %vm3043_vm8, %v3103_v16 }
 0x8da   :  { %v3067_v21 = vpop.permute.xlu0 %3066  ;;  %v3108_v56 = vpop.permute.xlu1 %3107 }
 0x8db   :  { %3110 = vst.msk [vmem:[#allocation8 + $0x2] sm:$0x1] %vm3049_vm9, %v3108_v56 }
 0x8de   :  { %v3054_v22 = vpop.permute.xlu0 %3053  ;;  %v3126_v33 = vpop.permute.xlu1 %3125 }
 0x8df   :  { %3057 = vst.msk [vmem:[#allocation8] sm:$0x1] %vm3056_vm10, %v3054_v22 }
 0x8e0   :  { %3070 = vst.msk [vmem:[#allocation8] sm:$0x1] %vm3069_vm12, %v3067_v21 }
 0x8e2   :  { %v3074_v31 = vpop.permute.xlu0 %3073  ;;  %v3114_v54 = vpop.permute.xlu1 %3113 }
 0x8e3   :  { %3077 = vst.msk [vmem:[#allocation8] sm:$0x1] %vm3076_vm11, %v3074_v31 }
 0x8e4   :  { %3116 = vst.msk [vmem:[#allocation8 + $0x2] sm:$0x1] %vm3056_vm10, %v3114_v54 }
 0x8e5   :  { %3128 = vst.msk [vmem:[#allocation8 + $0x2] sm:$0x1] %vm3069_vm12, %v3126_v33 }
 0x8e6   :  { %v3080_v62 = vpop.permute.xlu0 %3079  ;;  %v3132_v8 = vpop.permute.xlu1 %3131 }
 0x8e7   :  { %3083 = vst.msk [vmem:[#allocation8] sm:$0x1] %vm3082_vm14, %v3080_v62 }
 0x8e8   :  { %3134 = vst.msk [vmem:[#allocation8 + $0x2] sm:$0x1] %vm3076_vm11, %v3132_v8 }
 0x8ea   :  { %v3087_v25 = vpop.permute.xlu0 %3086  ;;  %v3137_v45 = vpop.permute.xlu1 %3136 }
 0x8eb   :  { %3090 = vst.msk [vmem:[#allocation8] sm:$0x1] %vm3089_vm13, %v3087_v25 }
 0x8ec   :  { %3139 = vst.msk [vmem:[#allocation8 + $0x2] sm:$0x1] %vm3082_vm14, %v3137_v45 }
 0x8ee   :  { %v3143_v13 = vpop.permute.xlu1 %3142  ;;  %v3277_v10 = vpop.permute.xlu0 %3276 }
 0x8ef   :  { %3145 = vst.msk [vmem:[#allocation8 + $0x2] sm:$0x1] %vm3089_vm13, %v3143_v13 }
 0x8f0   :  { %3279 = vst.msk [vmem:[#allocation8 + $0x1] sm:$0x1] %vm3043_vm8, %v3277_v10 }
 0x8f2   :  { %v3282_v23 = vpop.permute.xlu0 %3281  ;;  %v3332_v48 = vpop.permute.xlu1 %3331 }
 0x8f3   :  { %3284 = vst.msk [vmem:[#allocation8 + $0x1] sm:$0x1] %vm3049_vm9, %v3282_v23 }
 0x8f4   :  { %3334 = vst.msk [vmem:[#allocation8 + $0x3] sm:$0x1] %vm3043_vm8, %v3332_v48 }
 0x8f6   :  { %v3300_v60 = vpop.permute.xlu0 %3299  ;;  %v3337_v52 = vpop.permute.xlu1 %3336 }
 0x8f7   :  { %3339 = vst.msk [vmem:[#allocation8 + $0x3] sm:$0x1] %vm3049_vm9, %v3337_v52 }
 0x8fa   :  { %v3288_v61 = vpop.permute.xlu0 %3287  ;;  %v3355_v46 = vpop.permute.xlu1 %3354 }
 0x8fb   :  { %3290 = vst.msk [vmem:[#allocation8 + $0x1] sm:$0x1] %vm3056_vm10, %v3288_v61 }
 0x8fc   :  { %3302 = vst.msk [vmem:[#allocation8 + $0x1] sm:$0x1] %vm3069_vm12, %v3300_v60 }
 0x8fe   :  { %v3306_v38 = vpop.permute.xlu0 %3305  ;;  %v3343_v5 = vpop.permute.xlu1 %3342 }
 0x8ff   :  { %3308 = vst.msk [vmem:[#allocation8 + $0x1] sm:$0x1] %vm3076_vm11, %v3306_v38 }
 0x900   :  { %3345 = vst.msk [vmem:[#allocation8 + $0x3] sm:$0x1] %vm3056_vm10, %v3343_v5 }
 0x901   :  { %3357 = vst.msk [vmem:[#allocation8 + $0x3] sm:$0x1] %vm3069_vm12, %v3355_v46 }
 0x902   :  { %v3311_v44 = vpop.permute.xlu0 %3310  ;;  %v3361_v18 = vpop.permute.xlu1 %3360 }
 0x903   :  { %3313 = vst.msk [vmem:[#allocation8 + $0x1] sm:$0x1] %vm3082_vm14, %v3311_v44 }
 0x904   :  { %3363 = vst.msk [vmem:[#allocation8 + $0x3] sm:$0x1] %vm3076_vm11, %v3361_v18 }
 0x906   :  { %v3317_v58 = vpop.permute.xlu0 %3316  ;;  %v3366_v11 = vpop.permute.xlu1 %3365 }
 0x907   :  { %3319 = vst.msk [vmem:[#allocation8 + $0x1] sm:$0x1] %vm3089_vm13, %v3317_v58 }
 0x908   :  { %3368 = vst.msk [vmem:[#allocation8 + $0x3] sm:$0x1] %vm3082_vm14, %v3366_v11 }
 0x90a   :  { %v3372_v47 = vpop.permute.xlu1 %3371 }
 0x90b   :  { %3374 = vst.msk [vmem:[#allocation8 + $0x3] sm:$0x1] %vm3089_vm13, %v3372_v47 }
 0x912   :  { %v3813_v36 = vld.sshfl [vmem:[#allocation8] sm:$0x33 pattern:$0x76325410] }
 0x913   :  { %v3436_v14 = vcombine.high %v3813_v36, %v3813_v36  ;;  %v3439_v1 = vpack.c.bf16 %v3813_v36, %v3813_v36 }
 0x915   :  { %v3440_v41 = vpack.c.bf16 %v3436_v14, %v3436_v14 }
 0x917   :  { %3573 = vmatprep.mubr.bf16.mxu0 %v3440_v41 }
 0x918   :  { %3574 = vmatmul.mubr.bf16.vlgmr.msra.gmra.mxu0 %v3439_v1 }
 0x919   :  { %4038 = vmatprep.mubr.msk.bf16.mxu0 %vm4377_vm2, %v4376_v43  ;;  %4037 = vmatpush3.bf16.xpose.msra.mxu0 %v3423_v2  ;;  %vm3721_vm2 = vcmask 9216  }
 0x9d8   :  { %v3931_v59 = vpop.f32.mrf.mxu0 }
 0x9da   :  { %v3932_v19 = vpop.f32.mrf.mxu0 }
 0x9db   :  { %v3933_v17 = vadd.f32 %v3932_v19, %v3931_v59 }
 0x9dc   :  { %v3934_v32 = vpop.f32.mrf.mxu0 }
 0x9dd   :  { %v3576_v53 = vadd.f32 %v3933_v17, %v3814_v20 }
 0x9de   :  { %v3935_v43 = vpop.f32.mrf.mxu0 }
 0x9df   :  { %v3581_v63 = vmax.f32 %v3576_v53, 0.0 }
 0x9e1   :  { %v3582_v34 = vpack.c.bf16 %v3581_v63, %v3581_v63 }
 0x9e3   :  { %4033 = vmatmul.mubr.bf16.vlgmr.msra.gmra.mxu1 %v3582_v34 }
 0xaa3   :  { %v3669_v55 = vpop.f32.mrf.mxu1 }
 0xaa4   :  { %v3670_v27 = vadd.f32 %v3831_v3, %v3669_v55 }
 0xaa5   :  { %v4034_v26 = vpop.f32.mrf.mxu1 }
 0xaa6   :  { %v3675_v40 = vmax.f32 %v3670_v27, 0.0 }
 0xaa7   :  { %v3672_v57 = vpop.f32.mrf.mxu1 }
 0xaa8   :  { %v3676_v42 = vpack.c.bf16 %v3675_v40, %v3675_v40 }
 0xaa9   :  { %v4035_v35 = vpop.f32.mrf.mxu1 }
 0xaaa   :  { %4039 = vmatmul.mubr.bf16.vlgmr.msra.gmra.mxu0 %v3676_v42 }
 0xb6a   :  { %v3715_v12 = vpop.f32.mrf.mxu0 }
 0xb6b   :  { %v3716_v51 = vadd.f32 %v3840_v49, %v3715_v12 }
 0xb6c   :  { %v4040_v39 = vpop.f32.mrf.mxu0 }
 0xb6d   :  { %v3722_v9 = vsel %vm3721_vm2, %v3716_v51, -inf }
 0xb6e   :  { %3723 = vmax.xlane.f32.xlu0 %v3722_v9  ;;  %v3718_v37 = vpop.f32.mrf.mxu0 }
 0xb70   :  { %v4041_v50 = vpop.f32.mrf.mxu0 }
 0xbf7   :  { %v3724_v30 = vpop.xlane.xlu0 %3723 }
 0xbf8   :  { %v3725_v28 = vsub.f32 %v3716_v51, %v3724_v30 }
 0xbfa   :  { %v3726_v15 = vmul.f32 1.442695, %v3725_v28 }
 0xbfc   :  { %4295 = vpow2.f32 %v3726_v15 }
 0xc09   :  { %v4296_v24 = vpop.eup %4295 }
 0xc0a   :  { %v3728_v29 = vsel %vm3721_vm2, %v4296_v24, 0.0 }
 0xc0b   :  { %3729 = vadd.xlane.f32.xlu1 %v3728_v29 }
 0xc94   :  { %v3730_v6 = vpop.xlane.xlu1 %3729 }
 0xc95   :  { %4297 = vrcp.f32 %v3730_v6 }
 0xca2   :  { %v4298_v16 = vpop.eup %4297 }
 0xca3   :  { %v3732_v21 = vmul.f32 %v4298_v16, %v4296_v24 }
 0xca5   :  { %3733 = vst.msk [vmem:[#allocation9] sm:$0x3] %vm3721_vm2, %v3732_v21 }
 0xca6   :  { %4313 = shalt.err (!%p4310_p4)
}
 0xca7   :  { %3743 = dma.vmem_to_hbm [thread:$0]  %s3741_s25, 32, %s6985_s4, [#allocation10]  }
 0xca8   :  { %4322 = dma.done.wait [#allocation10], 32  }
 0xca9   :  { %4323 = vsyncadd [#allocation10], 4294967264 }
 0xcaa   :  { %3747 = vsyncpa [#allocation10], 1 }

</bundles_post_ra>
